<compile_context>
chip_gen: v5e
topology: v5e:2x2
jax: 0.10.0
libtpu: 0.0.40
codegen_flags: <defaults>
</compile_context>

<pallas_src>
import functools

import jax
import jax.numpy as jnp
from jax.experimental import pallas as pl
from jax.experimental.pallas import tpu as pltpu

LANE = 128
SUBLANE = 8


def _round_up(x, m):
    return (x + m - 1) // m * m


# ----------------------------- fused Pallas kernel -----------------------------------

def _make_fused_tcn_kernel(NB, L, Cp, K, block_cfg, out_real, Op, maxpad_al):
    """Fused TCN forward for one batch tile.

    Positional refs:
      x_ref (NB, L, Cp) f32
      per block: w1 (T1, Cp) bf16, b1 (1, Cp) f32, w2 (T2, Cp) bf16, b2 (1, Cp) f32
                 [+ wd (Cp, Cp) bf16, bd (1, Cp) f32 if the block has a downsample conv]
      wl (Cp, Op) f32, bl (1, Op) f32
      o_ref (NB, Op) f32
      xpad_ref scratch (NB, maxpad_al + L, Cp) f32
    """

    def kernel(*refs):
        idx = 0
        x_ref = refs[idx]; idx += 1
        blk_refs = []
        for cfg in block_cfg:
            n = 6 if cfg["has_ds"] else 4
            blk_refs.append(refs[idx:idx + n]); idx += n
        wl_ref = refs[idx]; bl_ref = refs[idx + 1]; idx += 2
        o_ref = refs[idx]; idx += 1
        xpad_ref = refs[idx]

        # Halo rows [0:maxpad_al) are the causal left zero-padding for every conv; the
        # convs only ever write rows [maxpad_al:], so zeroing just the halo is enough.
        # (Zeroed every step so it is also correct when the grid is sharded over cores.)
        xpad_ref[:, :maxpad_al, :] = jnp.zeros((NB, maxpad_al, Cp), jnp.float32)

        def dilated_conv(act, w_ref, b_ref, dilation, cw):
            # act: (NB, L, Cp) f32, real channels in lanes [0:cw), lanes >= cw are zero.
            # Returns (NB*L, Cp) f32 conv output (bias added, no activation).
            pad = (K - 1) * dilation
            base = maxpad_al - pad
            # Tile-aligned, unmasked store (maxpad_al % 8 == 0).
            xpad_ref[:, maxpad_al:maxpad_al + L, :] = act
            if K * cw <= LANE:
                # Pack the K shifted windows into ONE 128-lane operand: window k's real
                # channels land in lanes [k*cw, (k+1)*cw).  Lanes >= cw of every window
                # are zero, so the lane-roll wraparound is zero and the adds are an
                # exact disjoint merge (roll runs on the otherwise-idle XLU slot).
                taps = xpad_ref[:, base:base + L, :]
                for k in range(1, K):
                    win = xpad_ref[:, base + k * dilation: base + k * dilation + L, :]
                    taps = taps + pltpu.roll(win, k * cw, axis=2)
                if Cp > LANE:
                    taps = taps[:, :, :LANE]
                kdim = LANE
            else:
                # Fallback for wide layers (K * C_real > 128): full-width contraction.
                taps = jnp.concatenate(
                    [xpad_ref[:, base + k * dilation: base + k * dilation + L, :]
                     for k in range(K)], axis=-1)
                kdim = K * Cp
            h = jnp.dot(taps.reshape(NB * L, kdim).astype(jnp.bfloat16), w_ref[...],
                        preferred_element_type=jnp.float32)
            return h + b_ref[...]                                   # (NB*L, Cp) f32

        x = x_ref[...].astype(jnp.float32)                          # (NB, L, Cp)
        for cfg, brefs in zip(block_cfg, blk_refs):
            d = cfg["dilation"]
            ci, co = cfg["in_ch"], cfg["out_ch"]
            if cfg["has_ds"]:
                w1_ref, b1_ref, w2_ref, b2_ref, wd_ref, bd_ref = brefs
                # residual branch from the block INPUT (1x1 conv, no activation)
                res = jnp.dot(x.reshape(NB * L, Cp).astype(jnp.bfloat16), wd_ref[...],
                              preferred_element_type=jnp.float32) + bd_ref[...]
            else:
                w1_ref, b1_ref, w2_ref, b2_ref = brefs
                res = x.reshape(NB * L, Cp)
            # conv1 -> chomp -> ReLU (dropout = identity at inference)
            h = jnp.maximum(dilated_conv(x, w1_ref, b1_ref, d, ci), 0.0)
            # conv2 -> chomp -> ReLU, then ReLU(out + res)
            h2 = jnp.maximum(dilated_conv(h.reshape(NB, L, Cp), w2_ref, b2_ref, d, co), 0.0)
            x = jnp.maximum(h2 + res, 0.0).reshape(NB, L, Cp)

        # head: last time step -> Linear -> log_softmax(dim=1), all f32, padded lanes masked.
        last = x[:, L - 1, :]                                       # (NB, Cp)
        logits = jnp.dot(last, wl_ref[...],
                         preferred_element_type=jnp.float32) + bl_ref[...]
        col = jax.lax.broadcasted_iota(jnp.int32, (NB, Op), 1)
        logits = jnp.where(col < out_real, logits, -1e30)
        m = jnp.max(logits, axis=1, keepdims=True)
        z = logits - m
        lse = jnp.log(jnp.sum(jnp.exp(z), axis=1, keepdims=True))
        o_ref[...] = z - lse

    return kernel


# ----------------------------- params -------------------------------------------------

def init_params(key, input_size, output_size, num_channels, kernel_size):
    """Deterministic synthetic init, original shapes (weight_norm folded)."""
    params = {"blocks": []}
    for i, out_ch in enumerate(num_channels):
        in_ch = input_size if i == 0 else num_channels[i - 1]
        key, k1, k2, k3, k4, k5, k6 = jax.random.split(key, 7)
        blk = {
            "w1": jax.random.normal(k1, (kernel_size, in_ch, out_ch), jnp.float32)
                  / jnp.sqrt(kernel_size * in_ch),
            "b1": jax.random.normal(k2, (1, out_ch), jnp.float32) * 0.1,
            "w2": jax.random.normal(k3, (kernel_size, out_ch, out_ch), jnp.float32)
                  / jnp.sqrt(kernel_size * out_ch),
            "b2": jax.random.normal(k4, (1, out_ch), jnp.float32) * 0.1,
        }
        if in_ch != out_ch:  # downsample 1x1 conv (same condition as the PyTorch module)
            blk["wd"] = jax.random.normal(k5, (1, in_ch, out_ch), jnp.float32) / jnp.sqrt(in_ch)
            blk["bd"] = jax.random.normal(k6, (1, out_ch), jnp.float32) * 0.1
        else:
            blk["wd"] = None
            blk["bd"] = None
        params["blocks"].append(blk)
    key, kw, kb = jax.random.split(key, 3)
    params["wl"] = jax.random.normal(kw, (num_channels[-1], output_size), jnp.float32) \
                   / jnp.sqrt(num_channels[-1])
    params["bl"] = jax.random.normal(kb, (1, output_size), jnp.float32) * 0.1
    return params


def pack_params(params, input_size, output_size, num_channels, kernel_size):
    """Pad channels to 128 lanes, tap-pack the conv weights for the single 128-wide MXU
    contraction per conv, and pre-cast conv weights to bf16.  Done once, offline."""
    K = kernel_size
    Cp = _round_up(max([input_size] + list(num_channels)), LANE)
    Op = _round_up(output_size, LANE)

    def pack_conv_w(w, cin, cout):          # (K, cin, cout) -> (T, Cp) bf16
        if K * cin <= LANE:
            # tap-packed layout: row k*cin + c holds w[k, c, :]
            wp = jnp.zeros((LANE, Cp), jnp.float32)
            wp = wp.at[:K * cin, :cout].set(w.reshape(K * cin, cout))
        else:
            wp = jnp.zeros((K, Cp, Cp), jnp.float32).at[:, :cin, :cout].set(w)
            wp = wp.reshape(K * Cp, Cp)
        return wp.astype(jnp.bfloat16)

    def pad_b(b, cout):                     # (1, cout) -> (1, Cp) f32
        return jnp.zeros((1, Cp), jnp.float32).at[:, :cout].set(b)

    packed = {"blocks": []}
    for i, blk in enumerate(params["blocks"]):
        in_ch = input_size if i == 0 else num_channels[i - 1]
        out_ch = num_channels[i]
        pb = {
            "w1": pack_conv_w(blk["w1"], in_ch, out_ch),
            "b1": pad_b(blk["b1"], out_ch),
            "w2": pack_conv_w(blk["w2"], out_ch, out_ch),
            "b2": pad_b(blk["b2"], out_ch),
        }
        if blk["wd"] is not None:
            pb["wd"] = (jnp.zeros((Cp, Cp), jnp.float32)
                        .at[:in_ch, :out_ch].set(blk["wd"][0]).astype(jnp.bfloat16))
            pb["bd"] = pad_b(blk["bd"], out_ch)
        packed["blocks"].append(pb)
    packed["wl"] = (jnp.zeros((Cp, Op), jnp.float32)
                    .at[:num_channels[-1], :output_size].set(params["wl"]))
    packed["bl"] = jnp.zeros((1, Op), jnp.float32).at[:, :output_size].set(params["bl"])
    return packed


# ----------------------------- forward wrapper ----------------------------------------

def tcn_model_forward(x_ncl, packed, *, input_size, output_size, num_channels,
                      kernel_size, batch_tile=8):
    """Inputs have dimension (N, C_in, L_in) like the PyTorch module."""
    N, C_in, L = x_ncl.shape
    K = kernel_size
    n_blocks = len(num_channels)
    Cp = _round_up(max([input_size] + list(num_channels)), LANE)
    Op = _round_up(output_size, LANE)
    NB = batch_tile            # raise to 16 on v6e/v7x when the real batch allows (MXU fill)
    Np = _round_up(max(N, NB), NB)
    # Causal left halo, rounded up to a sublane tile so the per-conv activation store into
    # the scratch is tile-aligned (12 -> 16 here).
    maxpad = (K - 1) * (2 ** (n_blocks - 1))
    maxpad_al = _round_up(maxpad, SUBLANE)

    # boundary glue: NCL -> NLC (channels on lanes), pad batch + channels to alignment
    x = jnp.transpose(x_ncl, (0, 2, 1)).astype(jnp.float32)          # (N, L, C_in)
    x = jnp.pad(x, ((0, Np - N), (0, 0), (0, Cp - C_in)))            # (Np, L, Cp)

    block_cfg = []
    for i, out_ch in enumerate(num_channels):
        in_ch = input_size if i == 0 else num_channels[i - 1]
        block_cfg.append({"dilation": 2 ** i, "in_ch": in_ch, "out_ch": out_ch,
                          "has_ds": in_ch != out_ch})

    kernel = _make_fused_tcn_kernel(NB, L, Cp, K, block_cfg, output_size, Op, maxpad_al)

    def full_spec(shape):
        nd = len(shape)
        return pl.BlockSpec(shape, lambda i, nd=nd: (0,) * nd)

    inputs = [x]
    in_specs = [pl.BlockSpec((NB, L, Cp), lambda i: (i, 0, 0))]
    for cfg, pb in zip(block_cfg, packed["blocks"]):
        names = ["w1", "b1", "w2", "b2"] + (["wd", "bd"] if cfg["has_ds"] else [])
        for nm in names:
            inputs.append(pb[nm])
            in_specs.append(full_spec(pb[nm].shape))
    inputs += [packed["wl"], packed["bl"]]
    in_specs += [full_spec(packed["wl"].shape), full_spec(packed["bl"].shape)]

    out = pl.pallas_call(
        kernel,
        out_shape=jax.ShapeDtypeStruct((Np, Op), jnp.float32),
        grid_spec=pltpu.PrefetchScalarGridSpec(
            num_scalar_prefetch=0,
            grid=(Np // NB,),
            in_specs=in_specs,
            out_specs=pl.BlockSpec((NB, Op), lambda i: (i, 0)),
            scratch_shapes=[pltpu.VMEM((NB, maxpad_al + L, Cp), jnp.float32)],
        ),
        compiler_params=pltpu.CompilerParams(
            dimension_semantics=("parallel",),
            vmem_limit_bytes=64 * 1024 * 1024),
    )(*inputs)
    return out[:N, :output_size]


# ----------------------------- pure-JAX reference --------------------------------------

def reference_forward(x_ncl, params, *, num_channels, kernel_size):
    """Pure-JAX reference mirroring the kernel's (bf16 operand, f32 accumulate) math."""
    K = kernel_size
    x = jnp.transpose(x_ncl, (0, 2, 1)).astype(jnp.float32)          # (N, L, C_in)
    N, L, _ = x.shape
    for i, blk in enumerate(params["blocks"]):
        d = 2 ** i

        def conv(a, w, b):
            pad = (K - 1) * d
            ap = jnp.pad(a, ((0, 0), (pad, 0), (0, 0)))
            out = jnp.zeros((N, L, w.shape[2]), jnp.float32)
            for k in range(K):
                out = out + jnp.dot(ap[:, k * d:k * d + L, :].astype(jnp.bfloat16),
                                    w[k].astype(jnp.bfloat16),
                                    preferred_element_type=jnp.float32)
            return out + b

        if blk["wd"] is not None:
            res = jnp.dot(x.astype(jnp.bfloat16), blk["wd"][0].astype(jnp.bfloat16),
                          preferred_element_type=jnp.float32) + blk["bd"]
        else:
            res = x
        h = jax.nn.relu(conv(x, blk["w1"], blk["b1"]))
        h2 = jax.nn.relu(conv(h, blk["w2"], blk["b2"]))
        x = jax.nn.relu(h2 + res)
    logits = jnp.dot(x[:, -1, :], params["wl"]) + params["bl"]
    return jax.nn.log_softmax(logits, axis=1)


# ----------------------------- main ----------------------------------------------------

if __name__ == "__main__":
    N = 2            # batch
    C_IN = 4         # input_size (channels)
    L = 16           # sequence length
    NUM_CHANNELS = [8, 8]
    OUTPUT_SIZE = 3
    KERNEL_SIZE = 7
    # TODO(synk): dropout(p=0.05) and the weight_norm reparametrization are training-time
    # constructs; the inference forward (identity dropout, folded weights) is implemented.

    key = jax.random.PRNGKey(0)
    key, kx = jax.random.split(key)
    x = jax.random.normal(kx, (N, C_IN, L), jnp.float32)   # (N, C_in, L_in) like PyTorch

    params = init_params(key, C_IN, OUTPUT_SIZE, NUM_CHANNELS, KERNEL_SIZE)
    packed = pack_params(params, C_IN, OUTPUT_SIZE, NUM_CHANNELS, KERNEL_SIZE)

    fwd = jax.jit(functools.partial(
        tcn_model_forward,
        input_size=C_IN, output_size=OUTPUT_SIZE,
        num_channels=NUM_CHANNELS, kernel_size=KERNEL_SIZE))
    out = jax.block_until_ready(fwd(x, packed))

    assert out.shape == (N, OUTPUT_SIZE)
    assert bool(jnp.all(jnp.isfinite(out)))
    # log_softmax rows should sum to ~1 in probability space
    assert bool(jnp.allclose(jnp.sum(jnp.exp(out), axis=1), 1.0, atol=1e-5))
    # correctness vs. a pure-JAX reference with matching precision choices
    ref = reference_forward(x, params, num_channels=NUM_CHANNELS, kernel_size=KERNEL_SIZE)
    assert bool(jnp.allclose(out, ref, atol=5e-2)), (out, ref)
    print("KERNEL_OK")
</pallas_src>

<mosaic_0001>
module attributes {stable_mosaic.version = 11 : i64} {
  func.func @kernel(%arg0: i32, %arg1: memref<8x16x128xf32, #tpu.memory_space<vmem>>, %arg2: memref<128x128xbf16, #tpu.memory_space<vmem>>, %arg3: memref<1x128xf32, #tpu.memory_space<vmem>>, %arg4: memref<128x128xbf16, #tpu.memory_space<vmem>>, %arg5: memref<1x128xf32, #tpu.memory_space<vmem>>, %arg6: memref<128x128xbf16, #tpu.memory_space<vmem>>, %arg7: memref<1x128xf32, #tpu.memory_space<vmem>>, %arg8: memref<128x128xbf16, #tpu.memory_space<vmem>>, %arg9: memref<1x128xf32, #tpu.memory_space<vmem>>, %arg10: memref<128x128xbf16, #tpu.memory_space<vmem>>, %arg11: memref<1x128xf32, #tpu.memory_space<vmem>>, %arg12: memref<128x128xf32, #tpu.memory_space<vmem>>, %arg13: memref<1x128xf32, #tpu.memory_space<vmem>>, %arg14: memref<8x128xf32, #tpu.memory_space<vmem>>, %arg15: memref<8x32x128xf32, #tpu.memory_space<vmem>>) attributes {dimension_semantics = [#tpu.dimension_semantics<parallel>], iteration_bounds = array<i64: 1>, scalar_prefetch = 0 : i64, scratch_operands = 1 : i64, tpu.core_type = #tpu.core_type<tc>, window_params = [{transform_indices = @transform_0, window_bounds = array<i64: 8, 16, 128>}, {pipeline_mode = #tpu.pipeline_mode<synchronous>, transform_indices = @transform_1, window_bounds = array<i64: 128, 128>}, {pipeline_mode = #tpu.pipeline_mode<synchronous>, transform_indices = @transform_2, window_bounds = array<i64: 1, 128>}, {pipeline_mode = #tpu.pipeline_mode<synchronous>, transform_indices = @transform_3, window_bounds = array<i64: 128, 128>}, {pipeline_mode = #tpu.pipeline_mode<synchronous>, transform_indices = @transform_4, window_bounds = array<i64: 1, 128>}, {pipeline_mode = #tpu.pipeline_mode<synchronous>, transform_indices = @transform_5, window_bounds = array<i64: 128, 128>}, {pipeline_mode = #tpu.pipeline_mode<synchronous>, transform_indices = @transform_6, window_bounds = array<i64: 1, 128>}, {pipeline_mode = #tpu.pipeline_mode<synchronous>, transform_indices = @transform_7, window_bounds = array<i64: 128, 128>}, {pipeline_mode = #tpu.pipeline_mode<synchronous>, transform_indices = @transform_8, window_bounds = array<i64: 1, 128>}, {pipeline_mode = #tpu.pipeline_mode<synchronous>, transform_indices = @transform_9, window_bounds = array<i64: 128, 128>}, {pipeline_mode = #tpu.pipeline_mode<synchronous>, transform_indices = @transform_10, window_bounds = array<i64: 1, 128>}, {pipeline_mode = #tpu.pipeline_mode<synchronous>, transform_indices = @transform_11, window_bounds = array<i64: 128, 128>}, {pipeline_mode = #tpu.pipeline_mode<synchronous>, transform_indices = @transform_12, window_bounds = array<i64: 1, 128>}, {transform_indices = @transform_13, window_bounds = array<i64: 8, 128>}]} {
    %cst = arith.constant 0.000000e+00 : f32
    %0 = vector.broadcast %cst : f32 to vector<8x16x128xf32>
    %c0 = arith.constant 0 : index
    %c0_0 = arith.constant 0 : index
    %c0_1 = arith.constant 0 : index
    %1 = vector.load %arg15[%c0, %c0_0, %c0_1] : memref<8x32x128xf32, #tpu.memory_space<vmem>>, vector<8x16x128xf32>
    tpu.vector_store %arg15[%c0, %c0_0, %c0_1], %0 {strides = array<i32>} : memref<8x32x128xf32, #tpu.memory_space<vmem>>, vector<8x16x128xf32>,
    %c0_2 = arith.constant 0 : index
    %c0_3 = arith.constant 0 : index
    %c0_4 = arith.constant 0 : index
    %2 = vector.load %arg1[%c0_2, %c0_3, %c0_4] : memref<8x16x128xf32, #tpu.memory_space<vmem>>, vector<8x16x128xf32>
    %3 = vector.shape_cast %2 : vector<8x16x128xf32> to vector<128x128xf32>
    %4 = arith.truncf %3 : vector<128x128xf32> to vector<128x128xbf16>
    %c0_5 = arith.constant 0 : index
    %c0_6 = arith.constant 0 : index
    %5 = vector.load %arg6[%c0_5, %c0_6] : memref<128x128xbf16, #tpu.memory_space<vmem>>, vector<128x128xbf16>
    %cst_7 = arith.constant dense<0.000000e+00> : vector<128x128xf32>
    %6 = tpu.matmul %4, %5, %cst_7 {dimension_numbers = #tpu.dot_dimension_numbers<[1], [0], [0], [1], [0, 0, 1, 1], [], []>} : vector<128x128xbf16>, vector<128x128xbf16>, vector<128x128xf32> -> vector<128x128xf32>
    %c0_8 = arith.constant 0 : index
    %c0_9 = arith.constant 0 : index
    %7 = vector.load %arg7[%c0_8, %c0_9] : memref<1x128xf32, #tpu.memory_space<vmem>>, vector<1x128xf32>
    %8 = vector.broadcast %7 : vector<1x128xf32> to vector<128x128xf32>
    %9 = arith.addf %6, %8 : vector<128x128xf32>
    %c0_10 = arith.constant 0 : index
    %c16 = arith.constant 16 : index
    %c0_11 = arith.constant 0 : index
    %10 = vector.load %arg15[%c0_10, %c16, %c0_11] : memref<8x32x128xf32, #tpu.memory_space<vmem>>, vector<8x16x128xf32>
    tpu.vector_store %arg15[%c0_10, %c16, %c0_11], %2 {strides = array<i32>} : memref<8x32x128xf32, #tpu.memory_space<vmem>>, vector<8x16x128xf32>,
    %c0_12 = arith.constant 0 : index
    %c10 = arith.constant 10 : index
    %c0_13 = arith.constant 0 : index
    %11 = vector.load %arg15[%c0_12, %c10, %c0_13] : memref<8x32x128xf32, #tpu.memory_space<vmem>>, vector<8x16x128xf32>
    %c0_14 = arith.constant 0 : index
    %c11 = arith.constant 11 : index
    %c0_15 = arith.constant 0 : index
    %12 = vector.load %arg15[%c0_14, %c11, %c0_15] : memref<8x32x128xf32, #tpu.memory_space<vmem>>, vector<8x16x128xf32>
    %c4_i32 = arith.constant 4 : i32
    %13 = tpu.dynamic_rotate %12 by %c4_i32 dim 2 : vector<8x16x128xf32>, i32 -> vector<8x16x128xf32>
    %14 = arith.addf %11, %13 : vector<8x16x128xf32>
    %c0_16 = arith.constant 0 : index
    %c12 = arith.constant 12 : index
    %c0_17 = arith.constant 0 : index
    %15 = vector.load %arg15[%c0_16, %c12, %c0_17] : memref<8x32x128xf32, #tpu.memory_space<vmem>>, vector<8x16x128xf32>
    %c8_i32 = arith.constant 8 : i32
    %16 = tpu.dynamic_rotate %15 by %c8_i32 dim 2 : vector<8x16x128xf32>, i32 -> vector<8x16x128xf32>
    %17 = arith.addf %14, %16 : vector<8x16x128xf32>
    %c0_18 = arith.constant 0 : index
    %c13 = arith.constant 13 : index
    %c0_19 = arith.constant 0 : index
    %18 = vector.load %arg15[%c0_18, %c13, %c0_19] : memref<8x32x128xf32, #tpu.memory_space<vmem>>, vector<8x16x128xf32>
    %c12_i32 = arith.constant 12 : i32
    %19 = tpu.dynamic_rotate %18 by %c12_i32 dim 2 : vector<8x16x128xf32>, i32 -> vector<8x16x128xf32>
    %20 = arith.addf %17, %19 : vector<8x16x128xf32>
    %c0_20 = arith.constant 0 : index
    %c14 = arith.constant 14 : index
    %c0_21 = arith.constant 0 : index
    %21 = vector.load %arg15[%c0_20, %c14, %c0_21] : memref<8x32x128xf32, #tpu.memory_space<vmem>>, vector<8x16x128xf32>
    %c16_i32 = arith.constant 16 : i32
    %22 = tpu.dynamic_rotate %21 by %c16_i32 dim 2 : vector<8x16x128xf32>, i32 -> vector<8x16x128xf32>
    %23 = arith.addf %20, %22 : vector<8x16x128xf32>
    %c0_22 = arith.constant 0 : index
    %c15 = arith.constant 15 : index
    %c0_23 = arith.constant 0 : index
    %24 = vector.load %arg15[%c0_22, %c15, %c0_23] : memref<8x32x128xf32, #tpu.memory_space<vmem>>, vector<8x16x128xf32>
    %c20_i32 = arith.constant 20 : i32
    %25 = tpu.dynamic_rotate %24 by %c20_i32 dim 2 : vector<8x16x128xf32>, i32 -> vector<8x16x128xf32>
    %26 = arith.addf %23, %25 : vector<8x16x128xf32>
    %c0_24 = arith.constant 0 : index
    %c16_25 = arith.constant 16 : index
    %c0_26 = arith.constant 0 : index
    %27 = vector.load %arg15[%c0_24, %c16_25, %c0_26] : memref<8x32x128xf32, #tpu.memory_space<vmem>>, vector<8x16x128xf32>
    %c24_i32 = arith.constant 24 : i32
    %28 = tpu.dynamic_rotate %27 by %c24_i32 dim 2 : vector<8x16x128xf32>, i32 -> vector<8x16x128xf32>
    %29 = arith.addf %26, %28 : vector<8x16x128xf32>
    %30 = vector.shape_cast %29 : vector<8x16x128xf32> to vector<128x128xf32>
    %31 = arith.truncf %30 : vector<128x128xf32> to vector<128x128xbf16>
    %c0_27 = arith.constant 0 : index
    %c0_28 = arith.constant 0 : index
    %32 = vector.load %arg2[%c0_27, %c0_28] : memref<128x128xbf16, #tpu.memory_space<vmem>>, vector<128x128xbf16>
    %cst_29 = arith.constant dense<0.000000e+00> : vector<128x128xf32>
    %33 = tpu.matmul %31, %32, %cst_29 {dimension_numbers = #tpu.dot_dimension_numbers<[1], [0], [0], [1], [0, 0, 1, 1], [], []>} : vector<128x128xbf16>, vector<128x128xbf16>, vector<128x128xf32> -> vector<128x128xf32>
    %c0_30 = arith.constant 0 : index
    %c0_31 = arith.constant 0 : index
    %34 = vector.load %arg3[%c0_30, %c0_31] : memref<1x128xf32, #tpu.memory_space<vmem>>, vector<1x128xf32>
    %35 = vector.broadcast %34 : vector<1x128xf32> to vector<128x128xf32>
    %36 = arith.addf %33, %35 : vector<128x128xf32>
    %cst_32 = arith.constant 0.000000e+00 : f32
    %37 = vector.broadcast %cst_32 : f32 to vector<128x128xf32>
    %38 = arith.maximumf %36, %37 : vector<128x128xf32>
    %39 = vector.shape_cast %38 : vector<128x128xf32> to vector<8x16x128xf32>
    %c0_33 = arith.constant 0 : index
    %c16_34 = arith.constant 16 : index
    %c0_35 = arith.constant 0 : index
    %40 = vector.load %arg15[%c0_33, %c16_34, %c0_35] : memref<8x32x128xf32, #tpu.memory_space<vmem>>, vector<8x16x128xf32>
    tpu.vector_store %arg15[%c0_33, %c16_34, %c0_35], %39 {strides = array<i32>} : memref<8x32x128xf32, #tpu.memory_space<vmem>>, vector<8x16x128xf32>,
    %c0_36 = arith.constant 0 : index
    %c10_37 = arith.constant 10 : index
    %c0_38 = arith.constant 0 : index
    %41 = vector.load %arg15[%c0_36, %c10_37, %c0_38] : memref<8x32x128xf32, #tpu.memory_space<vmem>>, vector<8x16x128xf32>
    %c0_39 = arith.constant 0 : index
    %c11_40 = arith.constant 11 : index
    %c0_41 = arith.constant 0 : index
    %42 = vector.load %arg15[%c0_39, %c11_40, %c0_41] : memref<8x32x128xf32, #tpu.memory_space<vmem>>, vector<8x16x128xf32>
    %c8_i32_42 = arith.constant 8 : i32
    %43 = tpu.dynamic_rotate %42 by %c8_i32_42 dim 2 : vector<8x16x128xf32>, i32 -> vector<8x16x128xf32>
    %44 = arith.addf %41, %43 : vector<8x16x128xf32>
    %c0_43 = arith.constant 0 : index
    %c12_44 = arith.constant 12 : index
    %c0_45 = arith.constant 0 : index
    %45 = vector.load %arg15[%c0_43, %c12_44, %c0_45] : memref<8x32x128xf32, #tpu.memory_space<vmem>>, vector<8x16x128xf32>
    %c16_i32_46 = arith.constant 16 : i32
    %46 = tpu.dynamic_rotate %45 by %c16_i32_46 dim 2 : vector<8x16x128xf32>, i32 -> vector<8x16x128xf32>
    %47 = arith.addf %44, %46 : vector<8x16x128xf32>
    %c0_47 = arith.constant 0 : index
    %c13_48 = arith.constant 13 : index
    %c0_49 = arith.constant 0 : index
    %48 = vector.load %arg15[%c0_47, %c13_48, %c0_49] : memref<8x32x128xf32, #tpu.memory_space<vmem>>, vector<8x16x128xf32>
    %c24_i32_50 = arith.constant 24 : i32
    %49 = tpu.dynamic_rotate %48 by %c24_i32_50 dim 2 : vector<8x16x128xf32>, i32 -> vector<8x16x128xf32>
    %50 = arith.addf %47, %49 : vector<8x16x128xf32>
    %c0_51 = arith.constant 0 : index
    %c14_52 = arith.constant 14 : index
    %c0_53 = arith.constant 0 : index
    %51 = vector.load %arg15[%c0_51, %c14_52, %c0_53] : memref<8x32x128xf32, #tpu.memory_space<vmem>>, vector<8x16x128xf32>
    %c32_i32 = arith.constant 32 : i32
    %52 = tpu.dynamic_rotate %51 by %c32_i32 dim 2 : vector<8x16x128xf32>, i32 -> vector<8x16x128xf32>
    %53 = arith.addf %50, %52 : vector<8x16x128xf32>
    %c0_54 = arith.constant 0 : index
    %c15_55 = arith.constant 15 : index
    %c0_56 = arith.constant 0 : index
    %54 = vector.load %arg15[%c0_54, %c15_55, %c0_56] : memref<8x32x128xf32, #tpu.memory_space<vmem>>, vector<8x16x128xf32>
    %c40_i32 = arith.constant 40 : i32
    %55 = tpu.dynamic_rotate %54 by %c40_i32 dim 2 : vector<8x16x128xf32>, i32 -> vector<8x16x128xf32>
    %56 = arith.addf %53, %55 : vector<8x16x128xf32>
    %c0_57 = arith.constant 0 : index
    %c16_58 = arith.constant 16 : index
    %c0_59 = arith.constant 0 : index
    %57 = vector.load %arg15[%c0_57, %c16_58, %c0_59] : memref<8x32x128xf32, #tpu.memory_space<vmem>>, vector<8x16x128xf32>
    %c48_i32 = arith.constant 48 : i32
    %58 = tpu.dynamic_rotate %57 by %c48_i32 dim 2 : vector<8x16x128xf32>, i32 -> vector<8x16x128xf32>
    %59 = arith.addf %56, %58 : vector<8x16x128xf32>
    %60 = vector.shape_cast %59 : vector<8x16x128xf32> to vector<128x128xf32>
    %61 = arith.truncf %60 : vector<128x128xf32> to vector<128x128xbf16>
    %c0_60 = arith.constant 0 : index
    %c0_61 = arith.constant 0 : index
    %62 = vector.load %arg4[%c0_60, %c0_61] : memref<128x128xbf16, #tpu.memory_space<vmem>>, vector<128x128xbf16>
    %cst_62 = arith.constant dense<0.000000e+00> : vector<128x128xf32>
    %63 = tpu.matmul %61, %62, %cst_62 {dimension_numbers = #tpu.dot_dimension_numbers<[1], [0], [0], [1], [0, 0, 1, 1], [], []>} : vector<128x128xbf16>, vector<128x128xbf16>, vector<128x128xf32> -> vector<128x128xf32>
    %c0_63 = arith.constant 0 : index
    %c0_64 = arith.constant 0 : index
    %64 = vector.load %arg5[%c0_63, %c0_64] : memref<1x128xf32, #tpu.memory_space<vmem>>, vector<1x128xf32>
    %65 = vector.broadcast %64 : vector<1x128xf32> to vector<128x128xf32>
    %66 = arith.addf %63, %65 : vector<128x128xf32>
    %cst_65 = arith.constant 0.000000e+00 : f32
    %67 = vector.broadcast %cst_65 : f32 to vector<128x128xf32>
    %68 = arith.maximumf %66, %67 : vector<128x128xf32>
    %69 = arith.addf %68, %9 : vector<128x128xf32>
    %cst_66 = arith.constant 0.000000e+00 : f32
    %70 = vector.broadcast %cst_66 : f32 to vector<128x128xf32>
    %71 = arith.maximumf %69, %70 : vector<128x128xf32>
    %72 = vector.shape_cast %71 : vector<128x128xf32> to vector<8x16x128xf32>
    %73 = vector.shape_cast %72 : vector<8x16x128xf32> to vector<128x128xf32>
    %c0_67 = arith.constant 0 : index
    %c16_68 = arith.constant 16 : index
    %c0_69 = arith.constant 0 : index
    %74 = vector.load %arg15[%c0_67, %c16_68, %c0_69] : memref<8x32x128xf32, #tpu.memory_space<vmem>>, vector<8x16x128xf32>
    tpu.vector_store %arg15[%c0_67, %c16_68, %c0_69], %72 {strides = array<i32>} : memref<8x32x128xf32, #tpu.memory_space<vmem>>, vector<8x16x128xf32>,
    %c0_70 = arith.constant 0 : index
    %c4 = arith.constant 4 : index
    %c0_71 = arith.constant 0 : index
    %75 = vector.load %arg15[%c0_70, %c4, %c0_71] : memref<8x32x128xf32, #tpu.memory_space<vmem>>, vector<8x16x128xf32>
    %c0_72 = arith.constant 0 : index
    %c6 = arith.constant 6 : index
    %c0_73 = arith.constant 0 : index
    %76 = vector.load %arg15[%c0_72, %c6, %c0_73] : memref<8x32x128xf32, #tpu.memory_space<vmem>>, vector<8x16x128xf32>
    %c8_i32_74 = arith.constant 8 : i32
    %77 = tpu.dynamic_rotate %76 by %c8_i32_74 dim 2 : vector<8x16x128xf32>, i32 -> vector<8x16x128xf32>
    %78 = arith.addf %75, %77 : vector<8x16x128xf32>
    %c0_75 = arith.constant 0 : index
    %c8 = arith.constant 8 : index
    %c0_76 = arith.constant 0 : index
    %79 = vector.load %arg15[%c0_75, %c8, %c0_76] : memref<8x32x128xf32, #tpu.memory_space<vmem>>, vector<8x16x128xf32>
    %c16_i32_77 = arith.constant 16 : i32
    %80 = tpu.dynamic_rotate %79 by %c16_i32_77 dim 2 : vector<8x16x128xf32>, i32 -> vector<8x16x128xf32>
    %81 = arith.addf %78, %80 : vector<8x16x128xf32>
    %c0_78 = arith.constant 0 : index
    %c10_79 = arith.constant 10 : index
    %c0_80 = arith.constant 0 : index
    %82 = vector.load %arg15[%c0_78, %c10_79, %c0_80] : memref<8x32x128xf32, #tpu.memory_space<vmem>>, vector<8x16x128xf32>
    %c24_i32_81 = arith.constant 24 : i32
    %83 = tpu.dynamic_rotate %82 by %c24_i32_81 dim 2 : vector<8x16x128xf32>, i32 -> vector<8x16x128xf32>
    %84 = arith.addf %81, %83 : vector<8x16x128xf32>
    %c0_82 = arith.constant 0 : index
    %c12_83 = arith.constant 12 : index
    %c0_84 = arith.constant 0 : index
    %85 = vector.load %arg15[%c0_82, %c12_83, %c0_84] : memref<8x32x128xf32, #tpu.memory_space<vmem>>, vector<8x16x128xf32>
    %c32_i32_85 = arith.constant 32 : i32
    %86 = tpu.dynamic_rotate %85 by %c32_i32_85 dim 2 : vector<8x16x128xf32>, i32 -> vector<8x16x128xf32>
    %87 = arith.addf %84, %86 : vector<8x16x128xf32>
    %c0_86 = arith.constant 0 : index
    %c14_87 = arith.constant 14 : index
    %c0_88 = arith.constant 0 : index
    %88 = vector.load %arg15[%c0_86, %c14_87, %c0_88] : memref<8x32x128xf32, #tpu.memory_space<vmem>>, vector<8x16x128xf32>
    %c40_i32_89 = arith.constant 40 : i32
    %89 = tpu.dynamic_rotate %88 by %c40_i32_89 dim 2 : vector<8x16x128xf32>, i32 -> vector<8x16x128xf32>
    %90 = arith.addf %87, %89 : vector<8x16x128xf32>
    %c0_90 = arith.constant 0 : index
    %c16_91 = arith.constant 16 : index
    %c0_92 = arith.constant 0 : index
    %91 = vector.load %arg15[%c0_90, %c16_91, %c0_92] : memref<8x32x128xf32, #tpu.memory_space<vmem>>, vector<8x16x128xf32>
    %c48_i32_93 = arith.constant 48 : i32
    %92 = tpu.dynamic_rotate %91 by %c48_i32_93 dim 2 : vector<8x16x128xf32>, i32 -> vector<8x16x128xf32>
    %93 = arith.addf %90, %92 : vector<8x16x128xf32>
    %94 = vector.shape_cast %93 : vector<8x16x128xf32> to vector<128x128xf32>
    %95 = arith.truncf %94 : vector<128x128xf32> to vector<128x128xbf16>
    %c0_94 = arith.constant 0 : index
    %c0_95 = arith.constant 0 : index
    %96 = vector.load %arg8[%c0_94, %c0_95] : memref<128x128xbf16, #tpu.memory_space<vmem>>, vector<128x128xbf16>
    %cst_96 = arith.constant dense<0.000000e+00> : vector<128x128xf32>
    %97 = tpu.matmul %95, %96, %cst_96 {dimension_numbers = #tpu.dot_dimension_numbers<[1], [0], [0], [1], [0, 0, 1, 1], [], []>} : vector<128x128xbf16>, vector<128x128xbf16>, vector<128x128xf32> -> vector<128x128xf32>
    %c0_97 = arith.constant 0 : index
    %c0_98 = arith.constant 0 : index
    %98 = vector.load %arg9[%c0_97, %c0_98] : memref<1x128xf32, #tpu.memory_space<vmem>>, vector<1x128xf32>
    %99 = vector.broadcast %98 : vector<1x128xf32> to vector<128x128xf32>
    %100 = arith.addf %97, %99 : vector<128x128xf32>
    %cst_99 = arith.constant 0.000000e+00 : f32
    %101 = vector.broadcast %cst_99 : f32 to vector<128x128xf32>
    %102 = arith.maximumf %100, %101 : vector<128x128xf32>
    %103 = vector.shape_cast %102 : vector<128x128xf32> to vector<8x16x128xf32>
    %c0_100 = arith.constant 0 : index
    %c16_101 = arith.constant 16 : index
    %c0_102 = arith.constant 0 : index
    %104 = vector.load %arg15[%c0_100, %c16_101, %c0_102] : memref<8x32x128xf32, #tpu.memory_space<vmem>>, vector<8x16x128xf32>
    tpu.vector_store %arg15[%c0_100, %c16_101, %c0_102], %103 {strides = array<i32>} : memref<8x32x128xf32, #tpu.memory_space<vmem>>, vector<8x16x128xf32>,
    %c0_103 = arith.constant 0 : index
    %c4_104 = arith.constant 4 : index
    %c0_105 = arith.constant 0 : index
    %105 = vector.load %arg15[%c0_103, %c4_104, %c0_105] : memref<8x32x128xf32, #tpu.memory_space<vmem>>, vector<8x16x128xf32>
    %c0_106 = arith.constant 0 : index
    %c6_107 = arith.constant 6 : index
    %c0_108 = arith.constant 0 : index
    %106 = vector.load %arg15[%c0_106, %c6_107, %c0_108] : memref<8x32x128xf32, #tpu.memory_space<vmem>>, vector<8x16x128xf32>
    %c8_i32_109 = arith.constant 8 : i32
    %107 = tpu.dynamic_rotate %106 by %c8_i32_109 dim 2 : vector<8x16x128xf32>, i32 -> vector<8x16x128xf32>
    %108 = arith.addf %105, %107 : vector<8x16x128xf32>
    %c0_110 = arith.constant 0 : index
    %c8_111 = arith.constant 8 : index
    %c0_112 = arith.constant 0 : index
    %109 = vector.load %arg15[%c0_110, %c8_111, %c0_112] : memref<8x32x128xf32, #tpu.memory_space<vmem>>, vector<8x16x128xf32>
    %c16_i32_113 = arith.constant 16 : i32
    %110 = tpu.dynamic_rotate %109 by %c16_i32_113 dim 2 : vector<8x16x128xf32>, i32 -> vector<8x16x128xf32>
    %111 = arith.addf %108, %110 : vector<8x16x128xf32>
    %c0_114 = arith.constant 0 : index
    %c10_115 = arith.constant 10 : index
    %c0_116 = arith.constant 0 : index
    %112 = vector.load %arg15[%c0_114, %c10_115, %c0_116] : memref<8x32x128xf32, #tpu.memory_space<vmem>>, vector<8x16x128xf32>
    %c24_i32_117 = arith.constant 24 : i32
    %113 = tpu.dynamic_rotate %112 by %c24_i32_117 dim 2 : vector<8x16x128xf32>, i32 -> vector<8x16x128xf32>
    %114 = arith.addf %111, %113 : vector<8x16x128xf32>
    %c0_118 = arith.constant 0 : index
    %c12_119 = arith.constant 12 : index
    %c0_120 = arith.constant 0 : index
    %115 = vector.load %arg15[%c0_118, %c12_119, %c0_120] : memref<8x32x128xf32, #tpu.memory_space<vmem>>, vector<8x16x128xf32>
    %c32_i32_121 = arith.constant 32 : i32
    %116 = tpu.dynamic_rotate %115 by %c32_i32_121 dim 2 : vector<8x16x128xf32>, i32 -> vector<8x16x128xf32>
    %117 = arith.addf %114, %116 : vector<8x16x128xf32>
    %c0_122 = arith.constant 0 : index
    %c14_123 = arith.constant 14 : index
    %c0_124 = arith.constant 0 : index
    %118 = vector.load %arg15[%c0_122, %c14_123, %c0_124] : memref<8x32x128xf32, #tpu.memory_space<vmem>>, vector<8x16x128xf32>
    %c40_i32_125 = arith.constant 40 : i32
    %119 = tpu.dynamic_rotate %118 by %c40_i32_125 dim 2 : vector<8x16x128xf32>, i32 -> vector<8x16x128xf32>
    %120 = arith.addf %117, %119 : vector<8x16x128xf32>
    %c0_126 = arith.constant 0 : index
    %c16_127 = arith.constant 16 : index
    %c0_128 = arith.constant 0 : index
    %121 = vector.load %arg15[%c0_126, %c16_127, %c0_128] : memref<8x32x128xf32, #tpu.memory_space<vmem>>, vector<8x16x128xf32>
    %c48_i32_129 = arith.constant 48 : i32
    %122 = tpu.dynamic_rotate %121 by %c48_i32_129 dim 2 : vector<8x16x128xf32>, i32 -> vector<8x16x128xf32>
    %123 = arith.addf %120, %122 : vector<8x16x128xf32>
    %124 = vector.shape_cast %123 : vector<8x16x128xf32> to vector<128x128xf32>
    %125 = arith.truncf %124 : vector<128x128xf32> to vector<128x128xbf16>
    %c0_130 = arith.constant 0 : index
    %c0_131 = arith.constant 0 : index
    %126 = vector.load %arg10[%c0_130, %c0_131] : memref<128x128xbf16, #tpu.memory_space<vmem>>, vector<128x128xbf16>
    %cst_132 = arith.constant dense<0.000000e+00> : vector<128x128xf32>
    %127 = tpu.matmul %125, %126, %cst_132 {dimension_numbers = #tpu.dot_dimension_numbers<[1], [0], [0], [1], [0, 0, 1, 1], [], []>} : vector<128x128xbf16>, vector<128x128xbf16>, vector<128x128xf32> -> vector<128x128xf32>
    %c0_133 = arith.constant 0 : index
    %c0_134 = arith.constant 0 : index
    %128 = vector.load %arg11[%c0_133, %c0_134] : memref<1x128xf32, #tpu.memory_space<vmem>>, vector<1x128xf32>
    %129 = vector.broadcast %128 : vector<1x128xf32> to vector<128x128xf32>
    %130 = arith.addf %127, %129 : vector<128x128xf32>
    %cst_135 = arith.constant 0.000000e+00 : f32
    %131 = vector.broadcast %cst_135 : f32 to vector<128x128xf32>
    %132 = arith.maximumf %130, %131 : vector<128x128xf32>
    %133 = arith.addf %132, %73 : vector<128x128xf32>
    %cst_136 = arith.constant 0.000000e+00 : f32
    %134 = vector.broadcast %cst_136 : f32 to vector<128x128xf32>
    %135 = arith.maximumf %133, %134 : vector<128x128xf32>
    %136 = vector.shape_cast %135 : vector<128x128xf32> to vector<8x16x128xf32>
    %137 = vector.extract_strided_slice %136 {offsets = [0, 15, 0], sizes = [8, 1, 128], strides = [1, 1, 1]} : vector<8x16x128xf32> to vector<8x1x128xf32>
    %138 = vector.shape_cast %137 : vector<8x1x128xf32> to vector<8x128xf32>
    %c0_137 = arith.constant 0 : index
    %c0_138 = arith.constant 0 : index
    %139 = vector.load %arg12[%c0_137, %c0_138] : memref<128x128xf32, #tpu.memory_space<vmem>>, vector<128x128xf32>
    %cst_139 = arith.constant dense<0.000000e+00> : vector<8x128xf32>
    %140 = tpu.matmul %138, %139, %cst_139 {dimension_numbers = #tpu.dot_dimension_numbers<[1], [0], [0], [1], [0, 0, 1, 1], [], []>} : vector<8x128xf32>, vector<128x128xf32>, vector<8x128xf32> -> vector<8x128xf32>
    %c0_140 = arith.constant 0 : index
    %c0_141 = arith.constant 0 : index
    %141 = vector.load %arg13[%c0_140, %c0_141] : memref<1x128xf32, #tpu.memory_space<vmem>>, vector<1x128xf32>
    %142 = vector.broadcast %141 : vector<1x128xf32> to vector<8x128xf32>
    %143 = arith.addf %140, %142 : vector<8x128xf32>
    %144 = tpu.iota {dimensions = array<i32: 1>} : vector<8x128xi32>
    %c3_i32 = arith.constant 3 : i32
    %145 = vector.broadcast %c3_i32 : i32 to vector<8x128xi32>
    %146 = arith.cmpi slt, %144, %145 : vector<8x128xi32>
    %cst_142 = arith.constant -1.000000e+30 : f32
    %147 = vector.broadcast %cst_142 : f32 to vector<8x128xf32>
    %148 = arith.select %146, %143, %147 : vector<8x128xi1>, vector<8x128xf32>
    %cst_143 = arith.constant dense<0xFF800000> : vector<8xf32>
    %149 = vector.multi_reduction <maximumf>, %148, %cst_143 [1] : vector<8x128xf32> to vector<8xf32>
    %150 = vector.shape_cast %149 : vector<8xf32> to vector<8x1xf32>
    %151 = vector.broadcast %150 : vector<8x1xf32> to vector<8x128xf32>
    %152 = arith.subf %148, %151 : vector<8x128xf32>
    %153 = math.exp %152 : vector<8x128xf32>
    %cst_144 = arith.constant dense<0.000000e+00> : vector<8xf32>
    %154 = vector.multi_reduction <add>, %153, %cst_144 [1] : vector<8x128xf32> to vector<8xf32>
    %155 = vector.shape_cast %154 : vector<8xf32> to vector<8x1xf32>
    %156 = math.log %155 : vector<8x1xf32>
    %157 = vector.broadcast %156 : vector<8x1xf32> to vector<8x128xf32>
    %158 = arith.subf %152, %157 : vector<8x128xf32>
    %c0_145 = arith.constant 0 : index
    %c0_146 = arith.constant 0 : index
    %159 = vector.load %arg14[%c0_145, %c0_146] : memref<8x128xf32, #tpu.memory_space<vmem>>, vector<8x128xf32>
    tpu.vector_store %arg14[%c0_145, %c0_146], %158 {strides = array<i32>} : memref<8x128xf32, #tpu.memory_space<vmem>>, vector<8x128xf32>,
    return
  }
  func.func @transform_0(%arg0: i32) -> (i32, i32, i32) {
    %c0_i32 = arith.constant 0 : i32
    %c0_i32_0 = arith.constant 0 : i32
    %c0_i32_1 = arith.constant 0 : i32
    return %arg0, %c0_i32, %c0_i32_0 : i32, i32, i32
  }
  func.func @transform_1(%arg0: i32) -> (i32, i32) {
    %c0_i32 = arith.constant 0 : i32
    %c0_i32_0 = arith.constant 0 : i32
    %c0_i32_1 = arith.constant 0 : i32
    return %c0_i32, %c0_i32_0 : i32, i32
  }
  func.func @transform_2(%arg0: i32) -> (i32, i32) {
    %c0_i32 = arith.constant 0 : i32
    %c0_i32_0 = arith.constant 0 : i32
    %c0_i32_1 = arith.constant 0 : i32
    return %c0_i32, %c0_i32_0 : i32, i32
  }
  func.func @transform_3(%arg0: i32) -> (i32, i32) {
    %c0_i32 = arith.constant 0 : i32
    %c0_i32_0 = arith.constant 0 : i32
    %c0_i32_1 = arith.constant 0 : i32
    return %c0_i32, %c0_i32_0 : i32, i32
  }
  func.func @transform_4(%arg0: i32) -> (i32, i32) {
    %c0_i32 = arith.constant 0 : i32
    %c0_i32_0 = arith.constant 0 : i32
    %c0_i32_1 = arith.constant 0 : i32
    return %c0_i32, %c0_i32_0 : i32, i32
  }
  func.func @transform_5(%arg0: i32) -> (i32, i32) {
    %c0_i32 = arith.constant 0 : i32
    %c0_i32_0 = arith.constant 0 : i32
    %c0_i32_1 = arith.constant 0 : i32
    return %c0_i32, %c0_i32_0 : i32, i32
  }
  func.func @transform_6(%arg0: i32) -> (i32, i32) {
    %c0_i32 = arith.constant 0 : i32
    %c0_i32_0 = arith.constant 0 : i32
    %c0_i32_1 = arith.constant 0 : i32
    return %c0_i32, %c0_i32_0 : i32, i32
  }
  func.func @transform_7(%arg0: i32) -> (i32, i32) {
    %c0_i32 = arith.constant 0 : i32
    %c0_i32_0 = arith.constant 0 : i32
    %c0_i32_1 = arith.constant 0 : i32
    return %c0_i32, %c0_i32_0 : i32, i32
  }
  func.func @transform_8(%arg0: i32) -> (i32, i32) {
    %c0_i32 = arith.constant 0 : i32
    %c0_i32_0 = arith.constant 0 : i32
    %c0_i32_1 = arith.constant 0 : i32
    return %c0_i32, %c0_i32_0 : i32, i32
  }
  func.func @transform_9(%arg0: i32) -> (i32, i32) {
    %c0_i32 = arith.constant 0 : i32
    %c0_i32_0 = arith.constant 0 : i32
    %c0_i32_1 = arith.constant 0 : i32
    return %c0_i32, %c0_i32_0 : i32, i32
  }
  func.func @transform_10(%arg0: i32) -> (i32, i32) {
    %c0_i32 = arith.constant 0 : i32
    %c0_i32_0 = arith.constant 0 : i32
    %c0_i32_1 = arith.constant 0 : i32
    return %c0_i32, %c0_i32_0 : i32, i32
  }
  func.func @transform_11(%arg0: i32) -> (i32, i32) {
    %c0_i32 = arith.constant 0 : i32
    %c0_i32_0 = arith.constant 0 : i32
    %c0_i32_1 = arith.constant 0 : i32
    return %c0_i32, %c0_i32_0 : i32, i32
  }
  func.func @transform_12(%arg0: i32) -> (i32, i32) {
    %c0_i32 = arith.constant 0 : i32
    %c0_i32_0 = arith.constant 0 : i32
    %c0_i32_1 = arith.constant 0 : i32
    return %c0_i32, %c0_i32_0 : i32, i32
  }
  func.func @transform_13(%arg0: i32) -> (i32, i32) {
    %c0_i32 = arith.constant 0 : i32
    %c0_i32_0 = arith.constant 0 : i32
    return %arg0, %c0_i32 : i32, i32
  }
}

</mosaic_0001>

<bundles_post_ra>
// kernel: tcn_model_forward.1
= control target key start
LH: loop header
LB: loop body
LE: loop exit
PB: predicated region body
PF: predicated region fallthrough
CT: control target
= control target key end

     0   :  { %18 = vsyncpa [#allocation4], 0  ;;  %s4158_s0 = inlined_call_operand.vmem [shape: f32[8,16,128], index: 0, kind: input, shape index: {}]   ;;  %s4159_s1 = inlined_call_operand.vmem [shape: bf16[128,128], index: 1, kind: input, shape index: {}]   ;;  %s4160_s2 = inlined_call_operand.vmem [shape: f32[1,128], index: 2, kind: input, shape index: {}]   ;;  %s4161_s3 = inlined_call_operand.hbm [shape: bf16[128,128], index: 3, kind: input, shape index: {}]   ;;  %s4162_s4 = inlined_call_operand.vmem [shape: f32[1,128], index: 4, kind: input, shape index: {}]   ;;  %s4163_s5 = inlined_call_operand.hbm [shape: bf16[128,128], index: 5, kind: input, shape index: {}]   ;;  %s4164_s6 = inlined_call_operand.vmem [shape: f32[1,128], index: 6, kind: input, shape index: {}]   ;;  %s4165_s7 = inlined_call_operand.hbm [shape: bf16[128,128], index: 7, kind: input, shape index: {}]   ;;  %s4166_s8 = inlined_call_operand.vmem [shape: f32[1,128], index: 8, kind: input, shape index: {}]   ;;  %s4167_s9 = inlined_call_operand.hbm [shape: bf16[128,128], index: 9, kind: input, shape index: {}]   ;;  %s4168_s10 = inlined_call_operand.vmem [shape: f32[1,128], index: 10, kind: input, shape index: {}]   ;;  %s4169_s11 = inlined_call_operand.vmem [shape: f32[128,128], index: 11, kind: input, shape index: {}]   ;;  %s4170_s12 = inlined_call_operand.vmem [shape: f32[1,128], index: 12, kind: input, shape index: {}]   ;;  %s4171_s13 = inlined_call_operand.vmem [shape: f32[8,128], index: 13, kind: output, shape index: {}]  }
   0x1   :  { %19 = vsyncpa [#allocation6], 0 }
   0x2   :  { %20 = vsyncpa [#allocation9], 0  ;;  %s46_s27 = sshll.u32 %s4163_s5, 4  ;;  %s2939_s28 = smov [#allocation5]   ;;  %s47_s27 = int_to_ptr.hbm [resolvable:$true] %s46_s27 }
   0x3   :  { %s48_s29 = sshll.u32 %s2939_s28, 4  ;;  %s31_s15 = sshll.u32 %s4161_s3, 4  ;;  %s49_s29 = int_to_ptr.vmem [resolvable:$true] %s48_s29  ;;  %s32_s15 = int_to_ptr.hbm [resolvable:$true] %s31_s15 }
   0x4   :  { %s2940_s16 = smov 64   ;;  %s2941_s17 = smov 4  }
   0x5   :  { %54 = dma.hbm_to_vmem [thread:$0]  %s47_s27, 1024, %s49_s29, [#allocation6], %s2940_s16, %s2940_s16, %s2941_s17  }
   0x6   :  { %s2942_s18 = smov [#allocation3]   ;;  %s61_s22 = sshll.u32 %s4165_s7, 4  ;;  %s62_s22 = int_to_ptr.hbm [resolvable:$true] %s61_s22 }
   0x7   :  { %s33_s19 = sshll.u32 %s2942_s18, 4  ;;  %s76_s24 = sshll.u32 %s4167_s9, 4  ;;  %s34_s19 = int_to_ptr.vmem [resolvable:$true] %s33_s19  ;;  %s77_s24 = int_to_ptr.hbm [resolvable:$true] %s76_s24 }
   0x8   :  { %39 = dma.hbm_to_vmem [thread:$0]  %s32_s15, 1024, %s34_s19, [#allocation4], %s2940_s16, %s2940_s16, %s2941_s17  }
   0x9   :  { %s2943_s3 = smov [#allocation7]   ;;  %s2944_s26 = smov [#allocation8]  }
   0xa   :  { %s63_s25 = sshll.u32 %s2943_s3, 4  ;;  %s78_s27 = sshll.u32 %s2944_s26, 4  ;;  %s64_s25 = int_to_ptr.vmem [resolvable:$true] %s63_s25  ;;  %s79_s27 = int_to_ptr.vmem [resolvable:$true] %s78_s27 }
   0xb   :  { %69 = dma.hbm_to_vmem [thread:$0]  %s62_s22, 1024, %s64_s25, [#allocation6], %s2940_s16, %s2940_s16, %s2941_s17  }
   0xc   :  { %84 = dma.hbm_to_vmem [thread:$0]  %s77_s24, 1024, %s79_s27, [#allocation9], %s2940_s16, %s2940_s16, %s2941_s17  }
   0xd   :  { %2933 = dma.done.wait [#allocation4], 1024  }
   0xe   :  { %2934 = vsyncadd [#allocation4], 4294966272 }
   0xf   :  { %2935 = dma.done.wait [#allocation6], 2048  }
  0x10   :  { %2936 = vsyncadd [#allocation6], 4294965248 }
  0x11   :  { %2937 = dma.done.wait [#allocation9], 1024  }
  0x12   :  { %2938 = vsyncadd [#allocation9], 4294966272  ;;  %v2945_v0 = vmov 0.0   ;;  %v3043_v1 = vld [vmem:[%s4158_s0 + $0x20] sm:$0xff]  ;;  %v3049_v3 = vld [vmem:[%s4158_s0 + $0x10] sm:$0xff]  ;;  %s2946_s26 = smov 12  }
  0x13   :  { %112 = vst [vmem:[#allocation2 + $0x48] sm:$0xff] %v2945_v0  ;;  %v3055_v4 = vld [vmem:[%s4158_s0] sm:$0xff]  ;;  %v3060_v5 = vld [vmem:[%s4158_s0 + $0x28] sm:$0xff]  ;;  %v3066_v6 = vld [vmem:[%s4158_s0 + $0x18] sm:$0xff]  ;;  %s2947_s27 = smov 8   ;;  %s2948_s7 = smov 16  }
  0x14   :  { %107 = vst [vmem:[#allocation2] sm:$0xff] %v2945_v0  ;;  %v3072_v7 = vld [vmem:[%s4158_s0 + $0x8] sm:$0xff]  ;;  %v3078_v8 = vld [vmem:[%s4158_s0 + $0x40] sm:$0xff]  ;;  %v3084_v9 = vld [vmem:[%s4158_s0 + $0x30] sm:$0xff]  ;;  %s2949_s9 = smov 24   ;;  %s2950_s28 = smov 20   ;;  %v141_v62 = vpack.c.bf16 %v3060_v5, %v3043_v1 }
  0x15   :  { %108 = vst [vmem:[#allocation2 + $0x8] sm:$0xff] %v2945_v0  ;;  %v3090_v10 = vld [vmem:[%s4158_s0 + $0x38] sm:$0xff]  ;;  %v2750_v38 = vld [vmem:[#allocation5 + $0x30] sm:$0xff]  ;;  %v2749_v43 = vld [vmem:[#allocation5 + $0x28] sm:$0xff]  ;;  %vm2522_vm0 = vcmask 1041409   ;;  %vm2525_vm1 = vcmask 1042434  }
  0x16   :  { %109 = vst [vmem:[#allocation2 + $0x20] sm:$0xff] %v2945_v0  ;;  %v2751_v37 = vld [vmem:[#allocation5 + $0x38] sm:$0xff]  ;;  %v2748_v44 = vld [vmem:[#allocation5 + $0x20] sm:$0xff]  ;;  %v3138_v47 = vld [vmem:[%s4158_s0 + $0x48] sm:$0xff]  ;;  %vm2528_vm2 = vcmask 1043459   ;;  %vm2531_vm3 = vcmask 1044484  }
  0x17   :  { %110 = vst [vmem:[#allocation2 + $0x28] sm:$0xff] %v2945_v0  ;;  %2784 = vmatpush.bf16.msra.mxu1 %v2751_v37  ;;  %2785 = vmatpush.bf16.msra.mxu2 %v2751_v37  ;;  %v2747_v48 = vld [vmem:[#allocation5 + $0x18] sm:$0xff]  ;;  %v2746_v50 = vld [vmem:[#allocation5 + $0x10] sm:$0xff]  ;;  %v2745_v53 = vld [vmem:[#allocation5 + $0x8] sm:$0xff]  ;;  %vm2534_vm4 = vcmask 1045509   ;;  %vm2537_vm5 = vcmask 1046534  }
  0x18   :  { %111 = vst [vmem:[#allocation2 + $0x40] sm:$0xff] %v2945_v0  ;;  %215 = vmatpush.bf16.msra.mxu0 %v2751_v37  ;;  %2786 = vmatpush.bf16.msra.mxu3 %v2751_v37  ;;  %v2744_v55 = vld [vmem:[#allocation5] sm:$0xff]  ;;  %v2759_v57 = vld [vmem:[%s4159_s1 + $0x38] sm:$0xff]  ;;  %v2758_v60 = vld [vmem:[%s4159_s1 + $0x30] sm:$0xff]  ;;  %vm2539_vm6 = vcmask 1047559  }
  0x19   :  { %113 = vst [vmem:[#allocation2 + $0x60] sm:$0xff] %v2945_v0 }
  0x1a   :  { %268 = vst [vmem:[#allocation2 + $0x50] sm:$0xff] %v3043_v1 }
  0x1b   :  { %114 = vst [vmem:[#allocation2 + $0x68] sm:$0xff] %v2945_v0  ;;  %2787 = vmatpush.bf16.msra.mxu1 %v2750_v38  ;;  %2788 = vmatpush.bf16.msra.mxu2 %v2750_v38 }
  0x1c   :  { %115 = vst [vmem:[#allocation2 + $0x80] sm:$0xff] %v2945_v0  ;;  %216 = vmatpush.bf16.msra.mxu0 %v2750_v38  ;;  %2789 = vmatpush.bf16.msra.mxu3 %v2750_v38 }
  0x1d   :  { %116 = vst [vmem:[#allocation2 + $0x88] sm:$0xff] %v2945_v0 }
  0x1e   :  { %117 = vst [vmem:[#allocation2 + $0xa0] sm:$0xff] %v2945_v0 }
  0x1f   :  { %118 = vst [vmem:[#allocation2 + $0xa8] sm:$0xff] %v2945_v0  ;;  %2790 = vmatpush.bf16.msra.mxu1 %v2749_v43  ;;  %2791 = vmatpush.bf16.msra.mxu2 %v2749_v43 }
  0x20   :  { %119 = vst [vmem:[#allocation2 + $0xc0] sm:$0xff] %v2945_v0  ;;  %217 = vmatpush.bf16.msra.mxu0 %v2749_v43  ;;  %2792 = vmatpush.bf16.msra.mxu3 %v2749_v43 }
  0x21   :  { %v300_v2 = vld [vmem:[#allocation2 + $0x4b] sm:$0xff]  ;;  %120 = vst [vmem:[#allocation2 + $0xc8] sm:$0xff] %v2945_v0 }
  0x22   :  { %320 = vrot.lane.b32.xlu2 %v300_v2, %s2941_s17  ;;  %121 = vst [vmem:[#allocation2 + $0xe0] sm:$0xff] %v2945_v0  ;;  %v364_v35 = vld [vmem:[#allocation2 + $0x4c] sm:$0xff] }
  0x23   :  { %122 = vst [vmem:[#allocation2 + $0xe8] sm:$0xff] %v2945_v0  ;;  %v428_v39 = vld [vmem:[#allocation2 + $0x4d] sm:$0xff]  ;;  %2793 = vmatpush.bf16.msra.mxu1 %v2748_v44  ;;  %2794 = vmatpush.bf16.msra.mxu2 %v2748_v44 }
  0x24   :  { %266 = vst [vmem:[#allocation2 + $0x30] sm:$0xff] %v3049_v3  ;;  %v556_v41 = vld [vmem:[#allocation2 + $0x4f] sm:$0xff]  ;;  %218 = vmatpush.bf16.msra.mxu0 %v2748_v44  ;;  %2795 = vmatpush.bf16.msra.mxu3 %v2748_v44 }
  0x25   :  { %264 = vst [vmem:[#allocation2 + $0x10] sm:$0xff] %v3055_v4  ;;  %v492_v46 = vld [vmem:[#allocation2 + $0x4e] sm:$0xff] }
  0x26   :  { %269 = vst [vmem:[#allocation2 + $0x58] sm:$0xff] %v3060_v5  ;;  %v2757_v0 = vld [vmem:[%s4159_s1 + $0x28] sm:$0xff] }
  0x27   :  { %267 = vst [vmem:[#allocation2 + $0x38] sm:$0xff] %v3066_v6  ;;  %2796 = vmatpush.bf16.msra.mxu1 %v2747_v48  ;;  %2797 = vmatpush.bf16.msra.mxu2 %v2747_v48 }
  0x28   :  { %265 = vst [vmem:[#allocation2 + $0x18] sm:$0xff] %v3072_v7  ;;  %219 = vmatpush.bf16.msra.mxu0 %v2747_v48  ;;  %2798 = vmatpush.bf16.msra.mxu3 %v2747_v48  ;;  %v3236_v48 = vld [vmem:[%s4158_s0 + $0x60] sm:$0xff] }
  0x29   :  { %272 = vst [vmem:[#allocation2 + $0x90] sm:$0xff] %v3078_v8 }
  0x2a   :  { %270 = vst [vmem:[#allocation2 + $0x70] sm:$0xff] %v3084_v9 }
  0x2b   :  { %v298_v11 = vld [vmem:[#allocation2 + $0x2b] sm:$0xff]  ;;  %271 = vst [vmem:[#allocation2 + $0x78] sm:$0xff] %v3090_v10  ;;  %2799 = vmatpush.bf16.msra.mxu1 %v2746_v50  ;;  %2800 = vmatpush.bf16.msra.mxu2 %v2746_v50 }
  0x2c   :  { %316 = vrot.lane.b32.xlu1 %v298_v11, %s2941_s17  ;;  %v296_v12 = vld [vmem:[#allocation2 + $0xb] sm:$0xff]  ;;  %273 = vst [vmem:[#allocation2 + $0x98] sm:$0xff] %v3138_v47  ;;  %220 = vmatpush.bf16.msra.mxu0 %v2746_v50 }
  0x2d   :  { %312 = vrot.lane.b32.xlu0 %v296_v12, %s2941_s17  ;;  %v301_v13 = vld [vmem:[#allocation2 + $0x53] sm:$0xff]  ;;  %2801 = vmatpush.bf16.msra.mxu3 %v2746_v50  ;;  %v280_v38 = vld [vmem:[#allocation2 + $0xa] sm:$0xff]  ;;  %276 = vst [vmem:[#allocation2 + $0xd0] sm:$0xff] %v3236_v48 }
  0x2e   :  { %322 = vrot.lane.b32.xlu2 %v301_v13, %s2941_s17  ;;  %v299_v14 = vld [vmem:[#allocation2 + $0x33] sm:$0xff] }
  0x2f   :  { %v297_v15 = vld [vmem:[#allocation2 + $0x13] sm:$0xff]  ;;  %2802 = vmatpush.bf16.msra.mxu1 %v2745_v53  ;;  %2803 = vmatpush.bf16.msra.mxu2 %v2745_v53 }
  0x30   :  { %v304_v16 = vld [vmem:[#allocation2 + $0x8b] sm:$0xff]  ;;  %v361_v20 = vld [vmem:[#allocation2 + $0x14] sm:$0xff]  ;;  %221 = vmatpush.bf16.msra.mxu0 %v2745_v53 }
  0x31   :  { %v302_v18 = vld [vmem:[#allocation2 + $0x6b] sm:$0xff]  ;;  %v489_v22 = vld [vmem:[#allocation2 + $0x16] sm:$0xff]  ;;  %2804 = vmatpush.bf16.msra.mxu3 %v2745_v53 }
  0x32   :  { %v303_v17 = vld [vmem:[#allocation2 + $0x73] sm:$0xff]  ;;  %v3243_v53 = vld [vmem:[%s4158_s0 + $0x68] sm:$0xff] }
  0x33   :  { %v424_v19 = vld [vmem:[#allocation2 + $0xd] sm:$0xff]  ;;  %v425_v24 = vld [vmem:[#allocation2 + $0x15] sm:$0xff]  ;;  %2805 = vmatpush.bf16.msra.mxu1 %v2744_v55  ;;  %2806 = vmatpush.bf16.msra.mxu2 %v2744_v55  ;;  %277 = vst [vmem:[#allocation2 + $0xd8] sm:$0xff] %v3243_v53 }
  0x34   :  { %318 = vrot.lane.b32.xlu1 %v299_v14, %s2941_s17  ;;  %v360_v21 = vld [vmem:[#allocation2 + $0xc] sm:$0xff]  ;;  %v553_v25 = vld [vmem:[#allocation2 + $0x17] sm:$0xff]  ;;  %222 = vmatpush.bf16.msra.mxu0 %v2744_v55 }
  0x35   :  { %314 = vrot.lane.b32.xlu0 %v297_v15, %s2941_s17  ;;  %v488_v23 = vld [vmem:[#allocation2 + $0xe] sm:$0xff]  ;;  %v555_v32 = vld [vmem:[#allocation2 + $0x37] sm:$0xff]  ;;  %2807 = vmatpush.bf16.msra.mxu3 %v2744_v55 }
  0x36   :  { %328 = vrot.lane.b32.xlu2 %v304_v16, %s2941_s17  ;;  %v552_v26 = vld [vmem:[#allocation2 + $0xf] sm:$0xff]  ;;  %v557_v51 = vld [vmem:[#allocation2 + $0x57] sm:$0xff]  ;;  %233 = vmatmul.bf16.vlgmr.msra.gmra.mxu1 %v141_v62 }
  0x37   :  { %v363_v27 = vld [vmem:[#allocation2 + $0x34] sm:$0xff]  ;;  %v362_v28 = vld [vmem:[#allocation2 + $0x2c] sm:$0xff]  ;;  %756 = vmatpush.bf16.msrb.mxu1 %v2759_v57 }
  0x38   :  { %v490_v29 = vld [vmem:[#allocation2 + $0x2e] sm:$0xff]  ;;  %v491_v34 = vld [vmem:[#allocation2 + $0x36] sm:$0xff] }
  0x39   :  { %v427_v30 = vld [vmem:[#allocation2 + $0x35] sm:$0xff]  ;;  %v426_v31 = vld [vmem:[#allocation2 + $0x2d] sm:$0xff] }
  0x3a   :  { %v554_v33 = vld [vmem:[#allocation2 + $0x2f] sm:$0xff]  ;;  %v559_v13 = vld [vmem:[#allocation2 + $0x77] sm:$0xff] }
  0x3b   :  { %v429_v36 = vld [vmem:[#allocation2 + $0x55] sm:$0xff]  ;;  %v430_v52 = vld [vmem:[#allocation2 + $0x6d] sm:$0xff]  ;;  %757 = vmatpush.bf16.msrb.mxu1 %v2758_v60 }
  0x3c   :  { %326 = vrot.lane.b32.xlu1 %v303_v17, %s2941_s17  ;;  %v365_v40 = vld [vmem:[#allocation2 + $0x54] sm:$0xff]  ;;  %v366_v58 = vld [vmem:[#allocation2 + $0x6c] sm:$0xff] }
  0x3d   :  { %324 = vrot.lane.b32.xlu0 %v302_v18, %s2941_s17  ;;  %v493_v45 = vld [vmem:[#allocation2 + $0x56] sm:$0xff]  ;;  %v494_v63 = vld [vmem:[#allocation2 + $0x6e] sm:$0xff] }
  0x3e   :  { %440 = vrot.lane.b32.xlu2 %v424_v19, %s2946_s26  ;;  %v367_v56 = vld [vmem:[#allocation2 + $0x74] sm:$0xff]  ;;  %v368_v16 = vld [vmem:[#allocation2 + $0x8c] sm:$0xff] }
  0x3f   :  { %v495_v59 = vld [vmem:[#allocation2 + $0x76] sm:$0xff]  ;;  %758 = vmatpush.bf16.msrb.mxu1 %v2757_v0 }
  0x40   :  { %v431_v2 = vld [vmem:[#allocation2 + $0x75] sm:$0xff] }
  0x41   :  { %v2755_v14 = vld [vmem:[%s4159_s1 + $0x18] sm:$0xff]  ;;  %v558_v15 = vld [vmem:[#allocation2 + $0x6f] sm:$0xff] }
  0x42   :  { %v3186_v17 = vld [vmem:[%s4158_s0 + $0x50] sm:$0xff]  ;;  %v3196_v19 = vld [vmem:[%s4158_s0 + $0x58] sm:$0xff] }
  0x43   :  { %274 = vst [vmem:[#allocation2 + $0xb0] sm:$0xff] %v3186_v17  ;;  %v561_v44 = vld [vmem:[#allocation2 + $0x97] sm:$0xff] }
  0x44   :  { %378 = vrot.lane.b32.xlu1 %v361_v20, %s2947_s27  ;;  %275 = vst [vmem:[#allocation2 + $0xb8] sm:$0xff] %v3196_v19 }
  0x45   :  { %376 = vrot.lane.b32.xlu0 %v360_v21, %s2947_s27  ;;  %v2754_v21 = vld [vmem:[%s4159_s1 + $0x10] sm:$0xff] }
  0x46   :  { %506 = vrot.lane.b32.xlu2 %v489_v22, %s2948_s7 }
  0x4a   :  { %v306_v60 = vld [vmem:[#allocation2 + $0xab] sm:$0xff] }
  0x4c   :  { %504 = vrot.lane.b32.xlu1 %v488_v23, %s2948_s7  ;;  %v305_v23 = vld [vmem:[#allocation2 + $0x93] sm:$0xff] }
  0x4d   :  { %442 = vrot.lane.b32.xlu0 %v425_v24, %s2946_s26  ;;  %v2753_v24 = vld [vmem:[%s4159_s1 + $0x8] sm:$0xff] }
  0x4e   :  { %632 = vrot.lane.b32.xlu2 %v3055_v4, %s2949_s9 }
  0x54   :  { %570 = vrot.lane.b32.xlu1 %v553_v25, %s2950_s28 }
  0x55   :  { %568 = vrot.lane.b32.xlu0 %v552_v26, %s2950_s28  ;;  %v433_v26 = vld [vmem:[#allocation2 + $0x95] sm:$0xff] }
  0x56   :  { %382 = vrot.lane.b32.xlu2 %v363_v27, %s2947_s27 }
  0x5c   :  { %380 = vrot.lane.b32.xlu1 %v362_v28, %s2947_s27  ;;  %v2752_v28 = vld [vmem:[%s4159_s1] sm:$0xff] }
  0x5d   :  { %634 = vrot.lane.b32.xlu0 %v3072_v7, %s2949_s9 }
  0x5e   :  { %508 = vrot.lane.b32.xlu2 %v490_v29, %s2948_s7 }
  0x64   :  { %446 = vrot.lane.b32.xlu1 %v427_v30, %s2946_s26  ;;  %v432_v30 = vld [vmem:[#allocation2 + $0x8d] sm:$0xff] }
  0x65   :  { %444 = vrot.lane.b32.xlu0 %v426_v31, %s2946_s26  ;;  %v369_v31 = vld [vmem:[#allocation2 + $0x94] sm:$0xff] }
  0x66   :  { %574 = vrot.lane.b32.xlu2 %v555_v32, %s2950_s28  ;;  %v560_v32 = vld [vmem:[#allocation2 + $0x8f] sm:$0xff] }
  0x6c   :  { %572 = vrot.lane.b32.xlu1 %v554_v33, %s2950_s28 }
  0x6d   :  { %510 = vrot.lane.b32.xlu0 %v491_v34, %s2948_s7 }
  0x6e   :  { %384 = vrot.lane.b32.xlu2 %v364_v35, %s2947_s27  ;;  %v497_v35 = vld [vmem:[#allocation2 + $0x96] sm:$0xff] }
  0x74   :  { %638 = vrot.lane.b32.xlu1 %v3066_v6, %s2949_s9 }
  0x75   :  { %636 = vrot.lane.b32.xlu0 %v3049_v3, %s2949_s9 }
  0x76   :  { %450 = vrot.lane.b32.xlu2 %v429_v36, %s2946_s26  ;;  %v496_v36 = vld [vmem:[#allocation2 + $0x8e] sm:$0xff] }
  0x7c   :  { %448 = vrot.lane.b32.xlu1 %v428_v39, %s2946_s26  ;;  %v3132_v42 = vpop.permute.xlu2 %320 }
  0x7d   :  { %386 = vrot.lane.b32.xlu0 %v365_v40, %s2947_s27 }
  0x7e   :  { %576 = vrot.lane.b32.xlu2 %v556_v41, %s2950_s28  ;;  %v281_v41 = vld [vmem:[#allocation2 + $0x12] sm:$0xff] }
  0x84   :  { %514 = vrot.lane.b32.xlu1 %v493_v45, %s2948_s7 }
  0x85   :  { %512 = vrot.lane.b32.xlu0 %v492_v46, %s2948_s7 }
  0x86   :  { %642 = vrot.lane.b32.xlu2 %v3060_v5, %s2949_s9 }
  0x88   :  { %v3144_v49 = vpop.permute.xlu2 %322 }
  0x8c   :  { %640 = vrot.lane.b32.xlu1 %v3043_v1, %s2949_s9  ;;  %v2756_v1 = vld [vmem:[%s4159_s1 + $0x20] sm:$0xff] }
  0x8d   :  { %578 = vrot.lane.b32.xlu0 %v557_v51, %s2950_s28  ;;  %759 = vmatpush.bf16.msrb.mxu1 %v2756_v1 }
  0x8e   :  { %452 = vrot.lane.b32.xlu2 %v430_v52, %s2946_s26  ;;  %v370_v52 = vld [vmem:[#allocation2 + $0xac] sm:$0xff] }
  0x90   :  { %v3150_v54 = vpop.permute.xlu2 %328 }
  0x91   :  { %760 = vmatpush.bf16.msrb.mxu1 %v2755_v14 }
  0x94   :  { %390 = vrot.lane.b32.xlu1 %v367_v56, %s2947_s27 }
  0x95   :  { %388 = vrot.lane.b32.xlu0 %v366_v58, %s2947_s27  ;;  %761 = vmatpush.bf16.msrb.mxu1 %v2754_v21  ;;  %v307_v58 = vld [vmem:[#allocation2 + $0xb3] sm:$0xff] }
  0x96   :  { %518 = vrot.lane.b32.xlu2 %v495_v59, %s2948_s7  ;;  %v562_v21 = vld [vmem:[#allocation2 + $0xaf] sm:$0xff] }
  0x98   :  { %v3161_v61 = vpop.permute.xlu2 %440 }
  0x99   :  { %762 = vmatpush.bf16.msrb.mxu1 %v2753_v24  ;;  %v283_v24 = vld [vmem:[#allocation2 + $0x32] sm:$0xff] }
  0x9c   :  { %516 = vrot.lane.b32.xlu1 %v494_v63, %s2948_s7 }
  0x9d   :  { %454 = vrot.lane.b32.xlu0 %v431_v2, %s2946_s26  ;;  %763 = vmatpush.bf16.msrb.mxu1 %v2752_v28  ;;  %v499_v28 = vld [vmem:[#allocation2 + $0xb6] sm:$0xff] }
  0x9e   :  { %v3170_v11 = vpop.permute.xlu1 %316  ;;  %644 = vrot.lane.b32.xlu2 %v3084_v9, %s2949_s9 }
  0x9f   :  { %v313_v12 = vpop.permute.xlu0 %312 }
  0xa0   :  { %v3177_v5 = vpop.permute.xlu2 %506  ;;  %v344_v43 = vadd.f32 %v313_v12, %v280_v38  ;;  %v435_v12 = vld [vmem:[#allocation2 + $0xb5] sm:$0xff] }
  0xa4   :  { %582 = vrot.lane.b32.xlu1 %v559_v13, %s2950_s28 }
  0xa5   :  { %580 = vrot.lane.b32.xlu0 %v558_v15, %s2950_s28  ;;  %v434_v15 = vld [vmem:[#allocation2 + $0xad] sm:$0xff] }
  0xa6   :  { %v3190_v18 = vpop.permute.xlu1 %318  ;;  %392 = vrot.lane.b32.xlu2 %v368_v16, %s2947_s27 }
  0xa7   :  { %v315_v20 = vpop.permute.xlu0 %314 }
  0xa8   :  { %v3202_v22 = vpop.permute.xlu2 %632  ;;  %v345_v45 = vadd.f32 %v315_v20, %v281_v41  ;;  %v371_v20 = vld [vmem:[#allocation2 + $0xb4] sm:$0xff] }
  0xac   :  { %330 = vrot.lane.b32.xlu1 %v305_v23, %s2941_s17 }
  0xad   :  { %646 = vrot.lane.b32.xlu0 %v3090_v10, %s2949_s9 }
  0xae   :  { %v3210_v25 = vpop.permute.xlu1 %326  ;;  %458 = vrot.lane.b32.xlu2 %v433_v26, %s2946_s26 }
  0xaf   :  { %v3212_v27 = vpop.permute.xlu0 %324 }
  0xb0   :  { %v3218_v29 = vpop.permute.xlu2 %382 }
  0xb4   :  { %456 = vrot.lane.b32.xlu1 %v432_v30, %s2946_s26  ;;  %v498_v30 = vld [vmem:[#allocation2 + $0xae] sm:$0xff] }
  0xb5   :  { %394 = vrot.lane.b32.xlu0 %v369_v31, %s2947_s27  ;;  %v347_v31 = vadd.f32 %v3190_v18, %v283_v24 }
  0xb6   :  { %v379_v10 = vpop.permute.xlu1 %378  ;;  %584 = vrot.lane.b32.xlu2 %v560_v32, %s2950_s28 }
  0xb7   :  { %v377_v33 = vpop.permute.xlu0 %376  ;;  %v409_v50 = vadd.f32 %v379_v10, %v345_v45  ;;  %v411_v32 = vadd.f32 %v3218_v29, %v347_v31 }
  0xb8   :  { %v3223_v34 = vpop.permute.xlu2 %508  ;;  %v408_v46 = vadd.f32 %v377_v33, %v344_v43  ;;  %v563_v43 = vld [vmem:[#allocation2 + $0xb7] sm:$0xff] }
  0xbc   :  { %522 = vrot.lane.b32.xlu1 %v497_v35, %s2948_s7 }
  0xbd   :  { %520 = vrot.lane.b32.xlu0 %v496_v36, %s2948_s7 }
  0xbe   :  { %v505_v37 = vpop.permute.xlu1 %504  ;;  %650 = vrot.lane.b32.xlu2 %v3138_v47, %s2949_s9 }
  0xbf   :  { %v443_v39 = vpop.permute.xlu0 %442 }
  0xc0   :  { %v3229_v40 = vpop.permute.xlu2 %574  ;;  %v473_v56 = vadd.f32 %v443_v39, %v409_v50 }
  0xc2   :  { %v537_v62 = vadd.f32 %v3177_v5, %v473_v56  ;;  %v308_v56 = vld [vmem:[#allocation2 + $0xcb] sm:$0xff] }
  0xc4   :  { %648 = vrot.lane.b32.xlu1 %v3078_v8, %s2949_s9  ;;  %v472_v8 = vadd.f32 %v3161_v61, %v408_v46  ;;  %v372_v46 = vld [vmem:[#allocation2 + $0xcc] sm:$0xff] }
  0xc5   :  { %586 = vrot.lane.b32.xlu0 %v561_v44, %s2950_s28 }
  0xc6   :  { %v571_v51 = vpop.permute.xlu1 %570  ;;  %396 = vrot.lane.b32.xlu2 %v370_v52, %s2947_s27  ;;  %v536_v59 = vadd.f32 %v505_v37, %v472_v8 }
  0xc7   :  { %v569_v55 = vpop.permute.xlu0 %568  ;;  %v601_v0 = vadd.f32 %v571_v51, %v537_v62 }
  0xc8   :  { %v3248_v57 = vpop.permute.xlu2 %384  ;;  %v600_v63 = vadd.f32 %v569_v55, %v536_v59  ;;  %v437_v59 = vld [vmem:[#allocation2 + $0xd5] sm:$0xff] }
  0xca   :  { %v664_v61 = vadd.f32 %v3202_v22, %v600_v63  ;;  %v282_v22 = vld [vmem:[#allocation2 + $0x2a] sm:$0xff] }
  0xcb   :  { %v346_v10 = vadd.f32 %v3170_v11, %v282_v22  ;;  %v3275_v11 = vld [vmem:[%s4158_s0 + $0x70] sm:$0xff] }
  0xcc   :  { %334 = vrot.lane.b32.xlu1 %v307_v58, %s2941_s17  ;;  %278 = vst [vmem:[#allocation2 + $0xf0] sm:$0xff] %v3275_v11  ;;  %v436_v63 = vld [vmem:[#allocation2 + $0xcd] sm:$0xff] }
  0xcd   :  { %332 = vrot.lane.b32.xlu0 %v306_v60, %s2941_s17  ;;  %v500_v22 = vld [vmem:[#allocation2 + $0xce] sm:$0xff] }
  0xce   :  { %v381_v2 = vpop.permute.xlu1 %380  ;;  %462 = vrot.lane.b32.xlu2 %v435_v12, %s2946_s26  ;;  %v285_v12 = vld [vmem:[#allocation2 + $0x52] sm:$0xff] }
  0xcf   :  { %v635_v1 = vpop.permute.xlu0 %634  ;;  %v410_v33 = vadd.f32 %v381_v2, %v346_v10  ;;  %v284_v2 = vld [vmem:[#allocation2 + $0x4a] sm:$0xff] }
  0xd0   :  { %v665_v13 = vadd.f32 %v635_v1, %v601_v0  ;;  %v3255_v14 = vpop.permute.xlu2 %450  ;;  %v373_v0 = vld [vmem:[#allocation2 + $0xd4] sm:$0xff]  ;;  %v348_v1 = vadd.f32 %v3132_v42, %v284_v2 }
  0xd2   :  { %v680_v16 = vpack.c.bf16 %v665_v13, %v664_v61  ;;  %v349_v61 = vadd.f32 %v3144_v49, %v285_v12 }
  0xd4   :  { %764 = vmatmul.bf16.vlgmr.msrb.gmra.mxu1 %v680_v16  ;;  %460 = vrot.lane.b32.xlu1 %v434_v15, %s2946_s26  ;;  %v564_v15 = vld [vmem:[#allocation2 + $0xcf] sm:$0xff] }
  0xd5   :  { %398 = vrot.lane.b32.xlu0 %v371_v20, %s2947_s27  ;;  %v412_v20 = vadd.f32 %v3248_v57, %v348_v1  ;;  %v502_v1 = vld [vmem:[#allocation2 + $0xee] sm:$0xff] }
  0xd6   :  { %v447_v5 = vpop.permute.xlu1 %446  ;;  %588 = vrot.lane.b32.xlu2 %v562_v21, %s2950_s28  ;;  %v501_v21 = vld [vmem:[#allocation2 + $0xd6] sm:$0xff] }
  0xd7   :  { %v445_v23 = vpop.permute.xlu0 %444  ;;  %v475_v36 = vadd.f32 %v447_v5, %v411_v32 }
  0xd8   :  { %v3260_v26 = vpop.permute.xlu2 %576  ;;  %v474_v38 = vadd.f32 %v445_v23, %v410_v33  ;;  %v565_v33 = vld [vmem:[#allocation2 + $0xd7] sm:$0xff] }
  0xda   :  { %v538_v18 = vadd.f32 %v3223_v34, %v474_v38  ;;  %v3283_v34 = vld [vmem:[%s4158_s0 + $0x78] sm:$0xff]  ;;  %v374_v38 = vld [vmem:[#allocation2 + $0xec] sm:$0xff] }
  0xdb   :  { %279 = vst [vmem:[#allocation2 + $0xf8] sm:$0xff] %v3283_v34 }
  0xdc   :  { %526 = vrot.lane.b32.xlu1 %v499_v28, %s2948_s7 }
  0xdd   :  { %524 = vrot.lane.b32.xlu0 %v498_v30, %s2948_s7 }
  0xde   :  { %v573_v35 = vpop.permute.xlu1 %572  ;;  %654 = vrot.lane.b32.xlu2 %v3196_v19, %s2949_s9 }
  0xdf   :  { %v511_v37 = vpop.permute.xlu0 %510  ;;  %v602_v44 = vadd.f32 %v573_v35, %v538_v18 }
  0xe0   :  { %v643_v39 = vpop.permute.xlu2 %642  ;;  %v539_v41 = vadd.f32 %v511_v37, %v475_v36 }
  0xe2   :  { %v603_v29 = vadd.f32 %v3229_v40, %v539_v41  ;;  %v309_v40 = vld [vmem:[#allocation2 + $0xd3] sm:$0xff] }
  0xe3   :  { %v503_v12 = vld [vmem:[#allocation2 + $0xf6] sm:$0xff] }
  0xe4   :  { %652 = vrot.lane.b32.xlu1 %v3186_v17, %s2949_s9 }
  0xe5   :  { %590 = vrot.lane.b32.xlu0 %v563_v43, %s2950_s28  ;;  %v311_v43 = vld [vmem:[#allocation2 + $0xf3] sm:$0xff] }
  0xe6   :  { %v639_v45 = vpop.permute.xlu1 %638  ;;  %400 = vrot.lane.b32.xlu2 %v372_v46, %s2947_s27  ;;  %v287_v46 = vld [vmem:[#allocation2 + $0x72] sm:$0xff] }
  0xe7   :  { %v667_v50 = vadd.f32 %v639_v45, %v603_v29  ;;  %v637_v51 = vpop.permute.xlu0 %636  ;;  %v439_v29 = vld [vmem:[#allocation2 + $0xf5] sm:$0xff] }
  0xe8   :  { %v666_v52 = vadd.f32 %v637_v51, %v602_v44  ;;  %v3287_v55 = vpop.permute.xlu2 %452  ;;  %v286_v44 = vld [vmem:[#allocation2 + $0x6a] sm:$0xff] }
  0xe9   :  { %v350_v51 = vadd.f32 %v3212_v27, %v286_v44 }
  0xea   :  { %v681_v8 = vpack.c.bf16 %v667_v50, %v666_v52  ;;  %v438_v50 = vld [vmem:[#allocation2 + $0xed] sm:$0xff] }
  0xeb   :  { %v375_v52 = vld [vmem:[#allocation2 + $0xf4] sm:$0xff] }
  0xec   :  { %769 = vmatmul.bf16.gmra.mxu1 %v681_v8  ;;  %338 = vrot.lane.b32.xlu1 %v309_v40, %s2941_s17  ;;  %v351_v40 = vadd.f32 %v3210_v25, %v287_v46 }
  0xed   :  { %336 = vrot.lane.b32.xlu0 %v308_v56, %s2941_s17 }
  0xee   :  { %v449_v58 = vpop.permute.xlu1 %448  ;;  %466 = vrot.lane.b32.xlu2 %v437_v59, %s2946_s26 }
  0xef   :  { %v387_v60 = vpop.permute.xlu0 %386  ;;  %v476_v24 = vadd.f32 %v449_v58, %v412_v20 }
  0xf0   :  { %v3292_v62 = vpop.permute.xlu2 %518  ;;  %v413_v5 = vadd.f32 %v387_v60, %v349_v61  ;;  %v566_v60 = vld [vmem:[#allocation2 + $0xef] sm:$0xff] }
  0xf2   :  { %v477_v28 = vadd.f32 %v3255_v14, %v413_v5 }
  0xf4   :  { %464 = vrot.lane.b32.xlu1 %v436_v63, %s2946_s26 }
  0xf5   :  { %402 = vrot.lane.b32.xlu0 %v373_v0, %s2947_s27 }
  0xf6   :  { %v515_v13 = vpop.permute.xlu1 %514  ;;  %592 = vrot.lane.b32.xlu2 %v564_v15, %s2950_s28 }
  0xf7   :  { %v513_v16 = vpop.permute.xlu0 %512  ;;  %v541_v42 = vadd.f32 %v515_v13, %v477_v28 }
  0xf8   :  { %v3300_v23 = vpop.permute.xlu2 %644  ;;  %v540_v30 = vadd.f32 %v513_v16, %v476_v24  ;;  %v567_v24 = vld [vmem:[#allocation2 + $0xf7] sm:$0xff] }
  0xfa   :  { %v604_v57 = vadd.f32 %v3260_v26, %v540_v30  ;;  %v310_v26 = vld [vmem:[#allocation2 + $0xeb] sm:$0xff] }
  0xfc   :  { %530 = vrot.lane.b32.xlu1 %v501_v21, %s2948_s7 }
  0xfd   :  { %528 = vrot.lane.b32.xlu0 %v500_v22, %s2948_s7 }
  0xfe   :  { %v641_v49 = vpop.permute.xlu1 %640  ;;  %658 = vrot.lane.b32.xlu2 %v3243_v53, %s2949_s9 }
  0xff   :  { %v579_v31 = vpop.permute.xlu0 %578  ;;  %v668_v32 = vadd.f32 %v641_v49, %v604_v57  ;;  %v288_v49 = vld [vmem:[#allocation2 + $0x8a] sm:$0xff] }
 0x100   :  { %v605_v10 = vadd.f32 %v579_v31, %v541_v42  ;;  %v3308_v36 = vpop.permute.xlu2 %392  ;;  %v352_v57 = vadd.f32 %v3150_v54, %v288_v49  ;;  %v3334_v54 = vpop.f32.mrf.mxu1 }
 0x102   :  { %v669_v35 = vadd.f32 %v643_v39, %v605_v10 }
 0x104   :  { %v682_v14 = vpack.c.bf16 %v669_v35, %v668_v32  ;;  %656 = vrot.lane.b32.xlu1 %v3236_v48, %s2949_s9 }
 0x105   :  { %594 = vrot.lane.b32.xlu0 %v565_v33, %s2950_s28 }
 0x106   :  { %774 = vmatmul.bf16.gmra.mxu1 %v682_v14  ;;  %v391_v37 = vpop.permute.xlu1 %390  ;;  %404 = vrot.lane.b32.xlu2 %v374_v38, %s2947_s27 }
 0x107   :  { %v389_v41 = vpop.permute.xlu0 %388  ;;  %v415_v58 = vadd.f32 %v391_v37, %v351_v40 }
 0x108   :  { %v459_v18 = vpop.permute.xlu2 %458  ;;  %v414_v8 = vadd.f32 %v389_v41, %v350_v51 }
 0x10a   :  { %v478_v0 = vadd.f32 %v3287_v55, %v414_v8 }
 0x10c   :  { %342 = vrot.lane.b32.xlu1 %v311_v43, %s2941_s17 }
 0x10d   :  { %340 = vrot.lane.b32.xlu0 %v310_v26, %s2941_s17 }
 0x10e   :  { %v517_v39 = vpop.permute.xlu1 %516  ;;  %470 = vrot.lane.b32.xlu2 %v439_v29, %s2946_s26 }
 0x10f   :  { %v455_v45 = vpop.permute.xlu0 %454  ;;  %v542_v27 = vadd.f32 %v517_v39, %v478_v0 }
 0x110   :  { %v585_v56 = vpop.permute.xlu2 %584  ;;  %v479_v2 = vadd.f32 %v455_v45, %v415_v58 }
 0x112   :  { %v543_v25 = vadd.f32 %v3292_v62, %v479_v2  ;;  %v289_v62 = vld [vmem:[#allocation2 + $0x92] sm:$0xff] }
 0x114   :  { %468 = vrot.lane.b32.xlu1 %v438_v50, %s2946_s26  ;;  %s2952_s26 = smov 40  }
 0x115   :  { %406 = vrot.lane.b32.xlu0 %v375_v52, %s2947_s27  ;;  %v290_v52 = vld [vmem:[#allocation2 + $0xaa] sm:$0xff] }
 0x116   :  { %v583_v59 = vpop.permute.xlu1 %582  ;;  %596 = vrot.lane.b32.xlu2 %v566_v60, %s2950_s28 }
 0x117   :  { %v581_v63 = vpop.permute.xlu0 %580  ;;  %v607_v13 = vadd.f32 %v583_v59, %v543_v25 }
 0x118   :  { %v606_v61 = vadd.f32 %v581_v63, %v542_v27  ;;  %v651_v20 = vpop.permute.xlu2 %650  ;;  %v3336_v63 = vpop.f32.mrf.mxu1 }
 0x11a   :  { %v670_v55 = vadd.f32 %v3300_v23, %v606_v61  ;;  %v416_v23 = vadd.f32 %v3308_v36, %v352_v57 }
 0x11c   :  { %534 = vrot.lane.b32.xlu1 %v503_v12, %s2948_s7  ;;  %v3341_v12 = vld [vmem:[%s4160_s2] ss:$0 sm:$0xff]  ;;  %s2951_s2 = smov 48  }
 0x11d   :  { %532 = vrot.lane.b32.xlu0 %v502_v1, %s2948_s7 }
 0x11e   :  { %v331_v15 = vpop.permute.xlu1 %330  ;;  %662 = vrot.lane.b32.xlu2 %v3283_v34, %s2949_s9 }
 0x11f   :  { %v647_v16 = vpop.permute.xlu0 %646  ;;  %v353_v30 = vadd.f32 %v331_v15, %v289_v62 }
 0x120   :  { %v671_v5 = vadd.f32 %v647_v16, %v607_v13  ;;  %v397_v42 = vpop.permute.xlu2 %396 }
 0x122   :  { %v683_v21 = vpack.c.bf16 %v671_v5, %v670_v55 }
 0x124   :  { %779 = vmatmul.bf16.gmra.mxu1 %v683_v21  ;;  %660 = vrot.lane.b32.xlu1 %v3275_v11, %s2949_s9 }
 0x125   :  { %598 = vrot.lane.b32.xlu0 %v567_v24, %s2950_s28  ;;  %s2953_s28 = smov 32  }
 0x126   :  { %v457_v22 = vpop.permute.xlu1 %456 }
 0x127   :  { %v395_v28 = vpop.permute.xlu0 %394  ;;  %v480_v35 = vadd.f32 %v457_v22, %v416_v23 }
 0x128   :  { %v417_v31 = vadd.f32 %v395_v28, %v353_v30  ;;  %v463_v14 = vpop.permute.xlu2 %462 }
 0x12a   :  { %v481_v33 = vadd.f32 %v459_v18, %v417_v31  ;;  %v291_v18 = vld [vmem:[#allocation2 + $0xb2] sm:$0xff] }
 0x12e   :  { %v523_v10 = vpop.permute.xlu1 %522 }
 0x12f   :  { %v521_v32 = vpop.permute.xlu0 %520  ;;  %v545_v37 = vadd.f32 %v523_v10, %v481_v33 }
 0x130   :  { %v544_v38 = vadd.f32 %v521_v32, %v480_v35  ;;  %v589_v46 = vpop.permute.xlu2 %588  ;;  %v292_v35 = vld [vmem:[#allocation2 + $0xca] sm:$0xff] }
 0x132   :  { %v608_v26 = vadd.f32 %v585_v56, %v544_v38 }
 0x136   :  { %v649_v41 = vpop.permute.xlu1 %648 }
 0x137   :  { %v587_v43 = vpop.permute.xlu0 %586  ;;  %v672_v29 = vadd.f32 %v649_v41, %v608_v26 }
 0x138   :  { %v609_v39 = vadd.f32 %v587_v43, %v545_v37  ;;  %v655_v58 = vpop.permute.xlu2 %654  ;;  %v293_v37 = vld [vmem:[#allocation2 + $0xd2] sm:$0xff] }
 0x13a   :  { %v673_v44 = vadd.f32 %v651_v20, %v609_v39 }
 0x13c   :  { %v684_v45 = vpack.c.bf16 %v673_v44, %v672_v29 }
 0x13e   :  { %784 = vmatmul.bf16.gmra.mxu1 %v684_v45  ;;  %v335_v50 = vpop.permute.xlu1 %334 }
 0x13f   :  { %v333_v51 = vpop.permute.xlu0 %332  ;;  %v355_v59 = vadd.f32 %v335_v50, %v291_v18 }
 0x140   :  { %v354_v36 = vadd.f32 %v333_v51, %v290_v52  ;;  %v401_v13 = vpop.permute.xlu2 %400 }
 0x142   :  { %v418_v60 = vadd.f32 %v397_v42, %v354_v36 }
 0x146   :  { %v461_v40 = vpop.permute.xlu1 %460 }
 0x147   :  { %v399_v8 = vpop.permute.xlu0 %398  ;;  %v482_v0 = vadd.f32 %v461_v40, %v418_v60 }
 0x148   :  { %v419_v56 = vadd.f32 %v399_v8, %v355_v59  ;;  %v467_v42 = vpop.permute.xlu2 %466 }
 0x14a   :  { %v483_v1 = vadd.f32 %v463_v14, %v419_v56 }
 0x14e   :  { %v527_v2 = vpop.permute.xlu1 %526 }
 0x14f   :  { %v525_v27 = vpop.permute.xlu0 %524  ;;  %v547_v16 = vadd.f32 %v527_v2, %v483_v1 }
 0x150   :  { %v546_v25 = vadd.f32 %v525_v27, %v482_v0  ;;  %v593_v38 = vpop.permute.xlu2 %592 }
 0x151   :  { %v765_v61 = vpop.f32.mrf.mxu1 }
 0x152   :  { %v766_v15 = vadd.f32 %v3341_v12, %v765_v61  ;;  %v610_v20 = vadd.f32 %v589_v46, %v546_v25 }
 0x154   :  { %v805_v5 = vmax.f32 %v766_v15, 0.0 }
 0x156   :  { %821 = vst [vmem:[#allocation2 + $0x10] sm:$0xff] %v805_v5  ;;  %v653_v55 = vpop.permute.xlu1 %652 }
 0x157   :  { %v591_v21 = vpop.permute.xlu0 %590  ;;  %v674_v62 = vadd.f32 %v653_v55, %v610_v20 }
 0x158   :  { %v611_v24 = vadd.f32 %v591_v21, %v547_v16  ;;  %v659_v59 = vpop.permute.xlu2 %658 }
 0x159   :  { %v767_v22 = vpop.f32.mrf.mxu1 }
 0x15a   :  { %v675_v28 = vadd.f32 %v655_v58, %v611_v24  ;;  %v768_v30 = vadd.f32 %v3341_v12, %v767_v22 }
 0x15c   :  { %v806_v49 = vmax.f32 %v768_v30, 0.0  ;;  %v685_v31 = vpack.c.bf16 %v675_v28, %v674_v62 }
 0x15d   :  { %v981_v57 = vld [vmem:[#allocation2 + $0xd] sm:$0xff] }
 0x15e   :  { %v917_v10 = vld [vmem:[#allocation2 + $0xc] sm:$0xff]  ;;  %822 = vst [vmem:[#allocation2 + $0x18] sm:$0xff] %v806_v49  ;;  %789 = vmatmul.bf16.gmra.mxu1 %v685_v31  ;;  %997 = vrot.lane.b32.xlu1 %v981_v57, %s2949_s9  ;;  %v339_v23 = vpop.permute.xlu1 %338 }
 0x15f   :  { %v853_v32 = vld [vmem:[#allocation2 + $0xb] sm:$0xff]  ;;  %933 = vrot.lane.b32.xlu2 %v917_v10, %s2948_s7  ;;  %v337_v33 = vpop.permute.xlu0 %336  ;;  %v357_v29 = vadd.f32 %v339_v23, %v293_v37 }
 0x160   :  { %869 = vrot.lane.b32.xlu0 %v853_v32, %s2947_s27  ;;  %v356_v14 = vadd.f32 %v337_v33, %v292_v35  ;;  %v1109_v41 = vld [vmem:[#allocation2 + $0xf] sm:$0xff]  ;;  %v405_v55 = vpop.permute.xlu2 %404 }
 0x161   :  { %v1045_v43 = vld [vmem:[#allocation2 + $0xe] sm:$0xff] }
 0x162   :  { %v420_v44 = vadd.f32 %v401_v13, %v356_v14  ;;  %v295_v23 = vld [vmem:[#allocation2 + $0xf2] sm:$0xff] }
 0x165   :  { %v854_v36 = vld [vmem:[#allocation2 + $0x13] sm:$0xff] }
 0x166   :  { %1189 = vrot.lane.b32.xlu1 %v805_v5, %s2951_s2  ;;  %v465_v26 = vpop.permute.xlu1 %464  ;;  %v982_v18 = vld [vmem:[#allocation2 + $0x15] sm:$0xff] }
 0x167   :  { %1125 = vrot.lane.b32.xlu2 %v1109_v41, %s2952_s26  ;;  %v403_v39 = vpop.permute.xlu0 %402  ;;  %v484_v51 = vadd.f32 %v465_v26, %v420_v44  ;;  %v918_v40 = vld [vmem:[#allocation2 + $0x14] sm:$0xff] }
 0x168   :  { %1061 = vrot.lane.b32.xlu0 %v1045_v43, %s2953_s28  ;;  %v421_v50 = vadd.f32 %v403_v39, %v357_v29  ;;  %v1046_v61 = vld [vmem:[#allocation2 + $0x16] sm:$0xff]  ;;  %v471_v57 = vpop.permute.xlu2 %470 }
 0x169   :  { %v770_v45 = vpop.f32.mrf.mxu1  ;;  %v1110_v13 = vld [vmem:[#allocation2 + $0x17] sm:$0xff] }
 0x16a   :  { %v3352_v46 = vadd.f32 %v3341_v12, %v770_v45  ;;  %v485_v60 = vadd.f32 %v467_v42, %v421_v50 }
 0x16c   :  { %v807_v52 = vmax.f32 %v3352_v46, 0.0 }
 0x16e   :  { %823 = vst [vmem:[#allocation2 + $0x30] sm:$0xff] %v807_v52  ;;  %871 = vrot.lane.b32.xlu1 %v854_v36, %s2947_s27  ;;  %v531_v8 = vpop.permute.xlu1 %530 }
 0x16f   :  { %999 = vrot.lane.b32.xlu2 %v982_v18, %s2949_s9  ;;  %v529_v58 = vpop.permute.xlu0 %528  ;;  %v549_v27 = vadd.f32 %v531_v8, %v485_v60 }
 0x170   :  { %935 = vrot.lane.b32.xlu0 %v918_v40, %s2948_s7  ;;  %v548_v56 = vadd.f32 %v529_v58, %v484_v51  ;;  %v597_v51 = vpop.permute.xlu2 %596 }
 0x171   :  { %v772_v0 = vpop.f32.mrf.mxu1 }
 0x172   :  { %v3361_v2 = vadd.f32 %v3341_v12, %v772_v0  ;;  %v612_v1 = vadd.f32 %v593_v38, %v548_v56 }
 0x174   :  { %v808_v25 = vmax.f32 %v3361_v2, 0.0 }
 0x175   :  { %v983_v62 = vld [vmem:[#allocation2 + $0x2d] sm:$0xff] }
 0x176   :  { %824 = vst [vmem:[#allocation2 + $0x38] sm:$0xff] %v808_v25  ;;  %1063 = vrot.lane.b32.xlu1 %v1046_v61, %s2953_s28  ;;  %v657_v15 = vpop.permute.xlu1 %656  ;;  %v919_v22 = vld [vmem:[#allocation2 + $0x2c] sm:$0xff] }
 0x177   :  { %1191 = vrot.lane.b32.xlu2 %v806_v49, %s2951_s2  ;;  %v595_v16 = vpop.permute.xlu0 %594  ;;  %v676_v5 = vadd.f32 %v657_v15, %v612_v1  ;;  %v855_v28 = vld [vmem:[#allocation2 + $0x2b] sm:$0xff] }
 0x178   :  { %1127 = vrot.lane.b32.xlu0 %v1110_v13, %s2952_s26  ;;  %v613_v20 = vadd.f32 %v595_v16, %v549_v27  ;;  %v294_v49 = vld [vmem:[#allocation2 + $0xea] sm:$0xff]  ;;  %v663_v61 = vpop.permute.xlu2 %662 }
 0x179   :  { %v1111_v14 = vld [vmem:[#allocation2 + $0x2f] sm:$0xff] }
 0x17a   :  { %v677_v21 = vadd.f32 %v659_v59, %v613_v20  ;;  %v1047_v37 = vld [vmem:[#allocation2 + $0x2e] sm:$0xff] }
 0x17c   :  { %v686_v24 = vpack.c.bf16 %v677_v21, %v676_v5 }
 0x17d   :  { %v856_v33 = vld [vmem:[#allocation2 + $0x33] sm:$0xff] }
 0x17e   :  { %794 = vmatmul.bf16.gmra.mxu1 %v686_v24  ;;  %1001 = vrot.lane.b32.xlu1 %v983_v62, %s2949_s9  ;;  %v343_v30 = vpop.permute.xlu1 %342  ;;  %v1048_v50 = vld [vmem:[#allocation2 + $0x36] sm:$0xff] }
 0x17f   :  { %937 = vrot.lane.b32.xlu2 %v919_v22, %s2948_s7  ;;  %v341_v42 = vpop.permute.xlu0 %340  ;;  %v359_v43 = vadd.f32 %v343_v30, %v295_v23  ;;  %v984_v18 = vld [vmem:[#allocation2 + $0x35] sm:$0xff] }
 0x180   :  { %873 = vrot.lane.b32.xlu0 %v855_v28, %s2947_s27  ;;  %v358_v10 = vadd.f32 %v341_v42, %v294_v49  ;;  %v920_v40 = vld [vmem:[#allocation2 + $0x34] sm:$0xff] }
 0x181   :  { %v1112_v2 = vld [vmem:[#allocation2 + $0x37] sm:$0xff] }
 0x182   :  { %v422_v26 = vadd.f32 %v405_v55, %v358_v10  ;;  %v2833_v28 = vld [vmem:[#allocation2 + $0x78] sm:$0xff] }
 0x183   :  { %v775_v31 = vpop.f32.mrf.mxu1  ;;  %v142_v30 = vpack.c.bf16 %v2833_v28, %v3084_v9  ;;  %v2767_v9 = vld [vmem:[#allocation3 + $0x38] sm:$0xff] }
 0x184   :  { %v3371_v32 = vadd.f32 %v3341_v12, %v775_v31  ;;  %1313 = vmatpush.bf16.msrb.mxu2 %v2767_v9 }
 0x185   :  { %238 = vmatmul.bf16.vlgmr.msra.gmra.mxu2 %v142_v30 }
 0x186   :  { %v809_v35 = vmax.f32 %v3371_v32, 0.0  ;;  %875 = vrot.lane.b32.xlu1 %v856_v33, %s2947_s27  ;;  %v469_v38 = vpop.permute.xlu1 %468  ;;  %v2766_v33 = vld [vmem:[#allocation3 + $0x30] sm:$0xff] }
 0x187   :  { %1129 = vrot.lane.b32.xlu2 %v1111_v14, %s2952_s26  ;;  %v407_v41 = vpop.permute.xlu0 %406  ;;  %v486_v44 = vadd.f32 %v469_v38, %v422_v26 }
 0x188   :  { %1065 = vrot.lane.b32.xlu0 %v1047_v37, %s2953_s28  ;;  %825 = vst [vmem:[#allocation2 + $0x50] sm:$0xff] %v809_v35  ;;  %v423_v29 = vadd.f32 %v407_v41, %v359_v43  ;;  %1314 = vmatpush.bf16.msrb.mxu2 %v2766_v33  ;;  %v2834_v37 = vld [vmem:[#allocation2 + $0x90] sm:$0xff]  ;;  %v2765_v43 = vld [vmem:[#allocation3 + $0x28] sm:$0xff] }
 0x189   :  { %v143_v38 = vpack.c.bf16 %v3138_v47, %v2834_v37 }
 0x18a   :  { %v487_v59 = vadd.f32 %v471_v57, %v423_v29 }
 0x18b   :  { %v777_v39 = vpop.f32.mrf.mxu1 }
 0x18c   :  { %v778_v45 = vadd.f32 %v3341_v12, %v777_v39  ;;  %1315 = vmatpush.bf16.msrb.mxu2 %v2765_v43 }
 0x18e   :  { %v810_v36 = vmax.f32 %v778_v45, 0.0  ;;  %1067 = vrot.lane.b32.xlu1 %v1048_v50, %s2953_s28  ;;  %v535_v8 = vpop.permute.xlu1 %534  ;;  %v2763_v50 = vld [vmem:[#allocation3 + $0x18] sm:$0xff] }
 0x18f   :  { %1003 = vrot.lane.b32.xlu2 %v984_v18, %s2949_s9  ;;  %v533_v58 = vpop.permute.xlu0 %532  ;;  %v551_v56 = vadd.f32 %v535_v8, %v487_v59  ;;  %v921_v55 = vld [vmem:[#allocation2 + $0x4c] sm:$0xff] }
 0x190   :  { %939 = vrot.lane.b32.xlu0 %v920_v40, %s2948_s7  ;;  %826 = vst [vmem:[#allocation2 + $0x58] sm:$0xff] %v810_v36  ;;  %v550_v60 = vadd.f32 %v533_v58, %v486_v44  ;;  %v857_v21 = vld [vmem:[#allocation2 + $0x4b] sm:$0xff] }
 0x191   :  { %v985_v24 = vld [vmem:[#allocation2 + $0x4d] sm:$0xff] }
 0x192   :  { %v614_v0 = vadd.f32 %v597_v51, %v550_v60  ;;  %v1113_v10 = vld [vmem:[#allocation2 + $0x4f] sm:$0xff] }
 0x193   :  { %v1049_v23 = vld [vmem:[#allocation2 + $0x4e] sm:$0xff] }
 0x194   :  { %v2762_v40 = vld [vmem:[#allocation3 + $0x10] sm:$0xff] }
 0x195   :  { %243 = vmatmul.bf16.gmra.mxu2 %v143_v38 }
 0x196   :  { %1193 = vrot.lane.b32.xlu1 %v807_v52, %s2951_s2  ;;  %v661_v27 = vpop.permute.xlu1 %660 }
 0x197   :  { %1195 = vrot.lane.b32.xlu2 %v808_v25, %s2951_s2  ;;  %v599_v1 = vpop.permute.xlu0 %598  ;;  %v678_v15 = vadd.f32 %v661_v27, %v614_v0  ;;  %v858_v5 = vld [vmem:[#allocation2 + $0x53] sm:$0xff] }
 0x198   :  { %1131 = vrot.lane.b32.xlu0 %v1112_v2, %s2952_s26  ;;  %v615_v13 = vadd.f32 %v599_v1, %v551_v56  ;;  %v986_v62 = vld [vmem:[#allocation2 + $0x55] sm:$0xff]  ;;  %v2761_v56 = vld [vmem:[#allocation3 + $0x8] sm:$0xff]  ;;  %v2760_v2 = vld [vmem:[#allocation3] sm:$0xff] }
 0x199   :  { %v922_v22 = vld [vmem:[#allocation2 + $0x54] sm:$0xff] }
 0x19a   :  { %v679_v16 = vadd.f32 %v663_v61, %v615_v13  ;;  %v1050_v57 = vld [vmem:[#allocation2 + $0x56] sm:$0xff]  ;;  %v139_v13 = vpack.c.bf16 %v3072_v7, %v3055_v4 }
 0x19b   :  { %v1114_v14 = vld [vmem:[#allocation2 + $0x57] sm:$0xff] }
 0x19c   :  { %v687_v20 = vpack.c.bf16 %v679_v16, %v678_v15  ;;  %223 = vmatmul.bf16.vlgmr.msra.gmra.mxu0 %v139_v13 }
 0x19e   :  { %799 = vmatmul.bf16.gmra.mxu1 %v687_v20  ;;  %879 = vrot.lane.b32.xlu1 %v858_v5, %s2947_s27 }
 0x19f   :  { %941 = vrot.lane.b32.xlu2 %v921_v55, %s2948_s7 }
 0x1a0   :  { %877 = vrot.lane.b32.xlu0 %v857_v21, %s2947_s27 }
 0x1a1   :  { %v780_v46 = vpop.f32.mrf.mxu1 }
 0x1a2   :  { %v3392_v52 = vadd.f32 %v3341_v12, %v780_v46  ;;  %v837_v46 = vld [vmem:[#allocation2 + $0xa] sm:$0xff] }
 0x1a4   :  { %v811_v25 = vmax.f32 %v3392_v52, 0.0 }
 0x1a6   :  { %827 = vst [vmem:[#allocation2 + $0x70] sm:$0xff] %v811_v25  ;;  %1005 = vrot.lane.b32.xlu1 %v985_v24, %s2949_s9 }
 0x1a7   :  { %1007 = vrot.lane.b32.xlu2 %v986_v62, %s2949_s9 }
 0x1a8   :  { %943 = vrot.lane.b32.xlu0 %v922_v22, %s2948_s7 }
 0x1a9   :  { %v782_v42 = vpop.f32.mrf.mxu1 }
 0x1aa   :  { %v3402_v49 = vadd.f32 %v3341_v12, %v782_v42  ;;  %v838_v42 = vld [vmem:[#allocation2 + $0x12] sm:$0xff] }
 0x1ac   :  { %v812_v31 = vmax.f32 %v3402_v49, 0.0 }
 0x1ad   :  { %v923_v44 = vld [vmem:[#allocation2 + $0x6c] sm:$0xff] }
 0x1ae   :  { %828 = vst [vmem:[#allocation2 + $0x78] sm:$0xff] %v812_v31  ;;  %1071 = vrot.lane.b32.xlu1 %v1050_v57, %s2953_s28  ;;  %v859_v45 = vld [vmem:[#allocation2 + $0x6b] sm:$0xff] }
 0x1af   :  { %1133 = vrot.lane.b32.xlu2 %v1113_v10, %s2952_s26  ;;  %v987_v18 = vld [vmem:[#allocation2 + $0x6d] sm:$0xff] }
 0x1b0   :  { %1069 = vrot.lane.b32.xlu0 %v1049_v23, %s2953_s28  ;;  %v1115_v27 = vld [vmem:[#allocation2 + $0x6f] sm:$0xff] }
 0x1b1   :  { %v1051_v1 = vld [vmem:[#allocation2 + $0x6e] sm:$0xff] }
 0x1b5   :  { %v860_v32 = vld [vmem:[#allocation2 + $0x73] sm:$0xff] }
 0x1b6   :  { %1197 = vrot.lane.b32.xlu1 %v809_v35, %s2951_s2  ;;  %v2764_v35 = vld [vmem:[#allocation3 + $0x20] sm:$0xff]  ;;  %v988_v58 = vld [vmem:[#allocation2 + $0x75] sm:$0xff] }
 0x1b7   :  { %1199 = vrot.lane.b32.xlu2 %v810_v36, %s2951_s2  ;;  %1316 = vmatpush.bf16.msrb.mxu2 %v2764_v35  ;;  %v924_v59 = vld [vmem:[#allocation2 + $0x74] sm:$0xff] }
 0x1b8   :  { %1135 = vrot.lane.b32.xlu0 %v1114_v14, %s2952_s26  ;;  %v1052_v0 = vld [vmem:[#allocation2 + $0x76] sm:$0xff] }
 0x1b9   :  { %v3416_v41 = vpop.permute.xlu2 %933  ;;  %v1116_v20 = vld [vmem:[#allocation2 + $0x77] sm:$0xff] }
 0x1bb   :  { %v785_v26 = vpop.f32.mrf.mxu1  ;;  %1317 = vmatpush.bf16.msrb.mxu2 %v2763_v50 }
 0x1bc   :  { %v3419_v39 = vadd.f32 %v3341_v12, %v785_v26 }
 0x1be   :  { %v813_v29 = vmax.f32 %v3419_v39, 0.0  ;;  %883 = vrot.lane.b32.xlu1 %v860_v32, %s2947_s27 }
 0x1bf   :  { %945 = vrot.lane.b32.xlu2 %v923_v44, %s2948_s7  ;;  %1318 = vmatpush.bf16.msrb.mxu2 %v2762_v40 }
 0x1c0   :  { %881 = vrot.lane.b32.xlu0 %v859_v45, %s2947_s27  ;;  %829 = vst [vmem:[#allocation2 + $0x90] sm:$0xff] %v813_v29 }
 0x1c1   :  { %v3427_v47 = vpop.permute.xlu2 %1125 }
 0x1c3   :  { %v787_v51 = vpop.f32.mrf.mxu1  ;;  %1319 = vmatpush.bf16.msrb.mxu2 %v2761_v56 }
 0x1c4   :  { %v3430_v36 = vadd.f32 %v3341_v12, %v787_v51 }
 0x1c6   :  { %v814_v8 = vmax.f32 %v3430_v36, 0.0  ;;  %1009 = vrot.lane.b32.xlu1 %v987_v18, %s2949_s9 }
 0x1c7   :  { %1011 = vrot.lane.b32.xlu2 %v988_v58, %s2949_s9  ;;  %1320 = vmatpush.bf16.msrb.mxu2 %v2760_v2  ;;  %v861_v22 = vld [vmem:[#allocation2 + $0x8b] sm:$0xff] }
 0x1c8   :  { %947 = vrot.lane.b32.xlu0 %v924_v59, %s2948_s7  ;;  %830 = vst [vmem:[#allocation2 + $0x98] sm:$0xff] %v814_v8  ;;  %v989_v37 = vld [vmem:[#allocation2 + $0x8d] sm:$0xff] }
 0x1c9   :  { %v1000_v60 = vpop.permute.xlu2 %999  ;;  %v1117_v59 = vld [vmem:[#allocation2 + $0x8f] sm:$0xff] }
 0x1ca   :  { %v1053_v56 = vld [vmem:[#allocation2 + $0x8e] sm:$0xff] }
 0x1ce   :  { %1075 = vrot.lane.b32.xlu1 %v1052_v0, %s2953_s28 }
 0x1cf   :  { %1137 = vrot.lane.b32.xlu2 %v1115_v27, %s2952_s26  ;;  %v862_v62 = vld [vmem:[#allocation2 + $0x93] sm:$0xff] }
 0x1d0   :  { %1073 = vrot.lane.b32.xlu0 %v1051_v1, %s2953_s28  ;;  %v998_v61 = vpop.permute.xlu1 %997  ;;  %v926_v43 = vld [vmem:[#allocation2 + $0x94] sm:$0xff] }
 0x1d1   :  { %v1192_v15 = vpop.permute.xlu2 %1191  ;;  %v1054_v58 = vld [vmem:[#allocation2 + $0x96] sm:$0xff] }
 0x1d2   :  { %v870_v16 = vpop.permute.xlu0 %869  ;;  %v1118_v1 = vld [vmem:[#allocation2 + $0x97] sm:$0xff] }
 0x1d3   :  { %v901_v4 = vadd.f32 %v870_v16, %v837_v46 }
 0x1d5   :  { %v965_v28 = vadd.f32 %v3416_v41, %v901_v4  ;;  %v990_v41 = vld [vmem:[#allocation2 + $0x95] sm:$0xff] }
 0x1d6   :  { %1201 = vrot.lane.b32.xlu1 %v811_v25, %s2951_s2  ;;  %v925_v25 = vld [vmem:[#allocation2 + $0x8c] sm:$0xff] }
 0x1d7   :  { %1203 = vrot.lane.b32.xlu2 %v812_v31, %s2951_s2  ;;  %v1029_v10 = vadd.f32 %v998_v61, %v965_v28 }
 0x1d8   :  { %1139 = vrot.lane.b32.xlu0 %v1116_v20, %s2952_s26  ;;  %v1190_v5 = vpop.permute.xlu1 %1189 }
 0x1d9   :  { %v3450_v55 = vpop.permute.xlu2 %937 }
 0x1da   :  { %v1062_v21 = vpop.permute.xlu0 %1061 }
 0x1db   :  { %v790_v7 = vpop.f32.mrf.mxu1  ;;  %v1093_v14 = vadd.f32 %v1062_v21, %v1029_v10 }
 0x1dc   :  { %v3453_v24 = vadd.f32 %v3341_v12, %v790_v7 }
 0x1dd   :  { %v1157_v35 = vadd.f32 %v3427_v47, %v1093_v14  ;;  %v140_v47 = vpack.c.bf16 %v3066_v6, %v3049_v3  ;;  %v839_v3 = vld [vmem:[#allocation2 + $0x2a] sm:$0xff] }
 0x1de   :  { %v815_v52 = vmax.f32 %v3453_v24, 0.0  ;;  %887 = vrot.lane.b32.xlu1 %v862_v62, %s2947_s27 }
 0x1df   :  { %949 = vrot.lane.b32.xlu2 %v925_v25, %s2948_s7  ;;  %v1221_v18 = vadd.f32 %v1190_v5, %v1157_v35  ;;  %228 = vmatmul.bf16.gmra.mxu0 %v140_v47 }
 0x1e0   :  { %885 = vrot.lane.b32.xlu0 %v861_v22, %s2947_s27  ;;  %831 = vst [vmem:[#allocation2 + $0xb0] sm:$0xff] %v815_v52  ;;  %v872_v30 = vpop.permute.xlu1 %871 }
 0x1e1   :  { %v3462_v49 = vpop.permute.xlu2 %1129  ;;  %v902_v31 = vadd.f32 %v872_v30, %v838_v42 }
 0x1e2   :  { %v936_v57 = vpop.permute.xlu0 %935 }
 0x1e3   :  { %v966_v23 = vadd.f32 %v936_v57, %v902_v31  ;;  %v792_v9 = vpop.f32.mrf.mxu1 }
 0x1e4   :  { %v3465_v33 = vadd.f32 %v3341_v12, %v792_v9 }
 0x1e5   :  { %v1030_v26 = vadd.f32 %v1000_v60, %v966_v23 }
 0x1e6   :  { %v816_v38 = vmax.f32 %v3465_v33, 0.0  ;;  %1013 = vrot.lane.b32.xlu1 %v989_v37, %s2949_s9 }
 0x1e7   :  { %1015 = vrot.lane.b32.xlu2 %v990_v41, %s2949_s9  ;;  %v863_v36 = vld [vmem:[#allocation2 + $0xab] sm:$0xff] }
 0x1e8   :  { %951 = vrot.lane.b32.xlu0 %v926_v43, %s2948_s7  ;;  %832 = vst [vmem:[#allocation2 + $0xb8] sm:$0xff] %v816_v38  ;;  %v1064_v32 = vpop.permute.xlu1 %1063  ;;  %v991_v31 = vld [vmem:[#allocation2 + $0xad] sm:$0xff] }
 0x1e9   :  { %v1004_v44 = vpop.permute.xlu2 %1003  ;;  %v1094_v45 = vadd.f32 %v1064_v32, %v1030_v26 }
 0x1ea   :  { %v1128_v50 = vpop.permute.xlu0 %1127 }
 0x1eb   :  { %v1158_v51 = vadd.f32 %v1128_v50, %v1094_v45  ;;  %v1119_v45 = vld [vmem:[#allocation2 + $0xaf] sm:$0xff] }
 0x1ec   :  { %v1055_v50 = vld [vmem:[#allocation2 + $0xae] sm:$0xff] }
 0x1ed   :  { %v1222_v40 = vadd.f32 %v1192_v15, %v1158_v51 }
 0x1ee   :  { %1079 = vrot.lane.b32.xlu1 %v1054_v58, %s2953_s28 }
 0x1ef   :  { %1141 = vrot.lane.b32.xlu2 %v1117_v59, %s2952_s26  ;;  %v1237_v60 = vpack.c.bf16 %v1222_v40, %v1221_v18  ;;  %v864_v5 = vld [vmem:[#allocation2 + $0xb3] sm:$0xff] }
 0x1f0   :  { %1077 = vrot.lane.b32.xlu0 %v1053_v56, %s2953_s28  ;;  %v1002_v0 = vpop.permute.xlu1 %1001  ;;  %v928_v23 = vld [vmem:[#allocation2 + $0xb4] sm:$0xff] }
 0x1f1   :  { %v1196_v2 = vpop.permute.xlu2 %1195  ;;  %1321 = vmatmul.bf16.vlgmr.msrb.gmra.mxu2 %v1237_v60 }
 0x1f2   :  { %v874_v27 = vpop.permute.xlu0 %873 }
 0x1f3   :  { %v903_v16 = vadd.f32 %v874_v27, %v839_v3 }
 0x1f5   :  { %v967_v21 = vadd.f32 %v3450_v55, %v903_v16  ;;  %v992_v55 = vld [vmem:[#allocation2 + $0xb5] sm:$0xff] }
 0x1f6   :  { %1205 = vrot.lane.b32.xlu1 %v813_v29, %s2951_s2  ;;  %v927_v29 = vld [vmem:[#allocation2 + $0xac] sm:$0xff] }
 0x1f7   :  { %1207 = vrot.lane.b32.xlu2 %v814_v8, %s2951_s2  ;;  %v840_v8 = vld [vmem:[#allocation2 + $0x32] sm:$0xff]  ;;  %v1031_v28 = vadd.f32 %v1002_v0, %v967_v21 }
 0x1f8   :  { %1143 = vrot.lane.b32.xlu0 %v1118_v1, %s2952_s26  ;;  %v876_v61 = vpop.permute.xlu1 %875 }
 0x1f9   :  { %v3486_v13 = vpop.permute.xlu2 %941  ;;  %v904_v46 = vadd.f32 %v876_v61, %v840_v8 }
 0x1fa   :  { %v1066_v15 = vpop.permute.xlu0 %1065 }
 0x1fb   :  { %v795_v6 = vpop.f32.mrf.mxu1  ;;  %v1095_v57 = vadd.f32 %v1066_v15, %v1031_v28 }
 0x1fc   :  { %v3489_v20 = vadd.f32 %v3341_v12, %v795_v6 }
 0x1fd   :  { %v1159_v43 = vadd.f32 %v3462_v49, %v1095_v57  ;;  %v1120_v49 = vld [vmem:[#allocation2 + $0xb7] sm:$0xff] }
 0x1fe   :  { %v817_v39 = vmax.f32 %v3489_v20, 0.0  ;;  %891 = vrot.lane.b32.xlu1 %v864_v5, %s2947_s27  ;;  %v844_v20 = vld [vmem:[#allocation2 + $0x72] sm:$0xff] }
 0x1ff   :  { %953 = vrot.lane.b32.xlu2 %v927_v29, %s2948_s7 }
 0x200   :  { %889 = vrot.lane.b32.xlu0 %v863_v36, %s2947_s27  ;;  %833 = vst [vmem:[#allocation2 + $0xd0] sm:$0xff] %v817_v39  ;;  %v1068_v4 = vpop.permute.xlu1 %1067 }
 0x201   :  { %v3498_v7 = vpop.permute.xlu2 %1007 }
 0x202   :  { %v940_v62 = vpop.permute.xlu0 %939 }
 0x203   :  { %v968_v25 = vadd.f32 %v940_v62, %v904_v46  ;;  %v797_v22 = vpop.f32.mrf.mxu1 }
 0x204   :  { %v3501_v42 = vadd.f32 %v3341_v12, %v797_v22 }
 0x205   :  { %v1032_v30 = vadd.f32 %v1004_v44, %v968_v25  ;;  %v1056_v44 = vld [vmem:[#allocation2 + $0xb6] sm:$0xff] }
 0x206   :  { %v818_v10 = vmax.f32 %v3501_v42, 0.0  ;;  %1017 = vrot.lane.b32.xlu1 %v991_v31, %s2949_s9 }
 0x207   :  { %1019 = vrot.lane.b32.xlu2 %v992_v55, %s2949_s9  ;;  %v1096_v14 = vadd.f32 %v1068_v4, %v1032_v30  ;;  %v865_v33 = vld [vmem:[#allocation2 + $0xcb] sm:$0xff] }
 0x208   :  { %955 = vrot.lane.b32.xlu0 %v928_v23, %s2948_s7  ;;  %834 = vst [vmem:[#allocation2 + $0xd8] sm:$0xff] %v818_v10  ;;  %v1194_v9 = vpop.permute.xlu1 %1193  ;;  %v993_v21 = vld [vmem:[#allocation2 + $0xcd] sm:$0xff] }
 0x209   :  { %v1134_v37 = vpop.permute.xlu2 %1133  ;;  %v1223_v32 = vadd.f32 %v1194_v9, %v1159_v43  ;;  %v1121_v9 = vld [vmem:[#allocation2 + $0xcf] sm:$0xff] }
 0x20a   :  { %v1132_v41 = vpop.permute.xlu0 %1131 }
 0x20b   :  { %v1160_v26 = vadd.f32 %v1132_v41, %v1096_v14  ;;  %v1057_v14 = vld [vmem:[#allocation2 + $0xce] sm:$0xff] }
 0x20d   :  { %v1224_v35 = vadd.f32 %v1196_v2, %v1160_v26  ;;  %v841_v2 = vld [vmem:[#allocation2 + $0x4a] sm:$0xff] }
 0x20e   :  { %1083 = vrot.lane.b32.xlu1 %v1056_v44, %s2953_s28 }
 0x20f   :  { %v1238_v51 = vpack.c.bf16 %v1224_v35, %v1223_v32  ;;  %1145 = vrot.lane.b32.xlu2 %v1119_v45, %s2952_s26  ;;  %v866_v27 = vld [vmem:[#allocation2 + $0xd3] sm:$0xff] }
 0x210   :  { %1081 = vrot.lane.b32.xlu0 %v1055_v50, %s2953_s28  ;;  %v880_v18 = vpop.permute.xlu1 %879  ;;  %v994_v25 = vld [vmem:[#allocation2 + $0xd5] sm:$0xff]  ;;  %v843_v50 = vld [vmem:[#allocation2 + $0x6a] sm:$0xff] }
 0x211   :  { %1326 = vmatmul.bf16.gmra.mxu2 %v1238_v51  ;;  %v1200_v40 = vpop.permute.xlu2 %1199  ;;  %v930_v22 = vld [vmem:[#allocation2 + $0xd4] sm:$0xff] }
 0x212   :  { %v878_v58 = vpop.permute.xlu0 %877  ;;  %v1058_v23 = vld [vmem:[#allocation2 + $0xd6] sm:$0xff] }
 0x213   :  { %v905_v1 = vadd.f32 %v878_v58, %v841_v2 }
 0x215   :  { %v969_v16 = vadd.f32 %v3486_v13, %v905_v1 }
 0x216   :  { %1209 = vrot.lane.b32.xlu1 %v815_v52, %s2951_s2  ;;  %v929_v52 = vld [vmem:[#allocation2 + $0xcc] sm:$0xff] }
 0x217   :  { %1211 = vrot.lane.b32.xlu2 %v816_v38, %s2951_s2  ;;  %v842_v38 = vld [vmem:[#allocation2 + $0x52] sm:$0xff] }
 0x218   :  { %1147 = vrot.lane.b32.xlu0 %v1120_v49, %s2952_s26  ;;  %v1006_v59 = vpop.permute.xlu1 %1005  ;;  %v906_v61 = vadd.f32 %v880_v18, %v842_v38 }
 0x219   :  { %v3520_v56 = vpop.permute.xlu2 %945  ;;  %v1033_v36 = vadd.f32 %v1006_v59, %v969_v16 }
 0x21a   :  { %v944_v60 = vpop.permute.xlu0 %943 }
 0x21b   :  { %v800_v0 = vpop.f32.mrf.mxu1  ;;  %v970_v5 = vadd.f32 %v944_v60, %v906_v61 }
 0x21c   :  { %v3523_v47 = vadd.f32 %v3341_v12, %v800_v0 }
 0x21d   :  { %v1034_v46 = vadd.f32 %v3498_v7, %v970_v5 }
 0x21e   :  { %v819_v24 = vmax.f32 %v3523_v47, 0.0  ;;  %895 = vrot.lane.b32.xlu1 %v866_v27, %s2947_s27 }
 0x21f   :  { %957 = vrot.lane.b32.xlu2 %v929_v52, %s2948_s7 }
 0x220   :  { %893 = vrot.lane.b32.xlu0 %v865_v33, %s2947_s27  ;;  %835 = vst [vmem:[#allocation2 + $0xf0] sm:$0xff] %v819_v24  ;;  %v1072_v15 = vpop.permute.xlu1 %1071 }
 0x221   :  { %v1012_v3 = vpop.permute.xlu2 %1011  ;;  %v1098_v13 = vadd.f32 %v1072_v15, %v1034_v46 }
 0x222   :  { %v1070_v6 = vpop.permute.xlu0 %1069 }
 0x223   :  { %v802_v29 = vpop.f32.mrf.mxu1  ;;  %v1097_v4 = vadd.f32 %v1070_v6, %v1033_v36 }
 0x224   :  { %v3533_v8 = vadd.f32 %v3341_v12, %v802_v29 }
 0x225   :  { %v1161_v31 = vadd.f32 %v1134_v37, %v1097_v4  ;;  %v1122_v37 = vld [vmem:[#allocation2 + $0xd7] sm:$0xff] }
 0x226   :  { %v820_v62 = vmax.f32 %v3533_v8, 0.0  ;;  %1021 = vrot.lane.b32.xlu1 %v993_v21, %s2949_s9  ;;  %v3561_v21 = vpop.f32.mrf.mxu2 }
 0x227   :  { %1023 = vrot.lane.b32.xlu2 %v994_v25, %s2949_s9  ;;  %v867_v58 = vld [vmem:[#allocation2 + $0xeb] sm:$0xff] }
 0x228   :  { %959 = vrot.lane.b32.xlu0 %v930_v22, %s2948_s7  ;;  %836 = vst [vmem:[#allocation2 + $0xf8] sm:$0xff] %v820_v62  ;;  %v1198_v12 = vpop.permute.xlu1 %1197  ;;  %v995_v2 = vld [vmem:[#allocation2 + $0xed] sm:$0xff] }
 0x229   :  { %v1138_v28 = vpop.permute.xlu2 %1137  ;;  %v1225_v57 = vadd.f32 %v1198_v12, %v1161_v31  ;;  %v1059_v46 = vld [vmem:[#allocation2 + $0xee] sm:$0xff] }
 0x22a   :  { %v1136_v30 = vpop.permute.xlu0 %1135 }
 0x22b   :  { %v1162_v7 = vadd.f32 %v1136_v30, %v1098_v13 }
 0x22d   :  { %v1226_v55 = vadd.f32 %v1200_v40, %v1162_v7  ;;  %v931_v40 = vld [vmem:[#allocation2 + $0xec] sm:$0xff] }
 0x22e   :  { %1087 = vrot.lane.b32.xlu1 %v1058_v23, %s2953_s28 }
 0x22f   :  { %v1239_v41 = vpack.c.bf16 %v1226_v55, %v1225_v57  ;;  %1149 = vrot.lane.b32.xlu2 %v1121_v9, %s2952_s26  ;;  %v868_v51 = vld [vmem:[#allocation2 + $0xf3] sm:$0xff]  ;;  %v1442_v57 = vld [vmem:[#allocation2 + $0x6] sm:$0xff] }
 0x230   :  { %1085 = vrot.lane.b32.xlu0 %v1057_v14, %s2953_s28  ;;  %v884_v43 = vpop.permute.xlu1 %883  ;;  %v996_v52 = vld [vmem:[#allocation2 + $0xf5] sm:$0xff]  ;;  %v845_v55 = vld [vmem:[#allocation2 + $0x8a] sm:$0xff] }
 0x231   :  { %1331 = vmatmul.bf16.gmra.mxu2 %v1239_v41  ;;  %v1204_v26 = vpop.permute.xlu2 %1203  ;;  %v932_v33 = vld [vmem:[#allocation2 + $0xf4] sm:$0xff]  ;;  %v3577_v14 = vld [vmem:[#allocation2 + $0x48] sm:$0xff] }
 0x232   :  { %v882_v32 = vpop.permute.xlu0 %881  ;;  %v1060_v36 = vld [vmem:[#allocation2 + $0xf6] sm:$0xff] }
 0x233   :  { %v907_v18 = vadd.f32 %v882_v32, %v843_v50  ;;  %v1124_v12 = vld [vmem:[#allocation2 + $0xf7] sm:$0xff] }
 0x234   :  { %v846_v9 = vld [vmem:[#allocation2 + $0x92] sm:$0xff] }
 0x235   :  { %v971_v59 = vadd.f32 %v3520_v56, %v907_v18 }
 0x236   :  { %1213 = vrot.lane.b32.xlu1 %v817_v39, %s2951_s2  ;;  %v908_v39 = vadd.f32 %v884_v43, %v844_v20 }
 0x237   :  { %1215 = vrot.lane.b32.xlu2 %v818_v10, %s2951_s2 }
 0x238   :  { %1151 = vrot.lane.b32.xlu0 %v1122_v37, %s2952_s26  ;;  %v1010_v35 = vpop.permute.xlu1 %1009  ;;  %v1444_v37 = vld [vmem:[#allocation2 + $0x26] sm:$0xff] }
 0x239   :  { %v3552_v44 = vpop.permute.xlu2 %949  ;;  %v1035_v0 = vadd.f32 %v1010_v35, %v971_v59 }
 0x23a   :  { %v948_v45 = vpop.permute.xlu0 %947 }
 0x23b   :  { %v972_v60 = vadd.f32 %v948_v45, %v908_v39 }
 0x23d   :  { %v1036_v27 = vadd.f32 %v1012_v3, %v972_v60  ;;  %v1123_v3 = vld [vmem:[#allocation2 + $0xef] sm:$0xff] }
 0x23e   :  { %899 = vrot.lane.b32.xlu1 %v868_v51, %s2947_s27 }
 0x23f   :  { %961 = vrot.lane.b32.xlu2 %v931_v40, %s2948_s7 }
 0x240   :  { %897 = vrot.lane.b32.xlu0 %v867_v58, %s2947_s27  ;;  %v1076_v42 = vpop.permute.xlu1 %1075 }
 0x241   :  { %v1016_v10 = vpop.permute.xlu2 %1015  ;;  %v1100_v38 = vadd.f32 %v1076_v42, %v1036_v27  ;;  %v3602_v27 = vld [vmem:[%s4162_s4] ss:$0 sm:$0xff] }
 0x242   :  { %v1074_v49 = vpop.permute.xlu0 %1073 }
 0x243   :  { %v1099_v1 = vadd.f32 %v1074_v49, %v1035_v0  ;;  %v1446_v49 = vld [vmem:[#allocation2 + $0x46] sm:$0xff] }
 0x245   :  { %v1163_v16 = vadd.f32 %v1138_v28, %v1099_v1  ;;  %v3573_v28 = vpop.f32.mrf.mxu2  ;;  %v224_v1 = vpop.f32.mrf.mxu0 }
 0x246   :  { %1025 = vrot.lane.b32.xlu1 %v995_v2, %s2949_s9 }
 0x247   :  { %1027 = vrot.lane.b32.xlu2 %v996_v52, %s2949_s9  ;;  %v1448_v52 = vld [vmem:[#allocation2 + $0x66] sm:$0xff] }
 0x248   :  { %963 = vrot.lane.b32.xlu0 %v932_v33, %s2948_s7  ;;  %v1202_v61 = vpop.permute.xlu1 %1201 }
 0x249   :  { %v1142_v15 = vpop.permute.xlu2 %1141  ;;  %v1227_v56 = vadd.f32 %v1202_v61, %v1163_v16 }
 0x24a   :  { %v1140_v6 = vpop.permute.xlu0 %1139 }
 0x24b   :  { %v1164_v5 = vadd.f32 %v1140_v6, %v1100_v38 }
 0x24d   :  { %v1228_v29 = vadd.f32 %v1204_v26, %v1164_v5  ;;  %v3585_v26 = vpop.f32.mrf.mxu2 }
 0x24e   :  { %1091 = vrot.lane.b32.xlu1 %v1060_v36, %s2953_s28 }
 0x24f   :  { %v1240_v4 = vpack.c.bf16 %v1228_v29, %v1227_v56  ;;  %1153 = vrot.lane.b32.xlu2 %v1123_v3, %s2952_s26  ;;  %v226_v29 = vpop.f32.mrf.mxu0  ;;  %v847_v3 = vld [vmem:[#allocation2 + $0xaa] sm:$0xff] }
 0x250   :  { %1089 = vrot.lane.b32.xlu0 %v1059_v46, %s2953_s28  ;;  %v888_v25 = vpop.permute.xlu1 %887 }
 0x251   :  { %1336 = vmatmul.bf16.gmra.mxu2 %v1240_v4  ;;  %v1208_v22 = vpop.permute.xlu2 %1207  ;;  %v910_v47 = vadd.f32 %v888_v25, %v846_v9  ;;  %v848_v25 = vld [vmem:[#allocation2 + $0xb2] sm:$0xff] }
 0x252   :  { %v886_v13 = vpop.permute.xlu0 %885 }
 0x253   :  { %v909_v23 = vadd.f32 %v886_v13, %v845_v55 }
 0x255   :  { %v973_v41 = vadd.f32 %v3552_v44, %v909_v23  ;;  %v3592_v44 = vpop.f32.mrf.mxu2 }
 0x256   :  { %1217 = vrot.lane.b32.xlu1 %v819_v24, %s2951_s2 }
 0x257   :  { %1219 = vrot.lane.b32.xlu2 %v820_v62, %s2951_s2 }
 0x258   :  { %1155 = vrot.lane.b32.xlu0 %v1124_v12, %s2952_s26  ;;  %v1014_v30 = vpop.permute.xlu1 %1013 }
 0x259   :  { %v3575_v31 = vpop.permute.xlu2 %953  ;;  %v1037_v32 = vadd.f32 %v1014_v30, %v973_v41 }
 0x25a   :  { %v952_v7 = vpop.permute.xlu0 %951 }
 0x25b   :  { %v974_v43 = vadd.f32 %v952_v7, %v910_v47 }
 0x25d   :  { %v1038_v35 = vadd.f32 %v1016_v10, %v974_v43  ;;  %v144_v10 = vpack.c.bf16 %v3196_v19, %v3186_v17  ;;  %v3607_v17 = vld [vmem:[%s4164_s6] ss:$0 sm:$0xff] }
 0x25e   :  { %v225_v33 = vadd.f32 %v3607_v17, %v224_v1 }
 0x25f   :  { %1522 = vrot.lane.b32.xlu2 %v3577_v14, %s2948_s7  ;;  %248 = vmatmul.bf16.vlgmr.msra.gmra.mxu3 %v144_v10 }
 0x260   :  { %1458 = vrot.lane.b32.xlu0 %v1442_v57, %s2947_s27  ;;  %v1080_v24 = vpop.permute.xlu1 %1079 }
 0x261   :  { %v3582_v8 = vpop.permute.xlu2 %1019  ;;  %v1102_v50 = vadd.f32 %v1080_v24, %v1038_v35 }
 0x262   :  { %v1078_v62 = vpop.permute.xlu0 %1077 }
 0x263   :  { %v1101_v45 = vadd.f32 %v1078_v62, %v1037_v32 }
 0x265   :  { %v1165_v58 = vadd.f32 %v1142_v15, %v1101_v45 }
 0x267   :  { %1526 = vrot.lane.b32.xlu2 %v3577_v14, %s2948_s7 }
 0x268   :  { %1462 = vrot.lane.b32.xlu0 %v1444_v37, %s2947_s27  ;;  %v1206_v51 = vpop.permute.xlu1 %1205 }
 0x269   :  { %v3590_v18 = vpop.permute.xlu2 %1145  ;;  %v1229_v39 = vadd.f32 %v1206_v51, %v1165_v58 }
 0x26a   :  { %v1144_v40 = vpop.permute.xlu0 %1143 }
 0x26b   :  { %v1166_v20 = vadd.f32 %v1144_v40, %v1102_v50 }
 0x26d   :  { %v1230_v42 = vadd.f32 %v1208_v22, %v1166_v20  ;;  %v227_v22 = vadd.f32 %v3607_v17, %v226_v29 }
 0x26f   :  { %v1241_v59 = vpack.c.bf16 %v1230_v42, %v1229_v39  ;;  %1530 = vrot.lane.b32.xlu2 %v3577_v14, %s2948_s7 }
 0x270   :  { %1466 = vrot.lane.b32.xlu0 %v1446_v49, %s2947_s27  ;;  %v892_v60 = vpop.permute.xlu1 %891 }
 0x271   :  { %1341 = vmatmul.bf16.gmra.mxu2 %v1241_v59  ;;  %v1212_v0 = vpop.permute.xlu2 %1211  ;;  %v912_v12 = vadd.f32 %v892_v60, %v848_v25 }
 0x272   :  { %v890_v2 = vpop.permute.xlu0 %889 }
 0x273   :  { %v911_v4 = vadd.f32 %v890_v2, %v847_v3 }
 0x274   :  { %v1322_v19 = vpop.f32.mrf.mxu2 }
 0x275   :  { %v1323_v38 = vadd.f32 %v3602_v27, %v1322_v19  ;;  %v975_v23 = vadd.f32 %v3575_v31, %v911_v4 }
 0x277   :  { %v1362_v61 = vmax.f32 %v1323_v38, 0.0  ;;  %1534 = vrot.lane.b32.xlu2 %v3577_v14, %s2948_s7 }
 0x278   :  { %1470 = vrot.lane.b32.xlu0 %v1448_v52, %s2947_s27  ;;  %v1018_v15 = vpop.permute.xlu1 %1017 }
 0x279   :  { %v1378_v6 = vadd.f32 %v1362_v61, %v225_v33  ;;  %v3614_v16 = vpop.permute.xlu2 %957  ;;  %v1039_v24 = vadd.f32 %v1018_v15, %v975_v23 }
 0x27a   :  { %v956_v5 = vpop.permute.xlu0 %955 }
 0x27b   :  { %v1394_v56 = vmax.f32 %v1378_v6, 0.0  ;;  %v976_v9 = vadd.f32 %v956_v5, %v912_v12  ;;  %v849_v5 = vld [vmem:[#allocation2 + $0xca] sm:$0xff] }
 0x27c   :  { %v1324_v36 = vpop.f32.mrf.mxu2 }
 0x27d   :  { %1410 = vst [vmem:[#allocation2 + $0x10] sm:$0xff] %v1394_v56  ;;  %v1325_v46 = vadd.f32 %v3602_v27, %v1324_v36  ;;  %v1040_v43 = vadd.f32 %v3582_v8, %v976_v9  ;;  %v145_v8 = vpack.c.bf16 %v3243_v53, %v3236_v48 }
 0x27f   :  { %v1363_v13 = vmax.f32 %v1325_v46, 0.0  ;;  %253 = vmatmul.bf16.gmra.mxu3 %v145_v8  ;;  %v850_v46 = vld [vmem:[#allocation2 + $0xd2] sm:$0xff] }
 0x280   :  { %1524 = vrot.lane.b32.xlu0 %v1394_v56, %s2948_s7  ;;  %v1084_v30 = vpop.permute.xlu1 %1083 }
 0x281   :  { %v1379_v7 = vadd.f32 %v1363_v13, %v227_v22  ;;  %v3619_v57 = vpop.permute.xlu2 %1023  ;;  %v1104_v31 = vadd.f32 %v1084_v30, %v1040_v43 }
 0x282   :  { %v1082_v55 = vpop.permute.xlu0 %1081 }
 0x283   :  { %v3622_v47 = vmax.f32 %v1379_v7, 0.0  ;;  %v1103_v32 = vadd.f32 %v1082_v55, %v1039_v24 }
 0x284   :  { %v1443_v62 = vld [vmem:[#allocation2 + $0xe] sm:$0xff] }
 0x285   :  { %v3624_v41 = vld [vmem:[#allocation2 + $0xc] sm:$0xff]  ;;  %1411 = vst [vmem:[#allocation2 + $0x18] sm:$0xff] %v3622_v47  ;;  %1698 = vrot.lane.b32.xlu2 %v1443_v62, %s2952_s26  ;;  %1460 = vrot.lane.b32.xlu1 %v1443_v62, %s2947_s27  ;;  %v1167_v50 = vadd.f32 %v3590_v18, %v1103_v32  ;;  %v229_v18 = vpop.f32.mrf.mxu0 }
 0x286   :  { %v1570_v20 = vld [vmem:[#allocation2 + $0xa] sm:$0xff]  ;;  %v230_v2 = vadd.f32 %v3607_v17, %v229_v18  ;;  %v235_v18 = vadd.f32 %v3607_v17, %v3334_v54 }
 0x288   :  { %1642 = vrot.lane.b32.xlu0 %v3624_v41, %s2953_s28  ;;  %v1210_v37 = vpop.permute.xlu1 %1209 }
 0x289   :  { %v1150_v45 = vpop.permute.xlu2 %1149  ;;  %v1231_v40 = vadd.f32 %v1210_v37, %v1167_v50 }
 0x28a   :  { %v1148_v35 = vpop.permute.xlu0 %1147 }
 0x28b   :  { %v1168_v51 = vadd.f32 %v1148_v35, %v1104_v31 }
 0x28c   :  { %v1571_v58 = vld [vmem:[#allocation2 + $0x12] sm:$0xff] }
 0x28d   :  { %v1232_v39 = vadd.f32 %v1212_v0, %v1168_v51  ;;  %v1690_v42 = vld [vmem:[#allocation2 + $0x16] sm:$0xff]  ;;  %1588 = vrot.lane.b32.xlu2 %v1571_v58, %s2949_s9  ;;  %1586 = vrot.lane.b32.xlu1 %v1570_v20, %s2949_s9  ;;  %v231_v38 = vpop.f32.mrf.mxu0 }
 0x28e   :  { %v1634_v6 = vld [vmem:[#allocation2 + $0x14] sm:$0xff]  ;;  %v232_v36 = vadd.f32 %v3607_v17, %v231_v38 }
 0x28f   :  { %v1242_v49 = vpack.c.bf16 %v1232_v39, %v1231_v40  ;;  %v852_v38 = vld [vmem:[#allocation2 + $0xf2] sm:$0xff] }
 0x290   :  { %1700 = vrot.lane.b32.xlu0 %v1690_v42, %s2952_s26  ;;  %v896_v10 = vpop.permute.xlu1 %895 }
 0x291   :  { %1346 = vmatmul.bf16.gmra.mxu2 %v1242_v49  ;;  %v1216_v0 = vpop.permute.xlu2 %1215  ;;  %v914_v4 = vadd.f32 %v896_v10, %v850_v46 }
 0x292   :  { %v894_v59 = vpop.permute.xlu0 %893 }
 0x293   :  { %v913_v29 = vadd.f32 %v894_v59, %v849_v5 }
 0x294   :  { %v1327_v60 = vpop.f32.mrf.mxu2 }
 0x295   :  { %v1328_v1 = vadd.f32 %v3602_v27, %v1327_v60  ;;  %1764 = vrot.lane.b32.xlu2 %v3622_v47, %s2951_s2  ;;  %1762 = vrot.lane.b32.xlu1 %v1394_v56, %s2951_s2  ;;  %v977_v12 = vadd.f32 %v3614_v16, %v913_v29 }
 0x297   :  { %v1364_v48 = vmax.f32 %v1328_v1, 0.0 }
 0x298   :  { %v1022_v19 = vpop.permute.xlu1 %1021 }
 0x299   :  { %v1380_v53 = vadd.f32 %v1364_v48, %v230_v2  ;;  %v3647_v56 = vpop.permute.xlu2 %961  ;;  %v1041_v9 = vadd.f32 %v1022_v19, %v977_v12  ;;  %v851_v19 = vld [vmem:[#allocation2 + $0xea] sm:$0xff] }
 0x29a   :  { %v960_v52 = vpop.permute.xlu0 %959 }
 0x29b   :  { %v1396_v33 = vmax.f32 %v1380_v53, 0.0  ;;  %v978_v30 = vadd.f32 %v960_v52, %v914_v4  ;;  %v237_v52 = vadd.f32 %v3607_v17, %v3336_v63 }
 0x29c   :  { %v1329_v61 = vpop.f32.mrf.mxu2 }
 0x29d   :  { %1412 = vst [vmem:[#allocation2 + $0x30] sm:$0xff] %v1396_v33  ;;  %v1330_v15 = vadd.f32 %v3602_v27, %v1329_v61  ;;  %1528 = vrot.lane.b32.xlu0 %v1396_v33, %s2948_s7  ;;  %1644 = vrot.lane.b32.xlu1 %v1634_v6, %s2953_s28  ;;  %v1042_v24 = vadd.f32 %v3619_v57, %v978_v30 }
 0x29e   :  { %v146_v57 = vpack.c.bf16 %v3283_v34, %v3275_v11 }
 0x29f   :  { %v1365_v3 = vmax.f32 %v1330_v15, 0.0 }
 0x2a0   :  { %v1088_v22 = vpop.permute.xlu1 %1087  ;;  %258 = vmatmul.bf16.gmra.mxu3 %v146_v57 }
 0x2a1   :  { %v1381_v25 = vadd.f32 %v1365_v3, %v232_v36  ;;  %v1028_v16 = vpop.permute.xlu2 %1027  ;;  %v1106_v43 = vadd.f32 %v1088_v22, %v1042_v24 }
 0x2a2   :  { %v1086_v13 = vpop.permute.xlu0 %1085 }
 0x2a3   :  { %v3650_v7 = vmax.f32 %v1381_v25, 0.0  ;;  %v1105_v62 = vadd.f32 %v1086_v13, %v1041_v9  ;;  %v2775_v13 = vld [vmem:[#allocation7 + $0x38] sm:$0xff] }
 0x2a4   :  { %v1445_v55 = vld [vmem:[#allocation2 + $0x2e] sm:$0xff]  ;;  %1886 = vmatpush.bf16.msrb.mxu3 %v2775_v13 }
 0x2a5   :  { %v3652_v23 = vld [vmem:[#allocation2 + $0x2c] sm:$0xff]  ;;  %1413 = vst [vmem:[#allocation2 + $0x38] sm:$0xff] %v3650_v7  ;;  %1702 = vrot.lane.b32.xlu2 %v1445_v55, %s2952_s26  ;;  %1464 = vrot.lane.b32.xlu1 %v1445_v55, %s2947_s27  ;;  %v1169_v37 = vadd.f32 %v1150_v45, %v1105_v62 }
 0x2a6   :  { %1646 = vrot.lane.b32.xlu0 %v3652_v23, %s2953_s28  ;;  %v1572_v58 = vld [vmem:[#allocation2 + $0x2a] sm:$0xff] }
 0x2a8   :  { %v1214_v32 = vpop.permute.xlu1 %1213 }
 0x2a9   :  { %v1233_v40 = vadd.f32 %v1214_v32, %v1169_v37  ;;  %v1154_v8 = vpop.permute.xlu2 %1153 }
 0x2aa   :  { %v1152_v31 = vpop.permute.xlu0 %1151 }
 0x2ab   :  { %v1170_v35 = vadd.f32 %v1152_v31, %v1106_v43 }
 0x2ac   :  { %v1573_v50 = vld [vmem:[#allocation2 + $0x32] sm:$0xff] }
 0x2ad   :  { %v1691_v51 = vld [vmem:[#allocation2 + $0x36] sm:$0xff]  ;;  %1592 = vrot.lane.b32.xlu2 %v1573_v50, %s2949_s9  ;;  %v1234_v20 = vadd.f32 %v1216_v0, %v1170_v35  ;;  %1590 = vrot.lane.b32.xlu1 %v1572_v58, %s2949_s9 }
 0x2ae   :  { %1704 = vrot.lane.b32.xlu0 %v1691_v51, %s2952_s26  ;;  %v1635_v53 = vld [vmem:[#allocation2 + $0x34] sm:$0xff] }
 0x2af   :  { %v1243_v39 = vpack.c.bf16 %v1234_v20, %v1233_v40  ;;  %v240_v20 = vadd.f32 %v3607_v17, %v3561_v21  ;;  %v242_v21 = vadd.f32 %v3607_v17, %v3573_v28 }
 0x2b0   :  { %v900_v42 = vpop.permute.xlu1 %899 }
 0x2b1   :  { %1351 = vmatmul.bf16.gmra.mxu2 %v1243_v39  ;;  %v1220_v1 = vpop.permute.xlu2 %1219  ;;  %v916_v61 = vadd.f32 %v900_v42, %v852_v38 }
 0x2b2   :  { %v898_v45 = vpop.permute.xlu0 %897 }
 0x2b3   :  { %v915_v54 = vadd.f32 %v898_v45, %v851_v19  ;;  %v2770_v19 = vld [vmem:[#allocation7 + $0x10] sm:$0xff] }
 0x2b4   :  { %v1332_v49 = vpop.f32.mrf.mxu2 }
 0x2b5   :  { %v1333_v10 = vadd.f32 %v3602_v27, %v1332_v49  ;;  %1768 = vrot.lane.b32.xlu2 %v3650_v7, %s2951_s2  ;;  %1766 = vrot.lane.b32.xlu1 %v1396_v33, %s2951_s2  ;;  %v979_v29 = vadd.f32 %v3647_v56, %v915_v54 }
 0x2b7   :  { %v1366_v59 = vmax.f32 %v1333_v10, 0.0 }
 0x2b8   :  { %v1026_v11 = vpop.permute.xlu1 %1025 }
 0x2b9   :  { %v1382_v60 = vadd.f32 %v1366_v59, %v235_v18  ;;  %v1043_v25 = vadd.f32 %v1026_v11, %v979_v29  ;;  %v3682_v22 = vpop.permute.xlu2 %1522  ;;  %v2773_v59 = vld [vmem:[#allocation7 + $0x28] sm:$0xff] }
 0x2ba   :  { %v964_v34 = vpop.permute.xlu0 %963 }
 0x2bb   :  { %v1398_v2 = vmax.f32 %v1382_v60, 0.0  ;;  %v980_v36 = vadd.f32 %v964_v34, %v916_v61  ;;  %v2769_v61 = vld [vmem:[#allocation7 + $0x8] sm:$0xff] }
 0x2bc   :  { %v1334_v0 = vpop.f32.mrf.mxu2 }
 0x2bd   :  { %1414 = vst [vmem:[#allocation2 + $0x50] sm:$0xff] %v1398_v2  ;;  %v1335_v48 = vadd.f32 %v3602_v27, %v1334_v0  ;;  %1532 = vrot.lane.b32.xlu0 %v1398_v2, %s2948_s7  ;;  %1648 = vrot.lane.b32.xlu1 %v1635_v53, %s2953_s28  ;;  %v1044_v63 = vadd.f32 %v1028_v16, %v980_v36  ;;  %v2774_v16 = vld [vmem:[#allocation7 + $0x30] sm:$0xff]  ;;  %v2771_v53 = vld [vmem:[#allocation7 + $0x18] sm:$0xff] }
 0x2be   :  { %1887 = vmatpush.bf16.msrb.mxu3 %v2774_v16 }
 0x2bf   :  { %v1367_v33 = vmax.f32 %v1335_v48, 0.0  ;;  %v2772_v48 = vld [vmem:[#allocation7 + $0x20] sm:$0xff] }
 0x2c0   :  { %v1092_v6 = vpop.permute.xlu1 %1091 }
 0x2c1   :  { %v1383_v15 = vadd.f32 %v1367_v33, %v237_v52  ;;  %v1108_v12 = vadd.f32 %v1092_v6, %v1044_v63  ;;  %v3691_v35 = vpop.permute.xlu2 %1526  ;;  %v3730_v6 = vld [vmem:[#allocation2 + $0x86] sm:$0xff] }
 0x2c2   :  { %v1090_v5 = vpop.permute.xlu0 %1089  ;;  %1888 = vmatpush.bf16.msrb.mxu3 %v2773_v59 }
 0x2c3   :  { %v3677_v3 = vmax.f32 %v1383_v15, 0.0  ;;  %v1107_v56 = vadd.f32 %v1090_v5, %v1043_v25  ;;  %v245_v25 = vadd.f32 %v3607_v17, %v3585_v26  ;;  %v247_v26 = vadd.f32 %v3607_v17, %v3592_v44 }
 0x2c4   :  { %v1447_v46 = vld [vmem:[#allocation2 + $0x4e] sm:$0xff] }
 0x2c5   :  { %v3679_v4 = vld [vmem:[#allocation2 + $0x4c] sm:$0xff]  ;;  %1415 = vst [vmem:[#allocation2 + $0x58] sm:$0xff] %v3677_v3  ;;  %1706 = vrot.lane.b32.xlu2 %v1447_v46, %s2952_s26  ;;  %1468 = vrot.lane.b32.xlu1 %v1447_v46, %s2947_s27  ;;  %v1171_v9 = vadd.f32 %v1154_v8, %v1107_v56  ;;  %v2768_v46 = vld [vmem:[#allocation7] sm:$0xff] }
 0x2c6   :  { %1650 = vrot.lane.b32.xlu0 %v3679_v4, %s2953_s28  ;;  %v1574_v31 = vld [vmem:[#allocation2 + $0x4a] sm:$0xff]  ;;  %1889 = vmatpush.bf16.msrb.mxu3 %v2772_v48 }
 0x2c8   :  { %v1218_v30 = vpop.permute.xlu1 %1217 }
 0x2c9   :  { %v1235_v32 = vadd.f32 %v1218_v30, %v1171_v9  ;;  %v3701_v39 = vpop.permute.xlu2 %1530 }
 0x2ca   :  { %v1156_v55 = vpop.permute.xlu0 %1155  ;;  %1890 = vmatpush.bf16.msrb.mxu3 %v2771_v53  ;;  %v1452_v53 = vld [vmem:[#allocation2 + $0xa6] sm:$0xff] }
 0x2cb   :  { %v1172_v24 = vadd.f32 %v1156_v55, %v1108_v12 }
 0x2cc   :  { %v1575_v62 = vld [vmem:[#allocation2 + $0x52] sm:$0xff] }
 0x2cd   :  { %v1692_v43 = vld [vmem:[#allocation2 + $0x56] sm:$0xff]  ;;  %1596 = vrot.lane.b32.xlu2 %v1575_v62, %s2949_s9  ;;  %v1236_v37 = vadd.f32 %v1220_v1, %v1172_v24  ;;  %1594 = vrot.lane.b32.xlu1 %v1574_v31, %s2949_s9 }
 0x2ce   :  { %1708 = vrot.lane.b32.xlu0 %v1692_v43, %s2952_s26  ;;  %v1636_v10 = vld [vmem:[#allocation2 + $0x54] sm:$0xff]  ;;  %1891 = vmatpush.bf16.msrb.mxu3 %v2770_v19 }
 0x2cf   :  { %v1244_v50 = vpack.c.bf16 %v1236_v37, %v1235_v32  ;;  %v1426_v37 = vld [vmem:[#allocation2 + $0x4] sm:$0xff] }
 0x2d1   :  { %1356 = vmatmul.bf16.gmra.mxu2 %v1244_v50  ;;  %v3710_v34 = vpop.permute.xlu2 %1534 }
 0x2d2   :  { %v3693_v51 = vpop.permute.xlu0 %1458  ;;  %1892 = vmatpush.bf16.msrb.mxu3 %v2769_v61 }
 0x2d4   :  { %v1337_v40 = vpop.f32.mrf.mxu2 }
 0x2d5   :  { %v1338_v58 = vadd.f32 %v3602_v27, %v1337_v40  ;;  %1772 = vrot.lane.b32.xlu2 %v3677_v3, %s2951_s2  ;;  %1770 = vrot.lane.b32.xlu1 %v1398_v2, %s2951_s2  ;;  %v1490_v40 = vadd.f32 %v3693_v51, %v1426_v37  ;;  %v1428_v37 = vld [vmem:[#allocation2 + $0x24] sm:$0xff] }
 0x2d6   :  { %1893 = vmatpush.bf16.msrb.mxu3 %v2768_v46 }
 0x2d7   :  { %v1368_v57 = vmax.f32 %v1338_v58, 0.0 }
 0x2d9   :  { %v1384_v42 = vadd.f32 %v1368_v57, %v240_v20 }
 0x2da   :  { %v3704_v18 = vpop.permute.xlu0 %1462 }
 0x2db   :  { %v1400_v45 = vmax.f32 %v1384_v42, 0.0 }
 0x2dc   :  { %v1339_v8 = vpop.f32.mrf.mxu2 }
 0x2dd   :  { %1416 = vst [vmem:[#allocation2 + $0x70] sm:$0xff] %v1400_v45  ;;  %v1340_v49 = vadd.f32 %v3602_v27, %v1339_v8  ;;  %1536 = vrot.lane.b32.xlu0 %v1400_v45, %s2948_s7  ;;  %1652 = vrot.lane.b32.xlu1 %v1636_v10, %s2953_s28 }
 0x2df   :  { %v1369_v60 = vmax.f32 %v1340_v49, 0.0  ;;  %v3723_v33 = vpop.permute.xlu2 %1698 }
 0x2e1   :  { %v1385_v11 = vadd.f32 %v1369_v60, %v242_v21 }
 0x2e2   :  { %v3721_v28 = vpop.permute.xlu0 %1466  ;;  %v249_v48 = vpop.f32.mrf.mxu3 }
 0x2e3   :  { %v3712_v2 = vmax.f32 %v1385_v11, 0.0 }
 0x2e4   :  { %v1449_v0 = vld [vmem:[#allocation2 + $0x6e] sm:$0xff] }
 0x2e5   :  { %v3714_v1 = vld [vmem:[#allocation2 + $0x6c] sm:$0xff]  ;;  %1417 = vst [vmem:[#allocation2 + $0x78] sm:$0xff] %v3712_v2  ;;  %1710 = vrot.lane.b32.xlu2 %v1449_v0, %s2952_s26  ;;  %1472 = vrot.lane.b32.xlu1 %v1449_v0, %s2947_s27 }
 0x2e6   :  { %1654 = vrot.lane.b32.xlu0 %v3714_v1, %s2953_s28  ;;  %v1576_v38 = vld [vmem:[#allocation2 + $0x6a] sm:$0xff] }
 0x2e7   :  { %v1589_v63 = vpop.permute.xlu2 %1588 }
 0x2ea   :  { %v3728_v15 = vpop.permute.xlu0 %1470 }
 0x2ec   :  { %v1577_v52 = vld [vmem:[#allocation2 + $0x72] sm:$0xff] }
 0x2ed   :  { %v1693_v54 = vld [vmem:[#allocation2 + $0x76] sm:$0xff]  ;;  %1600 = vrot.lane.b32.xlu2 %v1577_v52, %s2949_s9  ;;  %1598 = vrot.lane.b32.xlu1 %v1576_v38, %s2949_s9 }
 0x2ee   :  { %1712 = vrot.lane.b32.xlu0 %v1693_v54, %s2952_s26  ;;  %v1637_v36 = vld [vmem:[#allocation2 + $0x74] sm:$0xff]  ;;  %v250_v54 = vadd.f32 %v3607_v17, %v249_v48 }
 0x2ef   :  { %v1765_v32 = vpop.permute.xlu2 %1764 }
 0x2f2   :  { %v1525_v55 = vpop.permute.xlu0 %1524 }
 0x2f4   :  { %v1342_v5 = vpop.f32.mrf.mxu2 }
 0x2f5   :  { %v1343_v29 = vadd.f32 %v3602_v27, %v1342_v5  ;;  %1776 = vrot.lane.b32.xlu2 %v3712_v2, %s2951_s2  ;;  %1656 = vrot.lane.b32.xlu1 %v1637_v36, %s2953_s28 }
 0x2f6   :  { %1474 = vrot.lane.b32.xlu0 %v3730_v6, %s2947_s27 }
 0x2f7   :  { %v1370_v56 = vmax.f32 %v1343_v29, 0.0  ;;  %v1461_v13 = vpop.permute.xlu1 %1460 }
 0x2f8   :  { %v1491_v44 = vadd.f32 %v1461_v13, %v3624_v41 }
 0x2f9   :  { %v1386_v12 = vadd.f32 %v1370_v56, %v245_v25 }
 0x2fa   :  { %v1643_v58 = vpop.permute.xlu0 %1642  ;;  %v1555_v8 = vadd.f32 %v1525_v55, %v1491_v44 }
 0x2fb   :  { %v3740_v30 = vmax.f32 %v1386_v12, 0.0  ;;  %v251_v12 = vpop.f32.mrf.mxu3 }
 0x2fc   :  { %v1344_v9 = vpop.f32.mrf.mxu2  ;;  %v1619_v11 = vadd.f32 %v1589_v63, %v1555_v8 }
 0x2fd   :  { %1418 = vst [vmem:[#allocation2 + $0x90] sm:$0xff] %v3740_v30  ;;  %v1345_v24 = vadd.f32 %v3602_v27, %v1344_v9  ;;  %1538 = vrot.lane.b32.xlu2 %v3577_v14, %s2948_s7  ;;  %1774 = vrot.lane.b32.xlu1 %v1400_v45, %s2951_s2  ;;  %v1554_v45 = vadd.f32 %v3682_v22, %v1490_v40 }
 0x2fe   :  { %1540 = vrot.lane.b32.xlu0 %v3740_v30, %s2948_s7 }
 0x2ff   :  { %v1371_v62 = vmax.f32 %v1345_v24, 0.0  ;;  %v1587_v43 = vpop.permute.xlu1 %1586  ;;  %v3761_v42 = vpop.permute.xlu2 %1702 }
 0x300   :  { %v1618_v49 = vadd.f32 %v1587_v43, %v1554_v45 }
 0x301   :  { %v1387_v31 = vadd.f32 %v1371_v62, %v247_v26  ;;  %v252_v26 = vadd.f32 %v3607_v17, %v251_v12 }
 0x302   :  { %v1674_v21 = vadd.f32 %v1643_v58, %v1618_v49  ;;  %v1701_v60 = vpop.permute.xlu0 %1700 }
 0x303   :  { %v3751_v16 = vmax.f32 %v1387_v31, 0.0  ;;  %v254_v48 = vpop.f32.mrf.mxu3 }
 0x304   :  { %v3753_v50 = vld [vmem:[#allocation2 + $0x8c] sm:$0xff]  ;;  %v1730_v22 = vadd.f32 %v3723_v33, %v1674_v21 }
 0x305   :  { %1419 = vst [vmem:[#allocation2 + $0x98] sm:$0xff] %v3751_v16  ;;  %v1451_v20 = vld [vmem:[#allocation2 + $0x8e] sm:$0xff] }
 0x306   :  { %1658 = vrot.lane.b32.xlu0 %v3753_v50, %s2953_s28  ;;  %1476 = vrot.lane.b32.xlu1 %v1451_v20, %s2947_s27  ;;  %v1578_v59 = vld [vmem:[#allocation2 + $0x8a] sm:$0xff] }
 0x307   :  { %v1763_v57 = vpop.permute.xlu1 %1762  ;;  %v1593_v19 = vpop.permute.xlu2 %1592 }
 0x308   :  { %v1794_v61 = vadd.f32 %v1763_v57, %v1730_v22 }
 0x30c   :  { %v1579_v10 = vld [vmem:[#allocation2 + $0x92] sm:$0xff] }
 0x30d   :  { %v1694_v51 = vld [vmem:[#allocation2 + $0x96] sm:$0xff]  ;;  %1604 = vrot.lane.b32.xlu2 %v1579_v10, %s2949_s9 }
 0x30e   :  { %1716 = vrot.lane.b32.xlu0 %v1694_v51, %s2952_s26  ;;  %1602 = vrot.lane.b32.xlu1 %v1578_v59, %s2949_s9  ;;  %v1638_v36 = vld [vmem:[#allocation2 + $0x94] sm:$0xff] }
 0x30f   :  { %v1645_v41 = vpop.permute.xlu1 %1644  ;;  %v1529_v25 = vpop.permute.xlu0 %1528 }
 0x310   :  { %v1675_v0 = vadd.f32 %v1645_v41, %v1619_v11  ;;  %v1769_v9 = vpop.permute.xlu2 %1768 }
 0x312   :  { %v1731_v52 = vadd.f32 %v1701_v60, %v1675_v0 }
 0x314   :  { %v1347_v38 = vpop.f32.mrf.mxu2  ;;  %v1795_v5 = vadd.f32 %v1765_v32, %v1731_v52 }
 0x315   :  { %v1348_v29 = vadd.f32 %v3602_v27, %v1347_v38  ;;  %1714 = vrot.lane.b32.xlu2 %v1451_v20, %s2952_s26  ;;  %v1492_v20 = vadd.f32 %v3704_v18, %v1428_v37 }
 0x316   :  { %1478 = vrot.lane.b32.xlu0 %v1452_v53, %s2947_s27  ;;  %1660 = vrot.lane.b32.xlu1 %v1638_v36, %s2953_s28  ;;  %v1810_v63 = vpack.c.bf16 %v1795_v5, %v1794_v61  ;;  %v3802_v53 = vld [vmem:[#allocation2 + $0xc6] sm:$0xff] }
 0x317   :  { %v1372_v46 = vmax.f32 %v1348_v29, 0.0  ;;  %v1465_v56 = vpop.permute.xlu1 %1464  ;;  %v1556_v8 = vadd.f32 %v3691_v35, %v1492_v20 }
 0x318   :  { %1894 = vmatmul.bf16.vlgmr.msrb.gmra.mxu3 %v1810_v63  ;;  %v1647_v31 = vpop.permute.xlu0 %1646  ;;  %v1493_v57 = vadd.f32 %v1465_v56, %v3652_v23 }
 0x319   :  { %v1388_v33 = vadd.f32 %v1372_v46, %v250_v54  ;;  %v255_v54 = vadd.f32 %v3607_v17, %v254_v48 }
 0x31a   :  { %v1557_v49 = vadd.f32 %v1529_v25, %v1493_v57 }
 0x31b   :  { %v3773_v13 = vmax.f32 %v1388_v33, 0.0  ;;  %v256_v33 = vpop.f32.mrf.mxu3 }
 0x31c   :  { %v1349_v55 = vpop.f32.mrf.mxu2  ;;  %v1621_v41 = vadd.f32 %v1593_v19, %v1557_v49 }
 0x31d   :  { %1420 = vst [vmem:[#allocation2 + $0xb0] sm:$0xff] %v3773_v13  ;;  %v1350_v24 = vadd.f32 %v3602_v27, %v1349_v55  ;;  %1780 = vrot.lane.b32.xlu2 %v3751_v16, %s2951_s2 }
 0x31e   :  { %1544 = vrot.lane.b32.xlu0 %v3773_v13, %s2948_s7  ;;  %1778 = vrot.lane.b32.xlu1 %v3740_v30, %s2951_s2 }
 0x31f   :  { %v1373_v62 = vmax.f32 %v1350_v24, 0.0  ;;  %v1591_v43 = vpop.permute.xlu1 %1590  ;;  %v3790_v44 = vpop.permute.xlu2 %1706  ;;  %v257_v24 = vadd.f32 %v3607_v17, %v256_v33 }
 0x320   :  { %v1620_v18 = vadd.f32 %v1591_v43, %v1556_v8  ;;  %v1705_v10 = vpop.permute.xlu0 %1704 }
 0x321   :  { %v1389_v32 = vadd.f32 %v1373_v62, %v252_v26 }
 0x322   :  { %v1676_v60 = vadd.f32 %v1647_v31, %v1620_v18  ;;  %v1430_v31 = vld [vmem:[#allocation2 + $0x44] sm:$0xff] }
 0x323   :  { %v3784_v40 = vmax.f32 %v1389_v32, 0.0  ;;  %v259_v48 = vpop.f32.mrf.mxu3 }
 0x324   :  { %v3786_v58 = vld [vmem:[#allocation2 + $0xac] sm:$0xff]  ;;  %v1732_v35 = vadd.f32 %v3761_v42, %v1676_v60 }
 0x325   :  { %1421 = vst [vmem:[#allocation2 + $0xb8] sm:$0xff] %v3784_v40  ;;  %1542 = vrot.lane.b32.xlu2 %v3577_v14, %s2948_s7  ;;  %v1453_v30 = vld [vmem:[#allocation2 + $0xae] sm:$0xff] }
 0x326   :  { %1662 = vrot.lane.b32.xlu0 %v3786_v58, %s2953_s28  ;;  %1480 = vrot.lane.b32.xlu1 %v1453_v30, %s2947_s27  ;;  %v1580_v21 = vld [vmem:[#allocation2 + $0xaa] sm:$0xff] }
 0x327   :  { %v1767_v45 = vpop.permute.xlu1 %1766  ;;  %v1597_v11 = vpop.permute.xlu2 %1596 }
 0x328   :  { %v1796_v61 = vadd.f32 %v1767_v45, %v1732_v35  ;;  %v3840_v35 = vld [vmem:[#allocation2 + $0xe6] sm:$0xff] }
 0x32b   :  { %v261_v33 = vpop.f32.mrf.mxu3 }
 0x32c   :  { %v1581_v51 = vld [vmem:[#allocation2 + $0xb2] sm:$0xff] }
 0x32d   :  { %v1695_v59 = vld [vmem:[#allocation2 + $0xb6] sm:$0xff]  ;;  %1608 = vrot.lane.b32.xlu2 %v1581_v51, %s2949_s9 }
 0x32e   :  { %1720 = vrot.lane.b32.xlu0 %v1695_v59, %s2952_s26  ;;  %1606 = vrot.lane.b32.xlu1 %v1580_v21, %s2949_s9  ;;  %v1639_v29 = vld [vmem:[#allocation2 + $0xb4] sm:$0xff] }
 0x32f   :  { %v1649_v0 = vpop.permute.xlu1 %1648  ;;  %v1533_v52 = vpop.permute.xlu0 %1532 }
 0x330   :  { %v1677_v23 = vadd.f32 %v1649_v0, %v1621_v41  ;;  %v1773_v25 = vpop.permute.xlu2 %1772 }
 0x332   :  { %v1733_v22 = vadd.f32 %v1705_v10, %v1677_v23 }
 0x334   :  { %v1352_v38 = vpop.f32.mrf.mxu2  ;;  %v1797_v36 = vadd.f32 %v1769_v9, %v1733_v22 }
 0x335   :  { %v1353_v5 = vadd.f32 %v3602_v27, %v1352_v38  ;;  %1718 = vrot.lane.b32.xlu2 %v1453_v30, %s2952_s26  ;;  %v1494_v30 = vadd.f32 %v3721_v28, %v1430_v31 }
 0x336   :  { %1482 = vrot.lane.b32.xlu0 %v3802_v53, %s2947_s27  ;;  %1664 = vrot.lane.b32.xlu1 %v1639_v29, %s2953_s28  ;;  %v1811_v46 = vpack.c.bf16 %v1797_v36, %v1796_v61 }
 0x337   :  { %v1374_v19 = vmax.f32 %v1353_v5, 0.0  ;;  %v1469_v42 = vpop.permute.xlu1 %1468  ;;  %v1558_v49 = vadd.f32 %v3701_v39, %v1494_v30 }
 0x338   :  { %1899 = vmatmul.bf16.gmra.mxu3 %v1811_v46  ;;  %v1651_v9 = vpop.permute.xlu0 %1650  ;;  %v1495_v57 = vadd.f32 %v1469_v42, %v3679_v4 }
 0x339   :  { %v1390_v63 = vadd.f32 %v1374_v19, %v255_v54 }
 0x33a   :  { %v1559_v18 = vadd.f32 %v1533_v52, %v1495_v57  ;;  %v260_v52 = vadd.f32 %v3607_v17, %v259_v48 }
 0x33b   :  { %v3811_v56 = vmax.f32 %v1390_v63, 0.0 }
 0x33c   :  { %v1354_v12 = vpop.f32.mrf.mxu2  ;;  %v1623_v41 = vadd.f32 %v1597_v11, %v1559_v18 }
 0x33d   :  { %1422 = vst [vmem:[#allocation2 + $0xd0] sm:$0xff] %v3811_v56  ;;  %v1355_v55 = vadd.f32 %v3602_v27, %v1354_v12  ;;  %1784 = vrot.lane.b32.xlu2 %v3784_v40, %s2951_s2 }
 0x33e   :  { %1548 = vrot.lane.b32.xlu0 %v3811_v56, %s2948_s7  ;;  %1782 = vrot.lane.b32.xlu1 %v3773_v13, %s2951_s2 }
 0x33f   :  { %v1375_v26 = vmax.f32 %v1355_v55, 0.0  ;;  %v1595_v62 = vpop.permute.xlu1 %1594  ;;  %v3822_v32 = vpop.permute.xlu2 %1710 }
 0x340   :  { %v1709_v45 = vpop.permute.xlu0 %1708  ;;  %v1622_v10 = vadd.f32 %v1595_v62, %v1558_v49 }
 0x341   :  { %v1391_v43 = vadd.f32 %v1375_v26, %v257_v24  ;;  %v262_v26 = vadd.f32 %v3607_v17, %v261_v33  ;;  %v3884_v33 = vld [vmem:[#allocation2 + $0x48] sm:$0xff] }
 0x342   :  { %v1678_v60 = vadd.f32 %v1651_v9, %v1622_v10  ;;  %v1432_v9 = vld [vmem:[#allocation2 + $0x64] sm:$0xff] }
 0x343   :  { %v3824_v37 = vmax.f32 %v1391_v43, 0.0  ;;  %v1496_v30 = vadd.f32 %v3728_v15, %v1432_v9 }
 0x344   :  { %v3826_v20 = vld [vmem:[#allocation2 + $0xcc] sm:$0xff]  ;;  %v1734_v39 = vadd.f32 %v3790_v44, %v1678_v60 }
 0x345   :  { %1423 = vst [vmem:[#allocation2 + $0xd8] sm:$0xff] %v3824_v37  ;;  %1546 = vrot.lane.b32.xlu2 %v3577_v14, %s2948_s7  ;;  %v1455_v13 = vld [vmem:[#allocation2 + $0xce] sm:$0xff] }
 0x346   :  { %1666 = vrot.lane.b32.xlu0 %v3826_v20, %s2953_s28  ;;  %1484 = vrot.lane.b32.xlu1 %v1455_v13, %s2947_s27  ;;  %v1582_v21 = vld [vmem:[#allocation2 + $0xca] sm:$0xff] }
 0x347   :  { %v1771_v8 = vpop.permute.xlu1 %1770  ;;  %v1601_v28 = vpop.permute.xlu2 %1600 }
 0x348   :  { %v1798_v38 = vadd.f32 %v1771_v8, %v1734_v39  ;;  %v1560_v8 = vadd.f32 %v3710_v34, %v1496_v30  ;;  %v1983_v39 = vld [vmem:[#allocation2 + $0x6] sm:$0xff] }
 0x34c   :  { %v1583_v51 = vld [vmem:[#allocation2 + $0xd2] sm:$0xff] }
 0x34d   :  { %v1696_v59 = vld [vmem:[#allocation2 + $0xd6] sm:$0xff]  ;;  %1612 = vrot.lane.b32.xlu2 %v1583_v51, %s2949_s9 }
 0x34e   :  { %1724 = vrot.lane.b32.xlu0 %v1696_v59, %s2952_s26  ;;  %1610 = vrot.lane.b32.xlu1 %v1582_v21, %s2949_s9  ;;  %v1640_v29 = vld [vmem:[#allocation2 + $0xd4] sm:$0xff] }
 0x34f   :  { %v1537_v0 = vpop.permute.xlu0 %1536  ;;  %v1653_v4 = vpop.permute.xlu1 %1652 }
 0x350   :  { %v1679_v23 = vadd.f32 %v1653_v4, %v1623_v41  ;;  %v1777_v61 = vpop.permute.xlu2 %1776 }
 0x352   :  { %v1735_v22 = vadd.f32 %v1709_v45, %v1679_v23 }
 0x354   :  { %v1357_v54 = vpop.f32.mrf.mxu2  ;;  %v1799_v11 = vadd.f32 %v1773_v25, %v1735_v22 }
 0x355   :  { %v1358_v5 = vadd.f32 %v3602_v27, %v1357_v54  ;;  %1722 = vrot.lane.b32.xlu2 %v1455_v13, %s2952_s26 }
 0x356   :  { %1486 = vrot.lane.b32.xlu0 %v3840_v35, %s2947_s27  ;;  %1668 = vrot.lane.b32.xlu1 %v1640_v29, %s2953_s28  ;;  %v1812_v19 = vpack.c.bf16 %v1799_v11, %v1798_v38 }
 0x357   :  { %v1376_v36 = vmax.f32 %v1358_v5, 0.0  ;;  %v1473_v46 = vpop.permute.xlu1 %1472  ;;  %v1985_v5 = vld [vmem:[#allocation2 + $0x26] sm:$0xff] }
 0x358   :  { %v1655_v44 = vpop.permute.xlu0 %1654  ;;  %1904 = vmatmul.bf16.gmra.mxu3 %v1812_v19  ;;  %v1539_v25 = vpop.permute.xlu2 %1538  ;;  %v1497_v24 = vadd.f32 %v1473_v46, %v3714_v1  ;;  %v1987_v46 = vld [vmem:[#allocation2 + $0x46] sm:$0xff] }
 0x359   :  { %v1392_v42 = vadd.f32 %v1376_v36, %v260_v52 }
 0x35a   :  { %v1561_v13 = vadd.f32 %v1537_v0, %v1497_v24 }
 0x35b   :  { %v1408_v63 = vmax.f32 %v1392_v42, 0.0 }
 0x35c   :  { %v1359_v12 = vpop.f32.mrf.mxu2 }
 0x35d   :  { %1424 = vst [vmem:[#allocation2 + $0xf0] sm:$0xff] %v1408_v63  ;;  %v1360_v55 = vadd.f32 %v3602_v27, %v1359_v12  ;;  %1788 = vrot.lane.b32.xlu2 %v3824_v37, %s2951_s2 }
 0x35e   :  { %1552 = vrot.lane.b32.xlu0 %v1408_v63, %s2948_s7  ;;  %1786 = vrot.lane.b32.xlu1 %v3811_v56, %s2951_s2  ;;  %v1625_v56 = vadd.f32 %v1601_v28, %v1561_v13 }
 0x35f   :  { %v1377_v62 = vmax.f32 %v1360_v55, 0.0  ;;  %v1599_v31 = vpop.permute.xlu1 %1598 }
 0x360   :  { %v1713_v43 = vpop.permute.xlu0 %1712  ;;  %v1624_v17 = vadd.f32 %v1599_v31, %v1560_v8 }
 0x361   :  { %v1393_v27 = vadd.f32 %v1377_v62, %v262_v26  ;;  %v1989_v62 = vld [vmem:[#allocation2 + $0x66] sm:$0xff] }
 0x362   :  { %v1680_v51 = vadd.f32 %v1655_v44, %v1624_v17 }
 0x363   :  { %v3858_v57 = vmax.f32 %v1393_v27, 0.0 }
 0x364   :  { %v3860_v45 = vld [vmem:[#allocation2 + $0xec] sm:$0xff]  ;;  %v1736_v41 = vadd.f32 %v3822_v32, %v1680_v51  ;;  %v3878_v32 = vld [vmem:[#allocation2 + $0x84] sm:$0xff] }
 0x365   :  { %1425 = vst [vmem:[#allocation2 + $0xf8] sm:$0xff] %v3858_v57  ;;  %1550 = vrot.lane.b32.xlu2 %v3577_v14, %s2948_s7  ;;  %v1457_v1 = vld [vmem:[#allocation2 + $0xee] sm:$0xff]  ;;  %v3904_v51 = vld [vmem:[#allocation2 + $0xa4] sm:$0xff] }
 0x366   :  { %1670 = vrot.lane.b32.xlu0 %v3860_v45, %s2953_s28  ;;  %1488 = vrot.lane.b32.xlu1 %v1457_v1, %s2947_s27  ;;  %v1584_v34 = vld [vmem:[#allocation2 + $0xea] sm:$0xff] }
 0x367   :  { %v1605_v15 = vpop.permute.xlu2 %1604  ;;  %v1657_v18 = vpop.permute.xlu1 %1656 }
 0x368   :  { %v1475_v49 = vpop.permute.xlu0 %1474  ;;  %v1681_v10 = vadd.f32 %v1657_v18, %v1625_v56 }
 0x369   :  { %v1498_v19 = vadd.f32 %v1475_v49, %v3878_v32  ;;  %v3899_v49 = vld [vmem:[%s4166_s8] ss:$0 sm:$0xff] }
 0x36a   :  { %v1737_v60 = vadd.f32 %v1713_v43, %v1681_v10 }
 0x36b   :  { %v1562_v42 = vadd.f32 %v1539_v25, %v1498_v19 }
 0x36c   :  { %v1585_v59 = vld [vmem:[#allocation2 + $0xf2] sm:$0xff]  ;;  %v1801_v23 = vadd.f32 %v1777_v61, %v1737_v60 }
 0x36d   :  { %v1697_v21 = vld [vmem:[#allocation2 + $0xf6] sm:$0xff]  ;;  %1616 = vrot.lane.b32.xlu2 %v1585_v59, %s2949_s9 }
 0x36e   :  { %1728 = vrot.lane.b32.xlu0 %v1697_v21, %s2952_s26  ;;  %1614 = vrot.lane.b32.xlu1 %v1584_v34, %s2949_s9  ;;  %v1641_v22 = vld [vmem:[#allocation2 + $0xf4] sm:$0xff] }
 0x36f   :  { %v1715_v14 = vpop.permute.xlu2 %1714  ;;  %v1775_v4 = vpop.permute.xlu1 %1774 }
 0x370   :  { %v1541_v0 = vpop.permute.xlu0 %1540  ;;  %v1800_v28 = vadd.f32 %v1775_v4, %v1736_v41 }
 0x372   :  { %v1813_v48 = vpack.c.bf16 %v1801_v23, %v1800_v28 }
 0x374   :  { %1909 = vmatmul.bf16.gmra.mxu3 %v1813_v48 }
 0x375   :  { %1726 = vrot.lane.b32.xlu2 %v1457_v1, %s2952_s26 }
 0x376   :  { %1672 = vrot.lane.b32.xlu1 %v1641_v22, %s2953_s28  ;;  %1999 = vrot.lane.b32.xlu0 %v1983_v39, %s2947_s27 }
 0x377   :  { %v1781_v52 = vpop.permute.xlu2 %1780 }
 0x378   :  { %v1659_v54 = vpop.permute.xlu0 %1658  ;;  %v1477_v38 = vpop.permute.xlu1 %1476 }
 0x379   :  { %v1499_v61 = vadd.f32 %v1477_v38, %v3753_v50 }
 0x37b   :  { %v1563_v44 = vadd.f32 %v1541_v0, %v1499_v61 }
 0x37d   :  { %1792 = vrot.lane.b32.xlu2 %v3858_v57, %s2951_s2  ;;  %v1627_v55 = vadd.f32 %v1605_v15, %v1563_v44 }
 0x37e   :  { %1790 = vrot.lane.b32.xlu1 %v1408_v63, %s2951_s2  ;;  %2003 = vrot.lane.b32.xlu0 %v1985_v5, %s2947_s27 }
 0x37f   :  { %v1543_v29 = vpop.permute.xlu2 %1542 }
 0x380   :  { %v1717_v11 = vpop.permute.xlu0 %1716  ;;  %v1603_v36 = vpop.permute.xlu1 %1602 }
 0x381   :  { %v1626_v63 = vadd.f32 %v1603_v36, %v1562_v42 }
 0x383   :  { %v1682_v26 = vadd.f32 %v1659_v54, %v1626_v63 }
 0x385   :  { %2063 = vrot.lane.b32.xlu2 %v3884_v33, %s2948_s7  ;;  %v1738_v31 = vadd.f32 %v1715_v14, %v1682_v26 }
 0x386   :  { %2007 = vrot.lane.b32.xlu0 %v1987_v46, %s2947_s27 }
 0x387   :  { %v1609_v12 = vpop.permute.xlu2 %1608 }
 0x388   :  { %v1479_v9 = vpop.permute.xlu0 %1478  ;;  %v1661_v50 = vpop.permute.xlu1 %1660 }
 0x389   :  { %v1683_v24 = vadd.f32 %v1661_v50, %v1627_v55  ;;  %v1500_v14 = vadd.f32 %v1479_v9, %v3904_v51 }
 0x38b   :  { %v1739_v43 = vadd.f32 %v1717_v11, %v1683_v24  ;;  %v1564_v4 = vadd.f32 %v1543_v29, %v1500_v14 }
 0x38d   :  { %2067 = vrot.lane.b32.xlu2 %v3884_v33, %s2948_s7  ;;  %v1803_v8 = vadd.f32 %v1781_v52, %v1739_v43 }
 0x38e   :  { %2011 = vrot.lane.b32.xlu0 %v1989_v62, %s2947_s27 }
 0x38f   :  { %v1719_v25 = vpop.permute.xlu2 %1718 }
 0x390   :  { %v1545_v30 = vpop.permute.xlu0 %1544  ;;  %v1779_v27 = vpop.permute.xlu1 %1778 }
 0x391   :  { %v1802_v13 = vadd.f32 %v1779_v27, %v1738_v31 }
 0x393   :  { %v1814_v1 = vpack.c.bf16 %v1803_v8, %v1802_v13 }
 0x395   :  { %2071 = vrot.lane.b32.xlu2 %v3884_v33, %s2948_s7  ;;  %1914 = vmatmul.bf16.gmra.mxu3 %v1814_v1 }
 0x396   :  { %2015 = vrot.lane.b32.xlu0 %v3730_v6, %s2947_s27 }
 0x397   :  { %v1785_v17 = vpop.permute.xlu2 %1784 }
 0x398   :  { %v1663_v15 = vpop.permute.xlu0 %1662  ;;  %v1481_v56 = vpop.permute.xlu1 %1480 }
 0x399   :  { %v1501_v59 = vadd.f32 %v1481_v56, %v3786_v58 }
 0x39b   :  { %v1895_v18 = vpop.f32.mrf.mxu3  ;;  %v1565_v41 = vadd.f32 %v1545_v30, %v1501_v59 }
 0x39c   :  { %v1896_v10 = vadd.f32 %v3899_v49, %v1895_v18 }
 0x39d   :  { %2075 = vrot.lane.b32.xlu2 %v3884_v33, %s2948_s7  ;;  %v1629_v39 = vadd.f32 %v1609_v12, %v1565_v41 }
 0x39e   :  { %v1935_v21 = vmax.f32 %v1896_v10, 0.0 }
 0x39f   :  { %v1547_v6 = vpop.permute.xlu2 %1546 }
 0x3a0   :  { %v1721_v60 = vpop.permute.xlu0 %1720  ;;  %v1607_v34 = vpop.permute.xlu1 %1606  ;;  %1951 = vst [vmem:[#allocation2 + $0x10] sm:$0xff] %v1935_v21  ;;  %2065 = vrot.lane.b32.xlu0 %v1935_v21, %s2948_s7 }
 0x3a1   :  { %v1628_v23 = vadd.f32 %v1607_v34, %v1564_v4 }
 0x3a3   :  { %v1897_v0 = vpop.f32.mrf.mxu3  ;;  %v1684_v61 = vadd.f32 %v1663_v15, %v1628_v23 }
 0x3a4   :  { %v1898_v28 = vadd.f32 %v3899_v49, %v1897_v0 }
 0x3a5   :  { %2079 = vrot.lane.b32.xlu2 %v3884_v33, %s2948_s7  ;;  %v1740_v36 = vadd.f32 %v1719_v25, %v1684_v61  ;;  %v3924_v25 = vld [vmem:[#allocation2 + $0xc4] sm:$0xff] }
 0x3a6   :  { %v1936_v48 = vmax.f32 %v1898_v28, 0.0 }
 0x3a7   :  { %v1613_v58 = vpop.permute.xlu2 %1612  ;;  %v1984_v54 = vld [vmem:[#allocation2 + $0xe] sm:$0xff] }
 0x3a8   :  { %v1483_v22 = vpop.permute.xlu0 %1482  ;;  %v1665_v52 = vpop.permute.xlu1 %1664  ;;  %v3912_v38 = vld [vmem:[#allocation2 + $0xc] sm:$0xff]  ;;  %1952 = vst [vmem:[#allocation2 + $0x18] sm:$0xff] %v1936_v48  ;;  %2001 = vrot.lane.b32.xlu1 %v1984_v54, %s2947_s27 }
 0x3a9   :  { %v1685_v5 = vadd.f32 %v1665_v52, %v1629_v39  ;;  %2183 = vrot.lane.b32.xlu0 %v3912_v38, %s2953_s28  ;;  %v2111_v46 = vld [vmem:[#allocation2 + $0xa] sm:$0xff] }
 0x3ab   :  { %v1741_v29 = vadd.f32 %v1721_v60, %v1685_v5 }
 0x3ad   :  { %2239 = vrot.lane.b32.xlu2 %v1984_v54, %s2952_s26  ;;  %v1805_v12 = vadd.f32 %v1785_v17, %v1741_v29  ;;  %v1502_v17 = vadd.f32 %v1483_v22, %v3924_v25 }
 0x3af   :  { %v1723_v11 = vpop.permute.xlu2 %1722  ;;  %v2231_v42 = vld [vmem:[#allocation2 + $0x16] sm:$0xff]  ;;  %v1566_v18 = vadd.f32 %v1547_v6, %v1502_v17 }
 0x3b0   :  { %v1549_v19 = vpop.permute.xlu0 %1548  ;;  %v1783_v44 = vpop.permute.xlu1 %1782  ;;  %2127 = vrot.lane.b32.xlu1 %v2111_v46, %s2949_s9  ;;  %v2112_v9 = vld [vmem:[#allocation2 + $0x12] sm:$0xff] }
 0x3b1   :  { %v1804_v63 = vadd.f32 %v1783_v44, %v1740_v36  ;;  %2241 = vrot.lane.b32.xlu0 %v2231_v42, %s2952_s26  ;;  %v2175_v1 = vld [vmem:[#allocation2 + $0x14] sm:$0xff]  ;;  %v3943_v42 = vld [vmem:[#allocation2 + $0xe4] sm:$0xff] }
 0x3b3   :  { %v1815_v55 = vpack.c.bf16 %v1805_v12, %v1804_v63 }
 0x3b5   :  { %2129 = vrot.lane.b32.xlu2 %v2112_v9, %s2949_s9  ;;  %1919 = vmatmul.bf16.gmra.mxu3 %v1815_v55 }
 0x3b7   :  { %v1789_v50 = vpop.permute.xlu2 %1788 }
 0x3b8   :  { %v1667_v24 = vpop.permute.xlu0 %1666  ;;  %v1485_v26 = vpop.permute.xlu1 %1484  ;;  %2303 = vrot.lane.b32.xlu1 %v1935_v21, %s2951_s2 }
 0x3b9   :  { %v1503_v31 = vadd.f32 %v1485_v26, %v3826_v20 }
 0x3bb   :  { %v1900_v62 = vpop.f32.mrf.mxu3  ;;  %v1567_v15 = vadd.f32 %v1549_v19, %v1503_v31 }
 0x3bc   :  { %v1901_v43 = vadd.f32 %v3899_v49, %v1900_v62 }
 0x3bd   :  { %2305 = vrot.lane.b32.xlu2 %v1936_v48, %s2951_s2  ;;  %v1631_v20 = vadd.f32 %v1613_v58, %v1567_v15 }
 0x3be   :  { %v1937_v30 = vmax.f32 %v1901_v43, 0.0 }
 0x3bf   :  { %v1551_v27 = vpop.permute.xlu2 %1550 }
 0x3c0   :  { %v1725_v13 = vpop.permute.xlu0 %1724  ;;  %v1611_v8 = vpop.permute.xlu1 %1610  ;;  %1953 = vst [vmem:[#allocation2 + $0x30] sm:$0xff] %v1937_v30  ;;  %2185 = vrot.lane.b32.xlu1 %v2175_v1, %s2953_s28  ;;  %2069 = vrot.lane.b32.xlu0 %v1937_v30, %s2948_s7 }
 0x3c1   :  { %v1630_v59 = vadd.f32 %v1611_v8, %v1566_v18 }
 0x3c3   :  { %v1902_v56 = vpop.f32.mrf.mxu3  ;;  %v1686_v6 = vadd.f32 %v1667_v24, %v1630_v59 }
 0x3c4   :  { %v1903_v10 = vadd.f32 %v3899_v49, %v1902_v56 }
 0x3c5   :  { %v1742_v23 = vadd.f32 %v1723_v11, %v1686_v6 }
 0x3c6   :  { %v1938_v21 = vmax.f32 %v1903_v10, 0.0 }
 0x3c7   :  { %v1986_v14 = vld [vmem:[#allocation2 + $0x2e] sm:$0xff]  ;;  %v1617_v0 = vpop.permute.xlu2 %1616 }
 0x3c8   :  { %v1487_v60 = vpop.permute.xlu0 %1486  ;;  %v1669_v34 = vpop.permute.xlu1 %1668  ;;  %v3931_v41 = vld [vmem:[#allocation2 + $0x2c] sm:$0xff]  ;;  %1954 = vst [vmem:[#allocation2 + $0x38] sm:$0xff] %v1938_v21  ;;  %2243 = vrot.lane.b32.xlu2 %v1986_v14, %s2952_s26  ;;  %2005 = vrot.lane.b32.xlu1 %v1986_v14, %s2947_s27 }
 0x3c9   :  { %v1687_v4 = vadd.f32 %v1669_v34, %v1631_v20  ;;  %2187 = vrot.lane.b32.xlu0 %v3931_v41, %s2953_s28  ;;  %v2113_v39 = vld [vmem:[#allocation2 + $0x2a] sm:$0xff] }
 0x3cb   :  { %v1743_v28 = vadd.f32 %v1725_v13, %v1687_v4 }
 0x3cd   :  { %v1807_v54 = vadd.f32 %v1789_v50, %v1743_v28  ;;  %v1504_v50 = vadd.f32 %v1487_v60, %v3943_v42 }
 0x3cf   :  { %v2114_v58 = vld [vmem:[#allocation2 + $0x32] sm:$0xff]  ;;  %v1727_v61 = vpop.permute.xlu2 %1726  ;;  %v1568_v62 = vadd.f32 %v1551_v27, %v1504_v50  ;;  %v2780_v50 = vld [vmem:[#allocation8 + $0x20] sm:$0xff] }
 0x3d0   :  { %v1787_v48 = vpop.permute.xlu1 %1786  ;;  %v2232_v22 = vld [vmem:[#allocation2 + $0x36] sm:$0xff]  ;;  %2133 = vrot.lane.b32.xlu2 %v2114_v58, %s2949_s9  ;;  %2131 = vrot.lane.b32.xlu1 %v2113_v39, %s2949_s9  ;;  %v1553_v5 = vpop.permute.xlu0 %1552 }
 0x3d1   :  { %v1806_v52 = vadd.f32 %v1787_v48, %v1742_v23  ;;  %2245 = vrot.lane.b32.xlu0 %v2232_v22, %s2952_s26  ;;  %v2176_v9 = vld [vmem:[#allocation2 + $0x34] sm:$0xff] }
 0x3d2   :  { %v2783_v22 = vld [vmem:[#allocation8 + $0x38] sm:$0xff] }
 0x3d3   :  { %v1816_v29 = vpack.c.bf16 %v1807_v54, %v1806_v52  ;;  %v1969_v52 = vld [vmem:[#allocation2 + $0x24] sm:$0xff]  ;;  %2427 = vmatpush.bf16.msrb.mxu0 %v2783_v22 }
 0x3d5   :  { %1924 = vmatmul.bf16.gmra.mxu3 %v1816_v29 }
 0x3d7   :  { %v1793_v44 = vpop.permute.xlu2 %1792 }
 0x3d8   :  { %v1489_v36 = vpop.permute.xlu1 %1488  ;;  %2309 = vrot.lane.b32.xlu2 %v1938_v21, %s2951_s2  ;;  %2307 = vrot.lane.b32.xlu1 %v1937_v30, %s2951_s2  ;;  %v1671_v11 = vpop.permute.xlu0 %1670 }
 0x3d9   :  { %v1505_v63 = vadd.f32 %v1489_v36, %v3860_v45 }
 0x3db   :  { %v1905_v19 = vpop.f32.mrf.mxu3  ;;  %v1569_v24 = vadd.f32 %v1553_v5, %v1505_v63 }
 0x3dc   :  { %v1906_v46 = vadd.f32 %v3899_v49, %v1905_v19 }
 0x3dd   :  { %v1633_v8 = vadd.f32 %v1617_v0, %v1569_v24 }
 0x3de   :  { %v1939_v12 = vmax.f32 %v1906_v46, 0.0 }
 0x3df   :  { %v3950_v30 = vpop.permute.xlu2 %2063 }
 0x3e0   :  { %v1615_v55 = vpop.permute.xlu1 %1614  ;;  %1955 = vst [vmem:[#allocation2 + $0x50] sm:$0xff] %v1939_v12  ;;  %2189 = vrot.lane.b32.xlu1 %v2176_v9, %s2953_s28  ;;  %2073 = vrot.lane.b32.xlu0 %v1939_v12, %s2948_s7  ;;  %v1729_v31 = vpop.permute.xlu0 %1728  ;;  %v1971_v9 = vld [vmem:[#allocation2 + $0x44] sm:$0xff] }
 0x3e1   :  { %v1632_v13 = vadd.f32 %v1615_v55, %v1568_v62 }
 0x3e3   :  { %v1907_v26 = vpop.f32.mrf.mxu3  ;;  %v1688_v27 = vadd.f32 %v1671_v11, %v1632_v13 }
 0x3e4   :  { %v1908_v43 = vadd.f32 %v3899_v49, %v1907_v26 }
 0x3e5   :  { %v1744_v59 = vadd.f32 %v1727_v61, %v1688_v27  ;;  %v2782_v61 = vld [vmem:[#allocation8 + $0x30] sm:$0xff]  ;;  %v2777_v27 = vld [vmem:[#allocation8 + $0x8] sm:$0xff] }
 0x3e6   :  { %v1940_v45 = vmax.f32 %v1908_v43, 0.0  ;;  %2428 = vmatpush.bf16.msrb.mxu0 %v2782_v61 }
 0x3e7   :  { %v1988_v17 = vld [vmem:[#allocation2 + $0x4e] sm:$0xff]  ;;  %v2068_v14 = vpop.permute.xlu2 %2067 }
 0x3e8   :  { %v1673_v1 = vpop.permute.xlu1 %1672  ;;  %v3952_v15 = vld [vmem:[#allocation2 + $0x4c] sm:$0xff]  ;;  %1956 = vst [vmem:[#allocation2 + $0x58] sm:$0xff] %v1940_v45  ;;  %2247 = vrot.lane.b32.xlu2 %v1988_v17, %s2952_s26  ;;  %2009 = vrot.lane.b32.xlu1 %v1988_v17, %s2947_s27  ;;  %v3958_v10 = vpop.permute.xlu0 %1999 }
 0x3e9   :  { %v1689_v56 = vadd.f32 %v1673_v1, %v1633_v8  ;;  %2191 = vrot.lane.b32.xlu0 %v3952_v15, %s2953_s28  ;;  %v2115_v60 = vld [vmem:[#allocation2 + $0x4a] sm:$0xff] }
 0x3ea   :  { %v2778_v1 = vld [vmem:[#allocation8 + $0x10] sm:$0xff] }
 0x3eb   :  { %v1745_v18 = vadd.f32 %v1729_v31, %v1689_v56  ;;  %v2779_v31 = vld [vmem:[#allocation8 + $0x18] sm:$0xff] }
 0x3ed   :  { %v1809_v4 = vadd.f32 %v1793_v44, %v1745_v18 }
 0x3ef   :  { %v2116_v20 = vld [vmem:[#allocation2 + $0x52] sm:$0xff]  ;;  %v2072_v58 = vpop.permute.xlu2 %2071 }
 0x3f0   :  { %v1791_v21 = vpop.permute.xlu1 %1790  ;;  %v2233_v34 = vld [vmem:[#allocation2 + $0x56] sm:$0xff]  ;;  %2137 = vrot.lane.b32.xlu2 %v2116_v20, %s2949_s9  ;;  %2135 = vrot.lane.b32.xlu1 %v2115_v60, %s2949_s9  ;;  %v2004_v28 = vpop.permute.xlu0 %2003  ;;  %v2776_v20 = vld [vmem:[#allocation8] sm:$0xff] }
 0x3f1   :  { %v1808_v0 = vadd.f32 %v1791_v21, %v1744_v59  ;;  %2249 = vrot.lane.b32.xlu0 %v2233_v34, %s2952_s26  ;;  %v2177_v5 = vld [vmem:[#allocation2 + $0x54] sm:$0xff]  ;;  %v2033_v29 = vadd.f32 %v2004_v28, %v1969_v52 }
 0x3f3   :  { %v1817_v6 = vpack.c.bf16 %v1809_v4, %v1808_v0  ;;  %v3974_v55 = vadd.f32 %v2068_v14, %v2033_v29 }
 0x3f5   :  { %1929 = vmatmul.bf16.gmra.mxu3 %v1817_v6 }
 0x3f7   :  { %v1910_v23 = vpop.f32.mrf.mxu3  ;;  %v2076_v63 = vpop.permute.xlu2 %2075 }
 0x3f8   :  { %v1911_v48 = vadd.f32 %v3899_v49, %v1910_v23  ;;  %2313 = vrot.lane.b32.xlu2 %v1940_v45, %s2951_s2  ;;  %2311 = vrot.lane.b32.xlu1 %v1939_v12, %s2951_s2  ;;  %v2008_v11 = vpop.permute.xlu0 %2007  ;;  %v2781_v12 = vld [vmem:[#allocation8 + $0x28] sm:$0xff] }
 0x3f9   :  { %2429 = vmatpush.bf16.msrb.mxu0 %v2781_v12  ;;  %v2035_v24 = vadd.f32 %v2008_v11, %v1971_v9  ;;  %v1973_v45 = vld [vmem:[#allocation2 + $0x64] sm:$0xff] }
 0x3fa   :  { %v1941_v39 = vmax.f32 %v1911_v48, 0.0 }
 0x3fb   :  { %v3979_v13 = vadd.f32 %v2072_v58, %v2035_v24 }
 0x3fc   :  { %1957 = vst [vmem:[#allocation2 + $0x70] sm:$0xff] %v1941_v39  ;;  %2077 = vrot.lane.b32.xlu0 %v1941_v39, %s2948_s7 }
 0x3fd   :  { %2430 = vmatpush.bf16.msrb.mxu0 %v2780_v50 }
 0x3ff   :  { %v1912_v54 = vpop.f32.mrf.mxu3  ;;  %v2080_v8 = vpop.permute.xlu2 %2079 }
 0x400   :  { %v1913_v36 = vadd.f32 %v3899_v49, %v1912_v54  ;;  %2193 = vrot.lane.b32.xlu1 %v2177_v5, %s2953_s28  ;;  %v2012_v26 = vpop.permute.xlu0 %2011  ;;  %v1967_v5 = vld [vmem:[#allocation2 + $0x4] sm:$0xff] }
 0x401   :  { %2431 = vmatpush.bf16.msrb.mxu0 %v2779_v31  ;;  %v2037_v56 = vadd.f32 %v2012_v26, %v1973_v45  ;;  %v2031_v61 = vadd.f32 %v3958_v10, %v1967_v5 }
 0x402   :  { %v1942_v19 = vmax.f32 %v1913_v36, 0.0 }
 0x403   :  { %v1990_v44 = vld [vmem:[#allocation2 + $0x6e] sm:$0xff]  ;;  %v3983_v59 = vadd.f32 %v2076_v63, %v2037_v56 }
 0x404   :  { %v3969_v46 = vld [vmem:[#allocation2 + $0x6c] sm:$0xff]  ;;  %1958 = vst [vmem:[#allocation2 + $0x78] sm:$0xff] %v1942_v19  ;;  %2251 = vrot.lane.b32.xlu2 %v1990_v44, %s2952_s26 }
 0x405   :  { %2195 = vrot.lane.b32.xlu0 %v3969_v46, %s2953_s28  ;;  %v2117_v17 = vld [vmem:[#allocation2 + $0x6a] sm:$0xff]  ;;  %2432 = vmatpush.bf16.msrb.mxu0 %v2778_v1 }
 0x407   :  { %v2240_v60 = vpop.permute.xlu2 %2239 }
 0x408   :  { %2013 = vrot.lane.b32.xlu1 %v1990_v44, %s2947_s27  ;;  %v2016_v18 = vpop.permute.xlu0 %2015 }
 0x409   :  { %2433 = vmatpush.bf16.msrb.mxu0 %v2777_v27  ;;  %v2039_v34 = vadd.f32 %v2016_v18, %v3878_v32 }
 0x40b   :  { %v2118_v62 = vld [vmem:[#allocation2 + $0x72] sm:$0xff]  ;;  %v3993_v6 = vadd.f32 %v2080_v8, %v2039_v34 }
 0x40c   :  { %v2234_v43 = vld [vmem:[#allocation2 + $0x76] sm:$0xff]  ;;  %2141 = vrot.lane.b32.xlu2 %v2118_v62, %s2949_s9  ;;  %v1993_v62 = vld [vmem:[#allocation2 + $0xa6] sm:$0xff] }
 0x40d   :  { %2253 = vrot.lane.b32.xlu0 %v2234_v43, %s2952_s26  ;;  %2434 = vmatpush.bf16.msrb.mxu0 %v2776_v20  ;;  %v2178_v48 = vld [vmem:[#allocation2 + $0x74] sm:$0xff] }
 0x40f   :  { %v2130_v58 = vpop.permute.xlu2 %2129 }
 0x410   :  { %2139 = vrot.lane.b32.xlu1 %v2117_v17, %s2949_s9 }
 0x412   :  { %v2066_v28 = vpop.permute.xlu0 %2065 }
 0x414   :  { %2317 = vrot.lane.b32.xlu2 %v1942_v19, %s2951_s2  ;;  %v2095_v19 = vadd.f32 %v3950_v30, %v2031_v61 }
 0x417   :  { %v2306_v12 = vpop.permute.xlu2 %2305 }
 0x418   :  { %v1915_v21 = vpop.f32.mrf.mxu3  ;;  %2315 = vrot.lane.b32.xlu1 %v1941_v39, %s2951_s2 }
 0x419   :  { %v1916_v14 = vadd.f32 %v3899_v49, %v1915_v21 }
 0x41a   :  { %v2002_v4 = vpop.permute.xlu1 %2001 }
 0x41b   :  { %v3988_v0 = vmax.f32 %v1916_v14, 0.0  ;;  %v2184_v29 = vpop.permute.xlu0 %2183  ;;  %v2032_v36 = vadd.f32 %v2002_v4, %v3912_v38 }
 0x41d   :  { %1959 = vst [vmem:[#allocation2 + $0x90] sm:$0xff] %v3988_v0  ;;  %2081 = vrot.lane.b32.xlu0 %v3988_v0, %s2948_s7  ;;  %v2096_v9 = vadd.f32 %v2066_v28, %v2032_v36 }
 0x41f   :  { %v2160_v26 = vadd.f32 %v2130_v58, %v2096_v9 }
 0x420   :  { %v1917_v23 = vpop.f32.mrf.mxu3  ;;  %2197 = vrot.lane.b32.xlu1 %v2178_v48, %s2953_s28 }
 0x421   :  { %v1918_v32 = vadd.f32 %v3899_v49, %v1917_v23 }
 0x422   :  { %v2128_v22 = vpop.permute.xlu1 %2127  ;;  %v2244_v45 = vpop.permute.xlu2 %2243 }
 0x423   :  { %v1944_v39 = vmax.f32 %v1918_v32, 0.0  ;;  %v2159_v50 = vadd.f32 %v2128_v22, %v2095_v19  ;;  %v2242_v43 = vpop.permute.xlu0 %2241 }
 0x424   :  { %v1992_v52 = vld [vmem:[#allocation2 + $0x8e] sm:$0xff] }
 0x425   :  { %v3997_v54 = vld [vmem:[#allocation2 + $0x8c] sm:$0xff]  ;;  %1960 = vst [vmem:[#allocation2 + $0x98] sm:$0xff] %v1944_v39  ;;  %2255 = vrot.lane.b32.xlu2 %v1992_v52, %s2952_s26  ;;  %v2215_v10 = vadd.f32 %v2184_v29, %v2159_v50 }
 0x426   :  { %2199 = vrot.lane.b32.xlu0 %v3997_v54, %s2953_s28  ;;  %v2119_v24 = vld [vmem:[#allocation2 + $0x8a] sm:$0xff] }
 0x427   :  { %v2271_v30 = vadd.f32 %v2240_v60, %v2215_v10 }
 0x428   :  { %2017 = vrot.lane.b32.xlu1 %v1992_v52, %s2947_s27 }
 0x42a   :  { %v2304_v11 = vpop.permute.xlu1 %2303  ;;  %v2134_v60 = vpop.permute.xlu2 %2133 }
 0x42b   :  { %v2335_v1 = vadd.f32 %v2304_v11, %v2271_v30 }
 0x42c   :  { %v2120_v44 = vld [vmem:[#allocation2 + $0x92] sm:$0xff] }
 0x42d   :  { %v2235_v63 = vld [vmem:[#allocation2 + $0x96] sm:$0xff]  ;;  %2145 = vrot.lane.b32.xlu2 %v2120_v44, %s2949_s9 }
 0x42e   :  { %2257 = vrot.lane.b32.xlu0 %v2235_v63, %s2952_s26  ;;  %v2179_v27 = vld [vmem:[#allocation2 + $0x94] sm:$0xff] }
 0x430   :  { %2143 = vrot.lane.b32.xlu1 %v2119_v24, %s2949_s9 }
 0x432   :  { %v2186_v38 = vpop.permute.xlu1 %2185  ;;  %v2070_v14 = vpop.permute.xlu0 %2069 }
 0x433   :  { %v2216_v31 = vadd.f32 %v2186_v38, %v2160_v26  ;;  %v2310_v22 = vpop.permute.xlu2 %2309 }
 0x435   :  { %2321 = vrot.lane.b32.xlu2 %v1944_v39, %s2951_s2  ;;  %v2272_v8 = vadd.f32 %v2242_v43, %v2216_v31 }
 0x436   :  { %2019 = vrot.lane.b32.xlu0 %v1993_v62, %s2947_s27 }
 0x437   :  { %v2336_v17 = vadd.f32 %v2306_v12, %v2272_v8 }
 0x438   :  { %v1920_v56 = vpop.f32.mrf.mxu3  ;;  %2201 = vrot.lane.b32.xlu1 %v2179_v27, %s2953_s28 }
 0x439   :  { %v1921_v18 = vadd.f32 %v3899_v49, %v1920_v56  ;;  %v2351_v21 = vpack.c.bf16 %v2336_v17, %v2335_v1 }
 0x43a   :  { %v2006_v34 = vpop.permute.xlu1 %2005 }
 0x43b   :  { %v1945_v20 = vmax.f32 %v1921_v18, 0.0  ;;  %2435 = vmatmul.bf16.vlgmr.msrb.gmra.mxu0 %v2351_v21  ;;  %v2188_v58 = vpop.permute.xlu0 %2187  ;;  %v2034_v52 = vadd.f32 %v2006_v34, %v3931_v41 }
 0x43d   :  { %1961 = vst [vmem:[#allocation2 + $0xb0] sm:$0xff] %v1945_v20  ;;  %2083 = vrot.lane.b32.xlu2 %v3884_v33, %s2948_s7 }
 0x43e   :  { %2085 = vrot.lane.b32.xlu0 %v1945_v20, %s2948_s7 }
 0x440   :  { %v1922_v4 = vpop.f32.mrf.mxu3  ;;  %2319 = vrot.lane.b32.xlu1 %v3988_v0, %s2951_s2  ;;  %v2098_v0 = vadd.f32 %v2070_v14, %v2034_v52 }
 0x441   :  { %v1923_v28 = vadd.f32 %v3899_v49, %v1922_v4 }
 0x442   :  { %v2132_v48 = vpop.permute.xlu1 %2131  ;;  %v2248_v44 = vpop.permute.xlu2 %2247  ;;  %v2162_v12 = vadd.f32 %v2134_v60, %v2098_v0 }
 0x443   :  { %v1946_v23 = vmax.f32 %v1923_v28, 0.0  ;;  %v2161_v36 = vadd.f32 %v2132_v48, %v3974_v55  ;;  %v2246_v11 = vpop.permute.xlu0 %2245 }
 0x444   :  { %v4019_v32 = vld [vmem:[#allocation2 + $0xac] sm:$0xff] }
 0x445   :  { %1962 = vst [vmem:[#allocation2 + $0xb8] sm:$0xff] %v1946_v23  ;;  %v1994_v39 = vld [vmem:[#allocation2 + $0xae] sm:$0xff]  ;;  %v2217_v63 = vadd.f32 %v2188_v58, %v2161_v36 }
 0x446   :  { %2203 = vrot.lane.b32.xlu0 %v4019_v32, %s2953_s28  ;;  %v2121_v19 = vld [vmem:[#allocation2 + $0xaa] sm:$0xff] }
 0x447   :  { %v2273_v41 = vadd.f32 %v2244_v45, %v2217_v63 }
 0x448   :  { %2021 = vrot.lane.b32.xlu1 %v1994_v39, %s2947_s27 }
 0x44a   :  { %v2308_v5 = vpop.permute.xlu1 %2307  ;;  %v2138_v30 = vpop.permute.xlu2 %2137 }
 0x44b   :  { %v2337_v26 = vadd.f32 %v2308_v5, %v2273_v41 }
 0x44c   :  { %v2122_v61 = vld [vmem:[#allocation2 + $0xb2] sm:$0xff] }
 0x44d   :  { %v2236_v29 = vld [vmem:[#allocation2 + $0xb6] sm:$0xff]  ;;  %2149 = vrot.lane.b32.xlu2 %v2122_v61, %s2949_s9 }
 0x44e   :  { %2261 = vrot.lane.b32.xlu0 %v2236_v29, %s2952_s26  ;;  %v2180_v55 = vld [vmem:[#allocation2 + $0xb4] sm:$0xff] }
 0x450   :  { %2147 = vrot.lane.b32.xlu1 %v2121_v19, %s2949_s9 }
 0x452   :  { %v2190_v9 = vpop.permute.xlu1 %2189  ;;  %v2074_v10 = vpop.permute.xlu0 %2073 }
 0x453   :  { %v2218_v50 = vadd.f32 %v2190_v9, %v2162_v12  ;;  %v2314_v21 = vpop.permute.xlu2 %2313 }
 0x455   :  { %2259 = vrot.lane.b32.xlu2 %v1994_v39, %s2952_s26  ;;  %v2274_v24 = vadd.f32 %v2246_v11, %v2218_v50 }
 0x456   :  { %2023 = vrot.lane.b32.xlu0 %v3802_v53, %s2947_s27 }
 0x457   :  { %v2338_v43 = vadd.f32 %v2310_v22, %v2274_v24 }
 0x458   :  { %v1925_v62 = vpop.f32.mrf.mxu3  ;;  %2205 = vrot.lane.b32.xlu1 %v2180_v55, %s2953_s28 }
 0x459   :  { %v1926_v38 = vadd.f32 %v3899_v49, %v1925_v62  ;;  %v2352_v31 = vpack.c.bf16 %v2338_v43, %v2337_v26 }
 0x45a   :  { %v2010_v1 = vpop.permute.xlu1 %2009 }
 0x45b   :  { %v1947_v8 = vmax.f32 %v1926_v38, 0.0  ;;  %2439 = vmatmul.bf16.gmra.mxu0 %v2352_v31  ;;  %v2192_v17 = vpop.permute.xlu0 %2191  ;;  %v2036_v14 = vadd.f32 %v2010_v1, %v3952_v15 }
 0x45d   :  { %1963 = vst [vmem:[#allocation2 + $0xd0] sm:$0xff] %v1947_v8  ;;  %2325 = vrot.lane.b32.xlu2 %v1946_v23, %s2951_s2  ;;  %v2100_v48 = vadd.f32 %v2074_v10, %v2036_v14 }
 0x45e   :  { %2089 = vrot.lane.b32.xlu0 %v1947_v8, %s2948_s7  ;;  %v2252_v23 = vpop.permute.xlu2 %2251 }
 0x45f   :  { %v2164_v52 = vadd.f32 %v2138_v30, %v2100_v48 }
 0x460   :  { %v1927_v53 = vpop.f32.mrf.mxu3  ;;  %2323 = vrot.lane.b32.xlu1 %v1945_v20, %s2951_s2 }
 0x461   :  { %v1928_v45 = vadd.f32 %v3899_v49, %v1927_v53 }
 0x462   :  { %v2136_v27 = vpop.permute.xlu1 %2135 }
 0x463   :  { %v1948_v56 = vmax.f32 %v1928_v45, 0.0  ;;  %v2250_v20 = vpop.permute.xlu0 %2249  ;;  %v2163_v58 = vadd.f32 %v2136_v27, %v3979_v13 }
 0x464   :  { %v4038_v18 = vld [vmem:[#allocation2 + $0xcc] sm:$0xff] }
 0x465   :  { %1964 = vst [vmem:[#allocation2 + $0xd8] sm:$0xff] %v1948_v56  ;;  %2087 = vrot.lane.b32.xlu2 %v3884_v33, %s2948_s7  ;;  %v1996_v34 = vld [vmem:[#allocation2 + $0xce] sm:$0xff]  ;;  %v2219_v22 = vadd.f32 %v2192_v17, %v2163_v58 }
 0x466   :  { %2207 = vrot.lane.b32.xlu0 %v4038_v18, %s2953_s28  ;;  %v2123_v39 = vld [vmem:[#allocation2 + $0xca] sm:$0xff]  ;;  %v2142_v36 = vpop.permute.xlu2 %2141 }
 0x467   :  { %v2275_v29 = vadd.f32 %v2248_v44, %v2219_v22 }
 0x468   :  { %2025 = vrot.lane.b32.xlu1 %v1996_v34, %s2947_s27 }
 0x46a   :  { %v2312_v60 = vpop.permute.xlu1 %2311 }
 0x46b   :  { %v2339_v11 = vadd.f32 %v2312_v60, %v2275_v29 }
 0x46c   :  { %v2124_v4 = vld [vmem:[#allocation2 + $0xd2] sm:$0xff] }
 0x46d   :  { %v2237_v28 = vld [vmem:[#allocation2 + $0xd6] sm:$0xff]  ;;  %2153 = vrot.lane.b32.xlu2 %v2124_v4, %s2949_s9 }
 0x46e   :  { %2265 = vrot.lane.b32.xlu0 %v2237_v28, %s2952_s26  ;;  %v2078_v61 = vpop.permute.xlu0 %2077  ;;  %v2181_v63 = vld [vmem:[#allocation2 + $0xd4] sm:$0xff]  ;;  %v2318_v44 = vpop.permute.xlu2 %2317 }
 0x470   :  { %2151 = vrot.lane.b32.xlu1 %v2123_v39, %s2949_s9 }
 0x472   :  { %v2194_v5 = vpop.permute.xlu1 %2193 }
 0x473   :  { %v2220_v15 = vadd.f32 %v2194_v5, %v2164_v52 }
 0x475   :  { %2263 = vrot.lane.b32.xlu2 %v1996_v34, %s2952_s26  ;;  %v2276_v0 = vadd.f32 %v2250_v20, %v2220_v15 }
 0x476   :  { %2027 = vrot.lane.b32.xlu0 %v3840_v35, %s2947_s27 }
 0x477   :  { %v2340_v13 = vadd.f32 %v2314_v21, %v2276_v0  ;;  %v2196_v24 = vpop.permute.xlu0 %2195 }
 0x478   :  { %v1930_v19 = vpop.f32.mrf.mxu3  ;;  %2209 = vrot.lane.b32.xlu1 %v2181_v63, %s2953_s28 }
 0x479   :  { %v1931_v12 = vadd.f32 %v3899_v49, %v1930_v19  ;;  %v2353_v9 = vpack.c.bf16 %v2340_v13, %v2339_v11 }
 0x47a   :  { %v2014_v41 = vpop.permute.xlu1 %2013 }
 0x47b   :  { %v1949_v50 = vmax.f32 %v1931_v12, 0.0  ;;  %2443 = vmatmul.bf16.gmra.mxu0 %v2353_v9 }
 0x47d   :  { %1965 = vst [vmem:[#allocation2 + $0xf0] sm:$0xff] %v1949_v50  ;;  %2329 = vrot.lane.b32.xlu2 %v1948_v56, %s2951_s2 }
 0x47e   :  { %2093 = vrot.lane.b32.xlu0 %v1949_v50, %s2948_s7 }
 0x47f   :  { %v2254_v43 = vpop.permute.xlu0 %2253  ;;  %v2256_v31 = vpop.permute.xlu2 %2255 }
 0x480   :  { %v1932_v35 = vpop.f32.mrf.mxu3  ;;  %2327 = vrot.lane.b32.xlu1 %v1947_v8, %s2951_s2 }
 0x481   :  { %v1933_v10 = vadd.f32 %v3899_v49, %v1932_v35  ;;  %v2038_v49 = vadd.f32 %v2014_v41, %v3969_v46 }
 0x482   :  { %v2140_v62 = vpop.permute.xlu1 %2139 }
 0x483   :  { %v1950_v26 = vmax.f32 %v1933_v10, 0.0  ;;  %v2102_v53 = vadd.f32 %v2078_v61, %v2038_v49 }
 0x484   :  { %v4059_v55 = vld [vmem:[#allocation2 + $0xec] sm:$0xff] }
 0x485   :  { %1966 = vst [vmem:[#allocation2 + $0xf8] sm:$0xff] %v1950_v26  ;;  %2091 = vrot.lane.b32.xlu2 %v3884_v33, %s2948_s7  ;;  %v1998_v38 = vld [vmem:[#allocation2 + $0xee] sm:$0xff]  ;;  %v2165_v33 = vadd.f32 %v2140_v62, %v3983_v59  ;;  %v2166_v27 = vadd.f32 %v2142_v36, %v2102_v53 }
 0x486   :  { %2211 = vrot.lane.b32.xlu0 %v4059_v55, %s2953_s28  ;;  %v2125_v17 = vld [vmem:[#allocation2 + $0xea] sm:$0xff] }
 0x487   :  { %v2221_v56 = vadd.f32 %v2196_v24, %v2165_v33  ;;  %v2146_v21 = vpop.permute.xlu2 %2145 }
 0x488   :  { %2029 = vrot.lane.b32.xlu1 %v1998_v38, %s2947_s27 }
 0x489   :  { %v2277_v46 = vadd.f32 %v2252_v23, %v2221_v56 }
 0x48a   :  { %v2316_v30 = vpop.permute.xlu1 %2315 }
 0x48b   :  { %v2341_v4 = vadd.f32 %v2316_v30, %v2277_v46 }
 0x48c   :  { %v2126_v8 = vld [vmem:[#allocation2 + $0xf2] sm:$0xff] }
 0x48d   :  { %v2238_v1 = vld [vmem:[#allocation2 + $0xf6] sm:$0xff]  ;;  %2157 = vrot.lane.b32.xlu2 %v2126_v8, %s2949_s9 }
 0x48e   :  { %2269 = vrot.lane.b32.xlu0 %v2238_v1, %s2952_s26  ;;  %v2182_v28 = vld [vmem:[#allocation2 + $0xf4] sm:$0xff] }
 0x48f   :  { %v2082_v45 = vpop.permute.xlu0 %2081  ;;  %v2322_v39 = vpop.permute.xlu2 %2321 }
 0x490   :  { %2155 = vrot.lane.b32.xlu1 %v2125_v17, %s2949_s9 }
 0x492   :  { %v2198_v34 = vpop.permute.xlu1 %2197 }
 0x493   :  { %v2222_v14 = vadd.f32 %v2198_v34, %v2166_v27 }
 0x495   :  { %2267 = vrot.lane.b32.xlu2 %v1998_v38, %s2952_s26  ;;  %v2278_v60 = vadd.f32 %v2254_v43, %v2222_v14 }
 0x497   :  { %v2342_v48 = vadd.f32 %v2318_v44, %v2278_v60  ;;  %v2084_v23 = vpop.permute.xlu2 %2083 }
 0x498   :  { %v2200_v20 = vpop.permute.xlu0 %2199  ;;  %2213 = vrot.lane.b32.xlu1 %v2182_v28, %s2953_s28 }
 0x499   :  { %v2354_v59 = vpack.c.bf16 %v2342_v48, %v2341_v4 }
 0x49a   :  { %v2018_v58 = vpop.permute.xlu1 %2017 }
 0x49b   :  { %2447 = vmatmul.bf16.gmra.mxu0 %v2354_v59  ;;  %v2040_v52 = vadd.f32 %v2018_v58, %v3997_v54 }
 0x49d   :  { %2333 = vrot.lane.b32.xlu2 %v1950_v26, %s2951_s2  ;;  %v2104_v61 = vadd.f32 %v2082_v45, %v2040_v52 }
 0x49f   :  { %v2168_v0 = vadd.f32 %v2146_v21, %v2104_v61 }
 0x4a0   :  { %v2258_v22 = vpop.permute.xlu0 %2257  ;;  %2331 = vrot.lane.b32.xlu1 %v1949_v50, %s2951_s2 }
 0x4a2   :  { %v2144_v5 = vpop.permute.xlu1 %2143 }
 0x4a3   :  { %v2167_v29 = vadd.f32 %v2144_v5, %v3993_v6 }
 0x4a5   :  { %v2223_v19 = vadd.f32 %v2200_v20, %v2167_v29 }
 0x4a7   :  { %v2150_v63 = vpop.permute.xlu2 %2149  ;;  %v2279_v9 = vadd.f32 %v2256_v31, %v2223_v19 }
 0x4a8   :  { %v2020_v15 = vpop.permute.xlu0 %2019 }
 0x4a9   :  { %v2041_v49 = vadd.f32 %v2020_v15, %v3904_v51  ;;  %v4082_v51 = vld [vmem:[%s4168_s10] ss:$0 sm:$0xff] }
 0x4aa   :  { %v2202_v36 = vpop.permute.xlu1 %2201 }
 0x4ab   :  { %v2224_v11 = vadd.f32 %v2202_v36, %v2168_v0  ;;  %v2105_v8 = vadd.f32 %v2084_v23, %v2041_v49 }
 0x4ad   :  { %v2280_v12 = vadd.f32 %v2258_v22, %v2224_v11 }
 0x4af   :  { %v2344_v35 = vadd.f32 %v2322_v39, %v2280_v12  ;;  %v2260_v54 = vpop.permute.xlu2 %2259 }
 0x4b0   :  { %v2086_v13 = vpop.permute.xlu0 %2085 }
 0x4b2   :  { %v2320_v41 = vpop.permute.xlu1 %2319 }
 0x4b3   :  { %v2343_v24 = vadd.f32 %v2320_v41, %v2279_v9 }
 0x4b5   :  { %v2355_v50 = vpack.c.bf16 %v2344_v35, %v2343_v24 }
 0x4b7   :  { %2451 = vmatmul.bf16.gmra.mxu0 %v2355_v50  ;;  %v2326_v43 = vpop.permute.xlu2 %2325 }
 0x4b8   :  { %v2204_v44 = vpop.permute.xlu0 %2203  ;;  %v2436_v10 = vpop.f32.mrf.mxu0 }
 0x4ba   :  { %v2022_v26 = vpop.permute.xlu1 %2021 }
 0x4bb   :  { %v2042_v6 = vadd.f32 %v2022_v26, %v4019_v32 }
 0x4bd   :  { %v2106_v30 = vadd.f32 %v2086_v13, %v2042_v6 }
 0x4bf   :  { %v2170_v53 = vadd.f32 %v2150_v63, %v2106_v30  ;;  %v2088_v17 = vpop.permute.xlu2 %2087 }
 0x4c0   :  { %v2262_v62 = vpop.permute.xlu0 %2261  ;;  %v2437_v21 = vpop.f32.mrf.mxu0 }
 0x4c1   :  { %v2438_v48 = vadd.f32 %v4082_v51, %v2437_v21 }
 0x4c2   :  { %v2148_v38 = vpop.permute.xlu1 %2147 }
 0x4c3   :  { %v2169_v31 = vadd.f32 %v2148_v38, %v2105_v8  ;;  %v2468_v39 = vmax.f32 %v2438_v48, 0.0 }
 0x4c5   :  { %v2225_v56 = vadd.f32 %v2204_v44, %v2169_v31  ;;  %v2476_v5 = vadd.f32 %v2468_v39, %v3622_v47 }
 0x4c7   :  { %v2281_v34 = vadd.f32 %v2260_v54, %v2225_v56  ;;  %v2154_v4 = vpop.permute.xlu2 %2153  ;;  %v2484_v36 = vmax.f32 %v2476_v5, 0.0 }
 0x4c8   :  { %v2024_v1 = vpop.permute.xlu0 %2023 }
 0x4c9   :  { %v2043_v29 = vadd.f32 %v2024_v1, %v3924_v25  ;;  %v2520_v9 = vrot.slane %v2484_v36, 7 }
 0x4ca   :  { %v2206_v33 = vpop.permute.xlu1 %2205 }
 0x4cb   :  { %v2226_v45 = vadd.f32 %v2206_v33, %v2170_v53  ;;  %v2107_v12 = vadd.f32 %v2088_v17, %v2043_v29 }
 0x4cd   :  { %v2282_v27 = vadd.f32 %v2262_v62, %v2226_v45 }
 0x4cf   :  { %v2346_v32 = vadd.f32 %v2326_v43, %v2282_v27  ;;  %v2264_v22 = vpop.permute.xlu2 %2263 }
 0x4d0   :  { %v2090_v46 = vpop.permute.xlu0 %2089 }
 0x4d2   :  { %v2324_v14 = vpop.permute.xlu1 %2323 }
 0x4d3   :  { %v2345_v60 = vadd.f32 %v2324_v14, %v2281_v34 }
 0x4d5   :  { %v2356_v20 = vpack.c.bf16 %v2346_v32, %v2345_v60 }
 0x4d7   :  { %2455 = vmatmul.bf16.gmra.mxu0 %v2356_v20  ;;  %v2330_v35 = vpop.permute.xlu2 %2329 }
 0x4d8   :  { %v2440_v28 = vpop.f32.mrf.mxu0  ;;  %v2208_v58 = vpop.permute.xlu0 %2207 }
 0x4da   :  { %v2026_v59 = vpop.permute.xlu1 %2025 }
 0x4db   :  { %v2044_v23 = vadd.f32 %v2026_v59, %v4038_v18  ;;  %v2507_v59 = vld [vmem:[%s4169_s11 + $0x78] sm:$0xff] }
 0x4dc   :  { %2542 = vmatpush.msra.mxu1 %v2507_v59 }
 0x4dd   :  { %v2108_v11 = vadd.f32 %v2090_v46, %v2044_v23 }
 0x4df   :  { %v2172_v47 = vadd.f32 %v2154_v4, %v2108_v11 }
 0x4e0   :  { %v2441_v52 = vpop.f32.mrf.mxu0  ;;  %v2266_v63 = vpop.permute.xlu0 %2265 }
 0x4e1   :  { %v2442_v61 = vadd.f32 %v4082_v51, %v2441_v52 }
 0x4e2   :  { %v2152_v15 = vpop.permute.xlu1 %2151 }
 0x4e3   :  { %v2469_v0 = vmax.f32 %v2442_v61, 0.0  ;;  %v2171_v24 = vadd.f32 %v2152_v15, %v2107_v12  ;;  %v2505_v15 = vld [vmem:[%s4169_s11 + $0x68] sm:$0xff]  ;;  %v2504_v12 = vld [vmem:[%s4169_s11 + $0x60] sm:$0xff] }
 0x4e5   :  { %v2477_v19 = vadd.f32 %v2469_v0, %v3650_v7  ;;  %v2227_v54 = vadd.f32 %v2208_v58, %v2171_v24  ;;  %v2092_v7 = vpop.permute.xlu2 %2091  ;;  %v2502_v24 = vld [vmem:[%s4169_s11 + $0x50] sm:$0xff] }
 0x4e7   :  { %v2485_v13 = vmax.f32 %v2477_v19, 0.0  ;;  %v2283_v26 = vadd.f32 %v2264_v22, %v2227_v54 }
 0x4e8   :  { %v2028_v25 = vpop.permute.xlu0 %2027 }
 0x4e9   :  { %v2521_v41 = vrot.slane %v2485_v13, 6  ;;  %v2045_v17 = vadd.f32 %v2028_v25, %v3943_v42  ;;  %v2506_v42 = vld [vmem:[%s4169_s11 + $0x70] sm:$0xff] }
 0x4ea   :  { %v2210_v18 = vpop.permute.xlu1 %2209  ;;  %2543 = vmatpush.msra.mxu1 %v2506_v42 }
 0x4eb   :  { %v2523_v50 = vsel %vm2522_vm0, %v2521_v41, %v2520_v9  ;;  %v2228_v44 = vadd.f32 %v2210_v18, %v2172_v47  ;;  %v2109_v46 = vadd.f32 %v2092_v7, %v2045_v17  ;;  %v2503_v9 = vld [vmem:[%s4169_s11 + $0x58] sm:$0xff]  ;;  %v2497_v7 = vld [vmem:[%s4169_s11 + $0x28] sm:$0xff] }
 0x4ec   :  { %2544 = vmatpush.msra.mxu1 %v2505_v15 }
 0x4ed   :  { %v2284_v10 = vadd.f32 %v2266_v63, %v2228_v44  ;;  %v2158_v1 = vpop.permute.xlu2 %2157 }
 0x4ee   :  { %2545 = vmatpush.msra.mxu1 %v2504_v12 }
 0x4ef   :  { %v2348_v43 = vadd.f32 %v2330_v35, %v2284_v10  ;;  %v2501_v35 = vld [vmem:[%s4169_s11 + $0x48] sm:$0xff] }
 0x4f0   :  { %v2094_v30 = vpop.permute.xlu0 %2093  ;;  %2546 = vmatpush.msra.mxu1 %v2503_v9 }
 0x4f2   :  { %v2328_v62 = vpop.permute.xlu1 %2327  ;;  %2547 = vmatpush.msra.mxu1 %v2502_v24 }
 0x4f3   :  { %v2347_v6 = vadd.f32 %v2328_v62, %v2283_v26  ;;  %v2500_v26 = vld [vmem:[%s4169_s11 + $0x40] sm:$0xff]  ;;  %v2499_v62 = vld [vmem:[%s4169_s11 + $0x38] sm:$0xff] }
 0x4f4   :  { %2548 = vmatpush.msra.mxu1 %v2501_v35 }
 0x4f5   :  { %v2357_v38 = vpack.c.bf16 %v2348_v43, %v2347_v6  ;;  %v2268_v60 = vpop.permute.xlu2 %2267  ;;  %v2498_v43 = vld [vmem:[%s4169_s11 + $0x30] sm:$0xff] }
 0x4f6   :  { %2549 = vmatpush.msra.mxu1 %v2500_v26 }
 0x4f7   :  { %2459 = vmatmul.bf16.gmra.mxu0 %v2357_v38  ;;  %v2496_v38 = vld [vmem:[%s4169_s11 + $0x20] sm:$0xff] }
 0x4f8   :  { %v2444_v49 = vpop.f32.mrf.mxu0  ;;  %v2212_v27 = vpop.permute.xlu0 %2211  ;;  %2550 = vmatpush.msra.mxu1 %v2499_v62 }
 0x4f9   :  { %v2495_v49 = vld [vmem:[%s4169_s11 + $0x18] sm:$0xff] }
 0x4fa   :  { %v2030_v8 = vpop.permute.xlu1 %2029  ;;  %2551 = vmatpush.msra.mxu1 %v2498_v43 }
 0x4fb   :  { %v2046_v53 = vadd.f32 %v2030_v8, %v4059_v55 }
 0x4fc   :  { %2552 = vmatpush.msra.mxu1 %v2497_v7 }
 0x4fd   :  { %v2110_v21 = vadd.f32 %v2094_v30, %v2046_v53  ;;  %v2334_v52 = vpop.permute.xlu2 %2333  ;;  %v2494_v30 = vld [vmem:[%s4169_s11 + $0x10] sm:$0xff]  ;;  %v2492_v53 = vld [vmem:[%s4169_s11] sm:$0xff] }
 0x4fe   :  { %2553 = vmatpush.msra.mxu1 %v2496_v38 }
 0x4ff   :  { %v2174_v4 = vadd.f32 %v2158_v1, %v2110_v21 }
 0x500   :  { %v2445_v31 = vpop.f32.mrf.mxu0  ;;  %v2270_v58 = vpop.permute.xlu0 %2269  ;;  %2554 = vmatpush.msra.mxu1 %v2495_v49 }
 0x501   :  { %v2446_v33 = vadd.f32 %v4082_v51, %v2445_v31  ;;  %v2493_v31 = vld [vmem:[%s4169_s11 + $0x8] sm:$0xff] }
 0x502   :  { %v2156_v45 = vpop.permute.xlu1 %2155  ;;  %2555 = vmatpush.msra.mxu1 %v2494_v30 }
 0x503   :  { %v2470_v56 = vmax.f32 %v2446_v33, 0.0  ;;  %v2173_v20 = vadd.f32 %v2156_v45, %v2109_v46 }
 0x504   :  { %2556 = vmatpush.msra.mxu1 %v2493_v31 }
 0x505   :  { %v2478_v34 = vadd.f32 %v2470_v56, %v3677_v3  ;;  %v2229_v3 = vadd.f32 %v2212_v27, %v2173_v20 }
 0x506   :  { %2557 = vmatpush.msra.mxu1 %v2492_v53 }
 0x507   :  { %v2486_v14 = vmax.f32 %v2478_v34, 0.0  ;;  %v2285_v22 = vadd.f32 %v2268_v60, %v2229_v3 }
 0x509   :  { %v2524_v32 = vrot.slane %v2486_v14, 5 }
 0x50a   :  { %v2214_v28 = vpop.permute.xlu1 %2213 }
 0x50b   :  { %v2526_v48 = vsel %vm2525_vm1, %v2524_v32, %v2523_v50  ;;  %v2230_v55 = vadd.f32 %v2214_v28, %v2174_v4 }
 0x50d   :  { %v2286_v39 = vadd.f32 %v2270_v58, %v2230_v55 }
 0x50f   :  { %v2350_v61 = vadd.f32 %v2334_v52, %v2286_v39  ;;  %v2828_v39 = vld [vmem:[%s4170_s12] ss:$0 sm:$0xff] }
 0x512   :  { %v2332_v5 = vpop.permute.xlu1 %2331 }
 0x513   :  { %v2349_v23 = vadd.f32 %v2332_v5, %v2285_v22 }
 0x515   :  { %v2358_v29 = vpack.c.bf16 %v2350_v61, %v2349_v23 }
 0x517   :  { %2463 = vmatmul.bf16.gmra.mxu0 %v2358_v29 }
 0x518   :  { %v2448_v0 = vpop.f32.mrf.mxu0 }
 0x520   :  { %v2449_v36 = vpop.f32.mrf.mxu0 }
 0x521   :  { %v2450_v11 = vadd.f32 %v4082_v51, %v2449_v36 }
 0x523   :  { %v2471_v19 = vmax.f32 %v2450_v11, 0.0 }
 0x525   :  { %v2479_v63 = vadd.f32 %v2471_v19, %v3712_v2 }
 0x527   :  { %v2487_v13 = vmax.f32 %v2479_v63, 0.0 }
 0x529   :  { %v2527_v41 = vrot.slane %v2487_v13, 4 }
 0x52b   :  { %v2529_v47 = vsel %vm2528_vm2, %v2527_v41, %v2526_v48 }
 0x534   :  { %v2452_v2 = vpop.f32.mrf.mxu0 }
 0x53c   :  { %v2453_v18 = vpop.f32.mrf.mxu0 }
 0x53d   :  { %v2454_v50 = vadd.f32 %v4082_v51, %v2453_v18 }
 0x53f   :  { %v2472_v44 = vmax.f32 %v2454_v50, 0.0 }
 0x541   :  { %v2480_v54 = vadd.f32 %v2472_v44, %v3751_v16 }
 0x543   :  { %v2488_v10 = vmax.f32 %v2480_v54, 0.0 }
 0x545   :  { %v2530_v25 = vrot.slane %v2488_v10, 3 }
 0x547   :  { %v2532_v6 = vsel %vm2531_vm3, %v2530_v25, %v2529_v47 }
 0x554   :  { %v2456_v16 = vpop.f32.mrf.mxu0 }
 0x55c   :  { %v2457_v8 = vpop.f32.mrf.mxu0 }
 0x55d   :  { %v2458_v45 = vadd.f32 %v4082_v51, %v2457_v8 }
 0x55f   :  { %v2473_v56 = vmax.f32 %v2458_v45, 0.0 }
 0x561   :  { %v2481_v34 = vadd.f32 %v2473_v56, %v3784_v40  ;;  %v2562_v40 = vlaneseq }
 0x563   :  { %v2489_v46 = vmax.f32 %v2481_v34, 0.0 }
 0x565   :  { %v2533_v4 = vrot.slane %v2489_v46, 2 }
 0x567   :  { %v2535_v42 = vsel %vm2534_vm4, %v2533_v4, %v2532_v6 }
 0x574   :  { %v2460_v1 = vpop.f32.mrf.mxu0 }
 0x57c   :  { %v2461_v33 = vpop.f32.mrf.mxu0 }
 0x57d   :  { %v2462_v17 = vadd.f32 %v4082_v51, %v2461_v33 }
 0x57f   :  { %v2474_v27 = vmax.f32 %v2462_v17, 0.0 }
 0x581   :  { %v2482_v14 = vadd.f32 %v2474_v27, %v3824_v37  ;;  %v2563_v37 = vand.u32 127, %v2562_v40 }
 0x583   :  { %v2490_v60 = vmax.f32 %v2482_v14, 0.0  ;;  %vm2564_vm7 = vcmp.lt.s32.totalorder %v2563_v37, 3 }
 0x585   :  { %v2536_v48 = vrot.slane %v2490_v60, 1 }
 0x587   :  { %v2538_v3 = vsel %vm2537_vm5, %v2536_v48, %v2535_v42 }
 0x594   :  { %v2464_v21 = vpop.f32.mrf.mxu0 }
 0x59c   :  { %v2465_v32 = vpop.f32.mrf.mxu0 }
 0x59d   :  { %v2466_v20 = vadd.f32 %v4082_v51, %v2465_v32 }
 0x59f   :  { %v2475_v28 = vmax.f32 %v2466_v20, 0.0 }
 0x5a1   :  { %v2483_v55 = vadd.f32 %v2475_v28, %v3858_v57 }
 0x5a3   :  { %v2491_v59 = vmax.f32 %v2483_v55, 0.0 }
 0x5a5   :  { %v2540_v58 = vsel %vm2539_vm6, %v2491_v59, %v2538_v3 }
 0x5a6   :  { %2558 = vmatmul.f32.vlgmr.msra.gmra.mxu1 %v2540_v58 }
 0x623   :  { %v2559_v51 = vpop.f32.mrf.mxu1 }
 0x624   :  { %v2560_v22 = vadd.f32 %v2828_v39, %v2559_v51 }
 0x626   :  { %v2565_v52 = vsel %vm2564_vm7, %v2560_v22, -1e+30 }
 0x627   :  { %2566 = vmax.xlane.f32.xlu0 %v2565_v52 }
 0x69a   :  { %v2567_v5 = vpop.xlane.xlu0 %2566 }
 0x69b   :  { %v2568_v57 = vsub.f32 %v2565_v52, %v2567_v5 }
 0x69d   :  { %v2569_v23 = vmul.f32 1.442695, %v2568_v57 }
 0x69f   :  { %2829 = vpow2.f32 %v2569_v23 }
 0x6a5   :  { %v2830_v61 = vpop.eup %2829 }
 0x6a6   :  { %2571 = vadd.xlane.f32.xlu1 %v2830_v61 }
 0x719   :  { %v2572_v15 = vpop.xlane.xlu1 %2571 }
 0x71a   :  { %2831 = vlog2.f32 %v2572_v15 }
 0x720   :  { %v2832_v29 = vpop.eup %2831 }
 0x721   :  { %v2574_v0 = vmul.f32 0.6931472, %v2832_v29 }
 0x723   :  { %v2575_v36 = vsub.f32 %v2568_v57, %v2574_v0 }
 0x725   :  { %2576 = vst [vmem:[%s4171_s13] sm:$0xff] %v2575_v36 }
 0x726   :  { %2581 = vsyncpa [#allocation4], 1 }
 0x727   :  { %2582 = vsyncpa [#allocation6], 1 }
 0x728   :  { %2583 = vsyncpa [#allocation9], 1 }

</bundles_post_ra>
